<compile_context>
chip_gen: v7x
topology: tpu7x:2x2x1
jax: 0.10.0
libtpu: 0.0.40
codegen_flags: <defaults>
</compile_context>

<pallas_src>
import jax
import jax.numpy as jnp
import numpy as np
from jax import lax
from jax.experimental import pallas as pl
from jax.experimental.pallas import tpu as pltpu

BN_EPS = 1e-5


def _residual_block_kernel(xpad_ref, w1_ref, w2_ref, sb_ref, out_ref):
    """Processes one batch image per grid step.

    xpad_ref: (1, H+4, W+4, C)  input zero-padded by 2 (NHWC, C on lanes)
    w1_ref/w2_ref: (9*C, C)     im2col weight matrices, K ordered (kh, kw, cin)
    sb_ref:  (4, C)             rows = [scale1, bias1, scale2, bias2] (BN folded)
    out_ref: (1, H*W, C)        output block (lane-dense when C % 128 == 0)
    """
    _, Hp2, Wp2, C = xpad_ref.shape
    Hp, Wp = Hp2 - 2, Wp2 - 2          # extended conv1 grid = (H+2, W+2)
    H, W = Hp - 2, Wp - 2
    M1 = Hp * Wp
    M2 = H * W

    mm_dtype = w1_ref.dtype

    # ---- conv1: single im2col matmul over the extended (H+2)x(W+2) grid ----
    cols1 = [
        xpad_ref[0, kh:kh + Hp, kw:kw + Wp, :].reshape(M1, C)
        for kh in range(3) for kw in range(3)
    ]
    patches1 = jnp.concatenate(cols1, axis=-1).astype(mm_dtype)      # (M1, 9C)
    h = jnp.dot(patches1, w1_ref[...], preferred_element_type=jnp.float32)

    # bn1 (folded, eval mode) + relu
    h = h * sb_ref[0:1, :] + sb_ref[1:2, :]
    h = jnp.maximum(h, 0.0)

    # Zero the 1-pixel ring: the reshaped result is then exactly conv2's
    # zero-padded input (no scratch re-pad / border store pass needed).
    h3 = h.reshape(Hp, Wp, C)
    row = lax.broadcasted_iota(jnp.int32, (Hp, Wp, C), 0)
    col = lax.broadcasted_iota(jnp.int32, (Hp, Wp, C), 1)
    interior = (row >= 1) & (row <= H) & (col >= 1) & (col <= W)
    h3 = jnp.where(interior, h3, 0.0)

    # ---- conv2: single im2col matmul ----
    cols2 = [
        h3[kh:kh + H, kw:kw + W, :].reshape(M2, C)
        for kh in range(3) for kw in range(3)
    ]
    patches2 = jnp.concatenate(cols2, axis=-1).astype(mm_dtype)      # (M2, 9C)
    y = jnp.dot(patches2, w2_ref[...], preferred_element_type=jnp.float32)

    # bn2 (folded) + residual add + relu
    y = y * sb_ref[2:3, :] + sb_ref[3:4, :]
    residual = xpad_ref[0, 2:2 + H, 2:2 + W, :].reshape(M2, C)
    y = jnp.maximum(y + residual.astype(jnp.float32), 0.0)

    out_ref[...] = y.reshape(1, M2, C)


def residual_block_pallas(x_nchw, params, *, matmul_dtype=jnp.float32):
    """Pallas ResidualBlock forward (PyTorch eval-mode semantics), NCHW in/out.

    Set matmul_dtype=jnp.bfloat16 on v6e/v7x for native-MXU throughput
    (accumulation stays f32; relax the comparison tolerance accordingly).
    """
    (w1, b1, g1, be1, m1, v1, w2, b2, g2, be2, m2, v2) = params
    N, C, H, W = x_nchw.shape

    # Fold BN (eval mode) + conv bias into per-channel scale / bias.
    s1 = g1 / jnp.sqrt(v1 + BN_EPS)
    t1 = (b1 - m1) * s1 + be1
    s2 = g2 / jnp.sqrt(v2 + BN_EPS)
    t2 = (b2 - m2) * s2 + be2
    sb = jnp.stack([s1, t1, s2, t2]).astype(jnp.float32)             # (4, C)

    # OIHW conv weights -> (9*C, C) im2col matrices, K ordered (kh, kw, cin).
    w1_mat = jnp.transpose(w1, (2, 3, 1, 0)).reshape(9 * C, C).astype(matmul_dtype)
    w2_mat = jnp.transpose(w2, (2, 3, 1, 0)).reshape(9 * C, C).astype(matmul_dtype)

    # NCHW -> NHWC, zero-pad spatial dims by 2 (1 for conv1's own padding plus
    # 1 so conv1 can be evaluated on the extended grid that directly becomes
    # conv2's padded input).
    x_nhwc = jnp.transpose(x_nchw, (0, 2, 3, 1)).astype(matmul_dtype)
    xpad = jnp.pad(x_nhwc, ((0, 0), (2, 2), (2, 2), (0, 0)))

    Hp2, Wp2 = H + 4, W + 4
    isz = jnp.dtype(matmul_dtype).itemsize

    # Explicit VMEM budget: gridded blocks (x2 for double buffering) + temps.
    block_bytes = (Hp2 * Wp2 * C * isz            # padded-input block
                   + 2 * 9 * C * C * isz          # both weight matrices
                   + 4 * C * 4                    # folded scale/bias
                   + H * W * C * 4)               # output block
    tmp_bytes = (((H + 2) * (W + 2) + H * W) * 9 * C * isz    # im2col patches
                 + ((H + 2) * (W + 2) + 2 * H * W) * C * 4)   # h / y / residual
    vmem_limit = int(min(112 << 20, max(16 << 20, 2 * block_bytes + 2 * tmp_bytes)))

    out = pl.pallas_call(
        _residual_block_kernel,
        out_shape=jax.ShapeDtypeStruct((N, H * W, C), jnp.float32),
        grid=(N,),
        in_specs=[
            pl.BlockSpec((1, Hp2, Wp2, C), lambda n: (n, 0, 0, 0)),
            pl.BlockSpec((9 * C, C), lambda n: (0, 0)),
            pl.BlockSpec((9 * C, C), lambda n: (0, 0)),
            pl.BlockSpec((4, C), lambda n: (0, 0)),
        ],
        out_specs=pl.BlockSpec((1, H * W, C), lambda n: (n, 0, 0)),
        compiler_params=pltpu.CompilerParams(
            dimension_semantics=("parallel",),     # shard batch across v7x TCs
            vmem_limit_bytes=vmem_limit,
        ),
    )(xpad, w1_mat, w2_mat, sb)

    # (N, H*W, C) -> NCHW to match the PyTorch module output.
    return jnp.transpose(out.reshape(N, H, W, C), (0, 3, 1, 2))


def residual_block_ref(x, params):
    """Pure-JAX reference matching the PyTorch module in eval() mode."""
    (w1, b1, g1, be1, m1, v1, w2, b2, g2, be2, m2, v2) = params

    def conv(xx, w, b):
        y = lax.conv_general_dilated(
            xx, w, window_strides=(1, 1), padding=((1, 1), (1, 1)),
            dimension_numbers=("NCHW", "OIHW", "NCHW"),
            precision=lax.Precision.HIGHEST)
        return y + b[None, :, None, None]

    def bn(xx, g, be, m, v):
        return ((xx - m[None, :, None, None])
                / jnp.sqrt(v + BN_EPS)[None, :, None, None]
                * g[None, :, None, None] + be[None, :, None, None])

    h = jax.nn.relu(bn(conv(x, w1, b1), g1, be1, m1, v1))
    y = bn(conv(h, w2, b2), g2, be2, m2, v2)
    return jax.nn.relu(y + x)


if __name__ == "__main__":
    # Chess-engine-like shapes: batch=4, channels=128, 8x8 board (NCHW).
    # C=128 keeps the channel (lane) axis fully dense on TPU.
    N, C, H, W = 4, 128, 8, 8
    key = jax.random.PRNGKey(0)
    ks = jax.random.split(key, 13)

    x = jax.random.normal(ks[0], (N, C, H, W), jnp.float32)

    # Deterministic synthetic parameters (PyTorch shapes: Conv2d OIHW, BN per-C).
    w1 = 0.1 * jax.random.normal(ks[1], (C, C, 3, 3), jnp.float32)
    b1 = 0.1 * jax.random.normal(ks[2], (C,), jnp.float32)
    g1 = 1.0 + 0.1 * jax.random.normal(ks[3], (C,), jnp.float32)
    be1 = 0.1 * jax.random.normal(ks[4], (C,), jnp.float32)
    m1 = 0.1 * jax.random.normal(ks[5], (C,), jnp.float32)
    v1 = jax.random.uniform(ks[6], (C,), jnp.float32, 0.5, 1.5)

    w2 = 0.1 * jax.random.normal(ks[7], (C, C, 3, 3), jnp.float32)
    b2 = 0.1 * jax.random.normal(ks[8], (C,), jnp.float32)
    g2 = 1.0 + 0.1 * jax.random.normal(ks[9], (C,), jnp.float32)
    be2 = 0.1 * jax.random.normal(ks[10], (C,), jnp.float32)
    m2 = 0.1 * jax.random.normal(ks[11], (C,), jnp.float32)
    v2 = jax.random.uniform(ks[12], (C,), jnp.float32, 0.5, 1.5)

    params = (w1, b1, g1, be1, m1, v1, w2, b2, g2, be2, m2, v2)

    out = jax.block_until_ready(residual_block_pallas(x, params))
    ref = jax.block_until_ready(residual_block_ref(x, params))

    assert out.shape == x.shape and out.dtype == jnp.float32
    np.testing.assert_allclose(np.asarray(out), np.asarray(ref),
                               rtol=1e-3, atol=1e-3)
    print("KERNEL_OK")
</pallas_src>

<mosaic_0001>
module attributes {stable_mosaic.version = 11 : i64} {
  func.func @_residual_block_kernel(%arg0: i32, %arg1: memref<1x12x12x128xf32, #tpu.memory_space<vmem>>, %arg2: memref<1152x128xf32, #tpu.memory_space<vmem>>, %arg3: memref<1152x128xf32, #tpu.memory_space<vmem>>, %arg4: memref<4x128xf32, #tpu.memory_space<vmem>>, %arg5: memref<1x64x128xf32, #tpu.memory_space<vmem>>) attributes {dimension_semantics = [#tpu.dimension_semantics<parallel>], iteration_bounds = array<i64: 4>, scalar_prefetch = 0 : i64, scratch_operands = 0 : i64, tpu.core_type = #tpu.core_type<tc>, window_params = [{transform_indices = @transform_0, window_bounds = array<i64: 1, 12, 12, 128>}, {pipeline_mode = #tpu.pipeline_mode<synchronous>, transform_indices = @transform_1, window_bounds = array<i64: 1152, 128>}, {pipeline_mode = #tpu.pipeline_mode<synchronous>, transform_indices = @transform_2, window_bounds = array<i64: 1152, 128>}, {pipeline_mode = #tpu.pipeline_mode<synchronous>, transform_indices = @transform_3, window_bounds = array<i64: 4, 128>}, {transform_indices = @transform_4, window_bounds = array<i64: 1, 64, 128>}]} {
    %c0 = arith.constant 0 : index
    %c0_0 = arith.constant 0 : index
    %c0_1 = arith.constant 0 : index
    %c0_2 = arith.constant 0 : index
    %0 = vector.load %arg1[%c0, %c0_0, %c0_1, %c0_2] : memref<1x12x12x128xf32, #tpu.memory_space<vmem>>, vector<1x10x10x128xf32>
    %1 = vector.shape_cast %0 : vector<1x10x10x128xf32> to vector<10x10x128xf32>
    %2 = vector.shape_cast %1 : vector<10x10x128xf32> to vector<100x128xf32>
    %c0_3 = arith.constant 0 : index
    %c0_4 = arith.constant 0 : index
    %c1 = arith.constant 1 : index
    %c0_5 = arith.constant 0 : index
    %3 = vector.load %arg1[%c0_3, %c0_4, %c1, %c0_5] : memref<1x12x12x128xf32, #tpu.memory_space<vmem>>, vector<1x10x10x128xf32>
    %4 = vector.shape_cast %3 : vector<1x10x10x128xf32> to vector<10x10x128xf32>
    %5 = vector.shape_cast %4 : vector<10x10x128xf32> to vector<100x128xf32>
    %c0_6 = arith.constant 0 : index
    %c0_7 = arith.constant 0 : index
    %c2 = arith.constant 2 : index
    %c0_8 = arith.constant 0 : index
    %6 = vector.load %arg1[%c0_6, %c0_7, %c2, %c0_8] : memref<1x12x12x128xf32, #tpu.memory_space<vmem>>, vector<1x10x10x128xf32>
    %7 = vector.shape_cast %6 : vector<1x10x10x128xf32> to vector<10x10x128xf32>
    %8 = vector.shape_cast %7 : vector<10x10x128xf32> to vector<100x128xf32>
    %c0_9 = arith.constant 0 : index
    %c1_10 = arith.constant 1 : index
    %c0_11 = arith.constant 0 : index
    %c0_12 = arith.constant 0 : index
    %9 = vector.load %arg1[%c0_9, %c1_10, %c0_11, %c0_12] : memref<1x12x12x128xf32, #tpu.memory_space<vmem>>, vector<1x10x10x128xf32>
    %10 = vector.shape_cast %9 : vector<1x10x10x128xf32> to vector<10x10x128xf32>
    %11 = vector.shape_cast %10 : vector<10x10x128xf32> to vector<100x128xf32>
    %c0_13 = arith.constant 0 : index
    %c1_14 = arith.constant 1 : index
    %c1_15 = arith.constant 1 : index
    %c0_16 = arith.constant 0 : index
    %12 = vector.load %arg1[%c0_13, %c1_14, %c1_15, %c0_16] : memref<1x12x12x128xf32, #tpu.memory_space<vmem>>, vector<1x10x10x128xf32>
    %13 = vector.shape_cast %12 : vector<1x10x10x128xf32> to vector<10x10x128xf32>
    %14 = vector.shape_cast %13 : vector<10x10x128xf32> to vector<100x128xf32>
    %c0_17 = arith.constant 0 : index
    %c1_18 = arith.constant 1 : index
    %c2_19 = arith.constant 2 : index
    %c0_20 = arith.constant 0 : index
    %15 = vector.load %arg1[%c0_17, %c1_18, %c2_19, %c0_20] : memref<1x12x12x128xf32, #tpu.memory_space<vmem>>, vector<1x10x10x128xf32>
    %16 = vector.shape_cast %15 : vector<1x10x10x128xf32> to vector<10x10x128xf32>
    %17 = vector.shape_cast %16 : vector<10x10x128xf32> to vector<100x128xf32>
    %c0_21 = arith.constant 0 : index
    %c2_22 = arith.constant 2 : index
    %c0_23 = arith.constant 0 : index
    %c0_24 = arith.constant 0 : index
    %18 = vector.load %arg1[%c0_21, %c2_22, %c0_23, %c0_24] : memref<1x12x12x128xf32, #tpu.memory_space<vmem>>, vector<1x10x10x128xf32>
    %19 = vector.shape_cast %18 : vector<1x10x10x128xf32> to vector<10x10x128xf32>
    %20 = vector.shape_cast %19 : vector<10x10x128xf32> to vector<100x128xf32>
    %c0_25 = arith.constant 0 : index
    %c2_26 = arith.constant 2 : index
    %c1_27 = arith.constant 1 : index
    %c0_28 = arith.constant 0 : index
    %21 = vector.load %arg1[%c0_25, %c2_26, %c1_27, %c0_28] : memref<1x12x12x128xf32, #tpu.memory_space<vmem>>, vector<1x10x10x128xf32>
    %22 = vector.shape_cast %21 : vector<1x10x10x128xf32> to vector<10x10x128xf32>
    %23 = vector.shape_cast %22 : vector<10x10x128xf32> to vector<100x128xf32>
    %c0_29 = arith.constant 0 : index
    %c2_30 = arith.constant 2 : index
    %c2_31 = arith.constant 2 : index
    %c0_32 = arith.constant 0 : index
    %24 = vector.load %arg1[%c0_29, %c2_30, %c2_31, %c0_32] : memref<1x12x12x128xf32, #tpu.memory_space<vmem>>, vector<1x10x10x128xf32>
    %25 = vector.shape_cast %24 : vector<1x10x10x128xf32> to vector<10x10x128xf32>
    %26 = vector.shape_cast %25 : vector<10x10x128xf32> to vector<100x128xf32>
    %27 = tpu.concatenate %2, %5, %8, %11, %14, %17, %20, %23, %26 in 1 : vector<100x128xf32>, vector<100x128xf32>, vector<100x128xf32>, vector<100x128xf32>, vector<100x128xf32>, vector<100x128xf32>, vector<100x128xf32>, vector<100x128xf32>, vector<100x128xf32> -> vector<100x1152xf32>
    %c0_33 = arith.constant 0 : index
    %c0_34 = arith.constant 0 : index
    %28 = vector.load %arg2[%c0_33, %c0_34] : memref<1152x128xf32, #tpu.memory_space<vmem>>, vector<1152x128xf32>
    %cst = arith.constant dense<0.000000e+00> : vector<100x128xf32>
    %29 = tpu.matmul %27, %28, %cst {dimension_numbers = #tpu.dot_dimension_numbers<[1], [0], [0], [1], [0, 0, 1, 1], [], []>} : vector<100x1152xf32>, vector<1152x128xf32>, vector<100x128xf32> -> vector<100x128xf32>
    %c0_35 = arith.constant 0 : index
    %c0_36 = arith.constant 0 : index
    %30 = vector.load %arg4[%c0_35, %c0_36] : memref<4x128xf32, #tpu.memory_space<vmem>>, vector<1x128xf32>
    %31 = vector.broadcast %30 : vector<1x128xf32> to vector<100x128xf32>
    %32 = arith.mulf %29, %31 : vector<100x128xf32>
    %c1_37 = arith.constant 1 : index
    %c0_38 = arith.constant 0 : index
    %33 = vector.load %arg4[%c1_37, %c0_38] : memref<4x128xf32, #tpu.memory_space<vmem>>, vector<1x128xf32>
    %34 = vector.broadcast %33 : vector<1x128xf32> to vector<100x128xf32>
    %35 = arith.addf %32, %34 : vector<100x128xf32>
    %cst_39 = arith.constant 0.000000e+00 : f32
    %36 = vector.broadcast %cst_39 : f32 to vector<100x128xf32>
    %37 = arith.maximumf %35, %36 : vector<100x128xf32>
    %38 = vector.shape_cast %37 : vector<100x128xf32> to vector<10x10x128xf32>
    %39 = tpu.iota {dimensions = array<i32: 0>} : vector<10x10x128xi32>
    %40 = tpu.iota {dimensions = array<i32: 1>} : vector<10x10x128xi32>
    %c1_i32 = arith.constant 1 : i32
    %41 = vector.broadcast %c1_i32 : i32 to vector<10x10x128xi32>
    %42 = arith.cmpi sge, %39, %41 : vector<10x10x128xi32>
    %c8_i32 = arith.constant 8 : i32
    %43 = vector.broadcast %c8_i32 : i32 to vector<10x10x128xi32>
    %44 = arith.cmpi sle, %39, %43 : vector<10x10x128xi32>
    %45 = arith.andi %42, %44 : vector<10x10x128xi1>
    %c1_i32_40 = arith.constant 1 : i32
    %46 = vector.broadcast %c1_i32_40 : i32 to vector<10x10x128xi32>
    %47 = arith.cmpi sge, %40, %46 : vector<10x10x128xi32>
    %48 = arith.andi %45, %47 : vector<10x10x128xi1>
    %c8_i32_41 = arith.constant 8 : i32
    %49 = vector.broadcast %c8_i32_41 : i32 to vector<10x10x128xi32>
    %50 = arith.cmpi sle, %40, %49 : vector<10x10x128xi32>
    %51 = arith.andi %48, %50 : vector<10x10x128xi1>
    %cst_42 = arith.constant 0.000000e+00 : f32
    %52 = vector.broadcast %cst_42 : f32 to vector<10x10x128xf32>
    %53 = arith.select %51, %38, %52 : vector<10x10x128xi1>, vector<10x10x128xf32>
    %54 = vector.extract_strided_slice %53 {offsets = [0, 0, 0], sizes = [8, 8, 128], strides = [1, 1, 1]} : vector<10x10x128xf32> to vector<8x8x128xf32>
    %55 = vector.shape_cast %54 : vector<8x8x128xf32> to vector<64x128xf32>
    %56 = vector.extract_strided_slice %53 {offsets = [0, 1, 0], sizes = [8, 8, 128], strides = [1, 1, 1]} : vector<10x10x128xf32> to vector<8x8x128xf32>
    %57 = vector.shape_cast %56 : vector<8x8x128xf32> to vector<64x128xf32>
    %58 = vector.extract_strided_slice %53 {offsets = [0, 2, 0], sizes = [8, 8, 128], strides = [1, 1, 1]} : vector<10x10x128xf32> to vector<8x8x128xf32>
    %59 = vector.shape_cast %58 : vector<8x8x128xf32> to vector<64x128xf32>
    %60 = vector.extract_strided_slice %53 {offsets = [1, 0, 0], sizes = [8, 8, 128], strides = [1, 1, 1]} : vector<10x10x128xf32> to vector<8x8x128xf32>
    %61 = vector.shape_cast %60 : vector<8x8x128xf32> to vector<64x128xf32>
    %62 = vector.extract_strided_slice %53 {offsets = [1, 1, 0], sizes = [8, 8, 128], strides = [1, 1, 1]} : vector<10x10x128xf32> to vector<8x8x128xf32>
    %63 = vector.shape_cast %62 : vector<8x8x128xf32> to vector<64x128xf32>
    %64 = vector.extract_strided_slice %53 {offsets = [1, 2, 0], sizes = [8, 8, 128], strides = [1, 1, 1]} : vector<10x10x128xf32> to vector<8x8x128xf32>
    %65 = vector.shape_cast %64 : vector<8x8x128xf32> to vector<64x128xf32>
    %66 = vector.extract_strided_slice %53 {offsets = [2, 0, 0], sizes = [8, 8, 128], strides = [1, 1, 1]} : vector<10x10x128xf32> to vector<8x8x128xf32>
    %67 = vector.shape_cast %66 : vector<8x8x128xf32> to vector<64x128xf32>
    %68 = vector.extract_strided_slice %53 {offsets = [2, 1, 0], sizes = [8, 8, 128], strides = [1, 1, 1]} : vector<10x10x128xf32> to vector<8x8x128xf32>
    %69 = vector.shape_cast %68 : vector<8x8x128xf32> to vector<64x128xf32>
    %70 = vector.extract_strided_slice %53 {offsets = [2, 2, 0], sizes = [8, 8, 128], strides = [1, 1, 1]} : vector<10x10x128xf32> to vector<8x8x128xf32>
    %71 = vector.shape_cast %70 : vector<8x8x128xf32> to vector<64x128xf32>
    %72 = tpu.concatenate %55, %57, %59, %61, %63, %65, %67, %69, %71 in 1 : vector<64x128xf32>, vector<64x128xf32>, vector<64x128xf32>, vector<64x128xf32>, vector<64x128xf32>, vector<64x128xf32>, vector<64x128xf32>, vector<64x128xf32>, vector<64x128xf32> -> vector<64x1152xf32>
    %c0_43 = arith.constant 0 : index
    %c0_44 = arith.constant 0 : index
    %73 = vector.load %arg3[%c0_43, %c0_44] : memref<1152x128xf32, #tpu.memory_space<vmem>>, vector<1152x128xf32>
    %cst_45 = arith.constant dense<0.000000e+00> : vector<64x128xf32>
    %74 = tpu.matmul %72, %73, %cst_45 {dimension_numbers = #tpu.dot_dimension_numbers<[1], [0], [0], [1], [0, 0, 1, 1], [], []>} : vector<64x1152xf32>, vector<1152x128xf32>, vector<64x128xf32> -> vector<64x128xf32>
    %c2_46 = arith.constant 2 : index
    %c0_47 = arith.constant 0 : index
    %75 = vector.load %arg4[%c2_46, %c0_47] : memref<4x128xf32, #tpu.memory_space<vmem>>, vector<1x128xf32>
    %76 = vector.broadcast %75 : vector<1x128xf32> to vector<64x128xf32>
    %77 = arith.mulf %74, %76 : vector<64x128xf32>
    %c3 = arith.constant 3 : index
    %c0_48 = arith.constant 0 : index
    %78 = vector.load %arg4[%c3, %c0_48] : memref<4x128xf32, #tpu.memory_space<vmem>>, vector<1x128xf32>
    %79 = vector.broadcast %78 : vector<1x128xf32> to vector<64x128xf32>
    %80 = arith.addf %77, %79 : vector<64x128xf32>
    %c0_49 = arith.constant 0 : index
    %c2_50 = arith.constant 2 : index
    %c2_51 = arith.constant 2 : index
    %c0_52 = arith.constant 0 : index
    %81 = vector.load %arg1[%c0_49, %c2_50, %c2_51, %c0_52] : memref<1x12x12x128xf32, #tpu.memory_space<vmem>>, vector<1x8x8x128xf32>
    %82 = vector.shape_cast %81 : vector<1x8x8x128xf32> to vector<8x8x128xf32>
    %83 = vector.shape_cast %82 : vector<8x8x128xf32> to vector<64x128xf32>
    %84 = arith.addf %80, %83 : vector<64x128xf32>
    %cst_53 = arith.constant 0.000000e+00 : f32
    %85 = vector.broadcast %cst_53 : f32 to vector<64x128xf32>
    %86 = arith.maximumf %84, %85 : vector<64x128xf32>
    %87 = vector.shape_cast %86 : vector<64x128xf32> to vector<1x64x128xf32>
    %c0_54 = arith.constant 0 : index
    %c0_55 = arith.constant 0 : index
    %c0_56 = arith.constant 0 : index
    %88 = vector.load %arg5[%c0_54, %c0_55, %c0_56] : memref<1x64x128xf32, #tpu.memory_space<vmem>>, vector<1x64x128xf32>
    tpu.vector_store %arg5[%c0_54, %c0_55, %c0_56], %87 {strides = array<i32>} : memref<1x64x128xf32, #tpu.memory_space<vmem>>, vector<1x64x128xf32>,
    return
  }
  func.func @transform_0(%arg0: i32) -> (i32, i32, i32, i32) {
    %c0_i32 = arith.constant 0 : i32
    %c0_i32_0 = arith.constant 0 : i32
    %c0_i32_1 = arith.constant 0 : i32
    %c0_i32_2 = arith.constant 0 : i32
    return %arg0, %c0_i32, %c0_i32_0, %c0_i32_1 : i32, i32, i32, i32
  }
  func.func @transform_1(%arg0: i32) -> (i32, i32) {
    %c0_i32 = arith.constant 0 : i32
    %c0_i32_0 = arith.constant 0 : i32
    %c0_i32_1 = arith.constant 0 : i32
    return %c0_i32, %c0_i32_0 : i32, i32
  }
  func.func @transform_2(%arg0: i32) -> (i32, i32) {
    %c0_i32 = arith.constant 0 : i32
    %c0_i32_0 = arith.constant 0 : i32
    %c0_i32_1 = arith.constant 0 : i32
    return %c0_i32, %c0_i32_0 : i32, i32
  }
  func.func @transform_3(%arg0: i32) -> (i32, i32) {
    %c0_i32 = arith.constant 0 : i32
    %c0_i32_0 = arith.constant 0 : i32
    %c0_i32_1 = arith.constant 0 : i32
    return %c0_i32, %c0_i32_0 : i32, i32
  }
  func.func @transform_4(%arg0: i32) -> (i32, i32, i32) {
    %c0_i32 = arith.constant 0 : i32
    %c0_i32_0 = arith.constant 0 : i32
    %c0_i32_1 = arith.constant 0 : i32
    return %arg0, %c0_i32, %c0_i32_0 : i32, i32, i32
  }
}

</mosaic_0001>

<bundles_post_ra>
// kernel: tpu_custom_call.1
= control target key start
LH: loop header
LB: loop body
LE: loop exit
PB: predicated region body
PF: predicated region fallthrough
CT: control target
= control target key end

     0   :  { %9 = vsyncpa [#allocation3], 0  ;;  %s10686_s0 = inlined_call_operand.vmem [shape: f32[4,12,12,128], index: 0, kind: input, shape index: {}]   ;;  %s10687_s1 = inlined_call_operand.vmem [shape: f32[1152,128], index: 1, kind: input, shape index: {}]   ;;  %s10688_s2 = inlined_call_operand.hbm [shape: f32[1152,128], index: 2, kind: input, shape index: {}]   ;;  %s10689_s3 = inlined_call_operand.vmem [shape: f32[4,128], index: 3, kind: input, shape index: {}]   ;;  %s10690_s4 = inlined_call_operand.hbm [shape: f32[4,64,128], index: 4, kind: output, shape index: {}]  }
   0x1   :  { %10 = vsyncpa [#allocation4], 0 }
   0x2   :  { %12 = vsyncpa [#allocation4 + $0x1], 0  ;;  %s8539_s15 = smov 0   ;;  %s8541_s16 = smov 0  }
   0x3   :  { %s8543_s17 = smov 0   ;;  %s8545_s18 = smov 0  }
   0x4 LB: > { %s8560_s19 = sadd.s32 4294967295, %s8502_s18   ;;  %s7038_s20 = sadd.s32 4294967294, %s8502_s18   ;;  %s8502_s18 = sphi %s8545_s18, %s10706_s18   ;;  %s8498_s17 = sphi %s8543_s17, %s10705_s17   ;;  %s8494_s16 = sphi %s8541_s16, %s10704_s16   ;;  %s8490_s15 = sphi %s8539_s15, %s10703_s15  }
   0x5   : > { %s8564_s21 = sadd.s32 1, %s8502_s18   ;;  %s114_s22 = sadd.s32 1, %s8498_s17 }
   0x6   : > { %s111_s23 = ssub.s32 %s8502_s18, %s8564_s21  ;;  %p124_p0 = scmp.ne.s32.totalorder %s8498_s17, %s8494_s16 }
   0x7   : > { %p112_p1 = scmp.eq.s32.totalorder %s111_s23, 0  ;;  %p125_p2 = scmp.eq.s32.totalorder %s8560_s19, 3 }
   0x8   : > { %p130_p3 = scmp.ne.s32.totalorder %s8494_s16, %s8490_s15  ;;  %p131_p4 = scmp.eq.s32.totalorder %s7038_s20, 3 }
   0x9   : > { %s8575_s24 = scalar_select %p112_p1, %s8498_s17, %s114_s22  }
   0xa   : > { %p8577_p5 = por %p125_p2, %p124_p0  ;;  %p8581_p6 = por %p131_p4, %p130_p3 }
   0xb   : > { %p7039_p7 = scmp.ge.s32.totalorder %s8502_s18, 1  ;;  %p138_p8 = scmp.lt.s32.totalorder %s8502_s18, 5 }
   0xc   : > { %s10694_s25 = scalar_select %p8577_p5, 1, 0 }
   0xd   : > { %s10695_s26 = scalar_select %p8581_p6, 1, 0 }
   0xe   : > { %p10691_p9 = scmp.eq.s32.totalorder %s8560_s19, 0  ;;  %p8588_p10 = pnand %p7039_p7, %p138_p8 }
   0xf   : > { %s8504_s28 = smov [#allocation2]   ;;  %s8408_s7 = scalar_lea.hbm %s10688_s2, 18432 }
  0x10   : > { %s10696_s27 = scalar_select %p8588_p10, 1, 0 }
  0x11   : > { %s153_s29 = sshll.u32 %s8504_s28, 4  ;;  %p8291_p11 = pneg %p8588_p10  ;;  %s154_s29 = int_to_ptr.vmem [resolvable:$true] %s153_s29 }
  0x12   : > { %p8409_p13 = scmp.ne.s32.totalorder %s10688_s2, %s8408_s7  ;;  %p8415_p3 = scmp.lt.u32.totalorder %s8408_s7, %s10688_s2 }
  0x13   : > { %p8596_p12 = pnand %p10691_p9, %p8291_p11 }
  0x15   : > { %p8410_p0 = pneg %p8596_p12 }
  0x17   : > { %p8411_p1 = pnand %p8410_p0, %p8409_p13 }
  0x19   : > { %p8412_p2 = pneg %p8411_p1 }
  0x1b   : > { %p8417_p4 = pnand %p8415_p3, %p8412_p2 }
  0x1d   : > { %8420 = shalt.err (!%p8417_p4)
}
  0x1e   : > { %s8421_s12 = scalar_lea.vmem %s154_s29, 18432  ;;  %p8429_p9 = scmp.lt.s32.totalorder %s154_s29, %s154_s29 }
  0x1f   : > { %p8422_p7 = scmp.ne.s32.totalorder %s154_s29, %s8421_s12  ;;  %p8430_p6 = scmp.lt.s32.totalorder %s8421_s12, %s8421_s12 }
  0x21   : > { %p8424_p8 = pnand %p8422_p7, %p8410_p0  ;;  %p8431_p5 = por %p8430_p6, %p8429_p9 }
  0x23   : > { %p8425_p11 = pneg %p8424_p8 }
  0x25   : > { %p8432_p10 = pnand %p8431_p5, %p8425_p11 }
  0x27   : > { %8435 = shalt.err (!%p8432_p10)
}
  0x28   : > { %s8505_s13 = smov 128   ;;  %s8506_s14 = smov 8  }
  0x29   : > { %8294 = dma.hbm_to_vmem [thread:$0]  (!%p8596_p12), %s10688_s2, 18432, %s154_s29, [#allocation3], %s8505_s13, %s8505_s13, %s8506_s14  }
  0x2a   : > { %p10698_p13 = scmp.ne.s32.totalorder %s10696_s27, 0 }
  0x2b   : > { %p10699_p1 = scmp.eq.s32.totalorder (!%p10698_p13), %s8560_s19, 0 }
  0x2c   : > { %180 = sbr.rel (%p10698_p13) target bundleno = 886 (0x376), region = 36 }
  0x33   : > { %8481 = dma.done.wait (%p10699_p1), [#allocation3], 18432   ;;  %p10700_p0 = pmov %p10699_p1 }
  0x34   : > { %v4774_v0 = vld [vmem:[%s10687_s1 + $0x80] sm:$0xff]  ;;  %v4775_v1 = vld [vmem:[%s10687_s1 + $0x88] sm:$0xff]  ;;  %v4776_v11 = vld [vmem:[%s10687_s1 + $0x90] sm:$0xff]  ;;  %p206_p5 = scmp.lt.s32.totalorder %s8560_s19, 3  ;;  %v8507_v47 = vmov 1983009808   ;;  %v255_v49 = vlaneseq }
  0x35   : > { %8483 = vsyncadd (%p10700_p0), [#allocation3], 4294948864  ;;  %v4806_v2 = vld [vmem:[%s10687_s1 + $0x180] sm:$0xff]  ;;  %v7972_v3 = vpack.c.bf16 %v4775_v1, %v4774_v0  ;;  %v4807_v4 = vld [vmem:[%s10687_s1 + $0x188] sm:$0xff]  ;;  %v253_v48 = vunpack.c.l.s4 %v8507_v47  ;;  %vm8509_vm0 = vmmov 0   ;;  %vm6137_vm3 = vcmask 1046528  }
  0x36   : > { %v4758_v5 = vld [vmem:[%s10687_s1] sm:$0xff]  ;;  %v4759_v6 = vld [vmem:[%s10687_s1 + $0x8] sm:$0xff]  ;;  %v8004_v7 = vpack.c.bf16 %v4807_v4, %v4806_v2  ;;  %v4777_v13 = vld [vmem:[%s10687_s1 + $0x98] sm:$0xff]  ;;  %s8725_s20 = scalar_select %p206_p5, %s8560_s19, 3  ;;  %vm6170_vm4 = vcmask 1045504  }
  0x37   : > { %v7974_v8 = vpack.c.bf16 %v4759_v6, %v4758_v5  ;;  %v4790_v9 = vld [vmem:[%s10687_s1 + $0x100] sm:$0xff]  ;;  %v4791_v10 = vld [vmem:[%s10687_s1 + $0x108] sm:$0xff]  ;;  %7973 = vmatprep.subr.bf16.mxu0 %v7972_v3  ;;  %v4808_v14 = vld [vmem:[%s10687_s1 + $0x190] sm:$0xff]  ;;  %v7976_v16 = vpack.c.bf16 %v4777_v13, %v4776_v11  ;;  %v254_v2 = vunpack.c.0.s8 %v253_v48  ;;  %v8764_v3 = vshrl.u32 %v255_v49, 7  ;;  %s203_s27 = sand.u32 1, %s8494_s16   ;;  %s7295_s11 = sshll.u32 %s8560_s19, 10 }
  0x38   : > { %v8006_v12 = vpack.c.bf16 %v4791_v10, %v4790_v9  ;;  %v4809_v15 = vld [vmem:[%s10687_s1 + $0x198] sm:$0xff]  ;;  %8005 = vmatprep.subr.bf16.mxu1 %v8004_v7  ;;  %v4760_v18 = vld [vmem:[%s10687_s1 + $0x10] sm:$0xff]  ;;  %v4778_v23 = vld [vmem:[%s10687_s1 + $0xa0] sm:$0xff]  ;;  %s8284_s29 = smul.u32 192, %s8725_s20  ;;  %s7044_s9 = sshll.u32 %s203_s27, 6 }
  0x39   : > { %7975 = vmatpush3.bf16.msra.mxu0 %v7974_v8  ;;  %v8008_v17 = vpack.c.bf16 %v4809_v15, %v4808_v14  ;;  %v4761_v19 = vld [vmem:[%s10687_s1 + $0x18] sm:$0xff]  ;;  %v4792_v20 = vld [vmem:[%s10687_s1 + $0x110] sm:$0xff]  ;;  %v4779_v24 = vld [vmem:[%s10687_s1 + $0xa8] sm:$0xff]  ;;  %vm5829_vm1 = vcmp.ge.s32.totalorder %v8764_v3, 1  ;;  %s10598_s10 = scalar_lea.vmem [#allocation5], %s7044_s9  ;;  %s10638_s22 = scalar_lea.hbm %s10690_s4, %s7295_s11 }
  0x3a   : > { %8007 = vmatpush3.bf16.msra.mxu1 %v8006_v12  ;;  %v7978_v21 = vpack.c.bf16 %v4761_v19, %v4760_v18  ;;  %v4793_v22 = vld [vmem:[%s10687_s1 + $0x118] sm:$0xff]  ;;  %7977 = vmatprep.subr.bf16.mxu0 %v7976_v16  ;;  %v7980_v26 = vpack.c.bf16 %v4779_v24, %v4778_v23  ;;  %v4810_v27 = vld [vmem:[%s10687_s1 + $0x1a0] sm:$0xff]  ;;  %v4811_v28 = vld [vmem:[%s10687_s1 + $0x1a8] sm:$0xff]  ;;  %s8811_s28 = scalar_lea.vmem %s10686_s0, %s8284_s29  ;;  %s6964_s12 = sshll.u32 %s10598_s10, 4  ;;  %s10640_s12 = int_to_ptr.vmem [resolvable:$true] %s6964_s12 }
  0x3b   : > { %8009 = vmatprep.subr.bf16.mxu1 %v8008_v17  ;;  %v8010_v25 = vpack.c.bf16 %v4793_v22, %v4792_v20  ;;  %v4762_v29 = vld [vmem:[%s10687_s1 + $0x20] sm:$0xff]  ;;  %v8012_v30 = vpack.c.bf16 %v4811_v28, %v4810_v27  ;;  %v4763_v31 = vld [vmem:[%s10687_s1 + $0x28] sm:$0xff]  ;;  %v4780_v35 = vld [vmem:[%s10687_s1 + $0xb0] sm:$0xff]  ;;  %v8814_v20 = vsub.s32 %v254_v2, %v8764_v3  ;;  %s8436_s20 = scalar_lea.vmem %s10640_s12, 1024  ;;  %p10701_p9 = scmp.ne.s32.totalorder %s10694_s25, 0 }
  0x3c   : > { %v4794_v32 = vld [vmem:[%s10687_s1 + $0x120] sm:$0xff]  ;;  %v4795_v33 = vld [vmem:[%s10687_s1 + $0x128] sm:$0xff]  ;;  %v7982_v34 = vpack.c.bf16 %v4763_v31, %v4762_v29  ;;  %v4781_v36 = vld [vmem:[%s10687_s1 + $0xb8] sm:$0xff]  ;;  %p8437_p6 = scmp.ne.s32.totalorder %s10640_s12, %s8436_s20  ;;  %s8511_s19 = smov [#allocation5]  }
  0x3d   : > { %7979 = vmatpush3.bf16.msra.mxu0 %v7978_v21  ;;  %v4812_v37 = vld [vmem:[%s10687_s1 + $0x1b0] sm:$0xff]  ;;  %v8014_v38 = vpack.c.bf16 %v4795_v33, %v4794_v32  ;;  %v7984_v39 = vpack.c.bf16 %v4781_v36, %v4780_v35  ;;  %v4813_v40 = vld [vmem:[%s10687_s1 + $0x1b8] sm:$0xff]  ;;  %v4782_v46 = vld [vmem:[%s10687_s1 + $0xc0] sm:$0xff]  ;;  %s8440_s23 = sshll.u32 %s8511_s19, 4  ;;  %s8441_s23 = int_to_ptr.vmem [resolvable:$false] %s8440_s23 }
  0x3e   : > { %8011 = vmatpush3.bf16.msra.mxu1 %v8010_v25  ;;  %7981 = vmatprep.subr.bf16.mxu0 %v7980_v26  ;;  %v4764_v41 = vld [vmem:[%s10687_s1 + $0x30] sm:$0xff]  ;;  %v4765_v42 = vld [vmem:[%s10687_s1 + $0x38] sm:$0xff]  ;;  %v8016_v43 = vpack.c.bf16 %v4813_v40, %v4812_v37  ;;  %v4783_v50 = vld [vmem:[%s10687_s1 + $0xc8] sm:$0xff]  ;;  %p8438_p10 = pnand %p8437_p6, %p10701_p9  ;;  %s8442_s5 = scalar_lea.vmem %s8441_s23, 2048 }
  0x3f   : > { %8013 = vmatprep.subr.bf16.mxu1 %v8012_v30  ;;  %v4796_v44 = vld [vmem:[%s10687_s1 + $0x130] sm:$0xff]  ;;  %v4797_v45 = vld [vmem:[%s10687_s1 + $0x138] sm:$0xff]  ;;  %v4814_v51 = vld [vmem:[%s10687_s1 + $0x1c0] sm:$0xff]  ;;  %v7986_v53 = vpack.c.bf16 %v4765_v42, %v4764_v41  ;;  %v7988_v58 = vpack.c.bf16 %v4783_v50, %v4782_v46  ;;  %p8443_p2 = scmp.lt.s32.totalorder %s10640_s12, %s8441_s23  ;;  %p8444_p3 = scmp.lt.s32.totalorder %s8442_s5, %s8436_s20 }
  0x40   : > { %v4815_v52 = vld [vmem:[%s10687_s1 + $0x1c8] sm:$0xff]  ;;  %v4766_v54 = vld [vmem:[%s10687_s1 + $0x40] sm:$0xff]  ;;  %v8018_v57 = vpack.c.bf16 %v4797_v45, %v4796_v44  ;;  %v4784_v60 = vld [vmem:[%s10687_s1 + $0xd0] sm:$0xff]  ;;  %p8439_p12 = pneg %p8438_p10 }
  0x41   : > { %7983 = vmatpush3.bf16.msra.mxu0 %v7982_v34  ;;  %v4767_v55 = vld [vmem:[%s10687_s1 + $0x48] sm:$0xff]  ;;  %v4798_v56 = vld [vmem:[%s10687_s1 + $0x140] sm:$0xff]  ;;  %v4785_v61 = vld [vmem:[%s10687_s1 + $0xd8] sm:$0xff]  ;;  %v8020_v62 = vpack.c.bf16 %v4815_v52, %v4814_v51  ;;  %p8445_p4 = por %p8444_p3, %p8443_p2 }
  0x42   : > { %8015 = vmatpush3.bf16.msra.mxu1 %v8014_v38  ;;  %7985 = vmatprep.subr.bf16.mxu0 %v7984_v39  ;;  %v4799_v59 = vld [vmem:[%s10687_s1 + $0x148] sm:$0xff]  ;;  %v4816_v63 = vld [vmem:[%s10687_s1 + $0x1d0] sm:$0xff]  ;;  %v4817_v0 = vld [vmem:[%s10687_s1 + $0x1d8] sm:$0xff]  ;;  %v7990_v7 = vpack.c.bf16 %v4767_v55, %v4766_v54  ;;  %v7992_v12 = vpack.c.bf16 %v4785_v61, %v4784_v60 }
  0x43   : > { %8017 = vmatprep.subr.bf16.mxu1 %v8016_v43  ;;  %v4768_v1 = vld [vmem:[%s10687_s1 + $0x50] sm:$0xff]  ;;  %v4769_v4 = vld [vmem:[%s10687_s1 + $0x58] sm:$0xff]  ;;  %v4786_v8 = vld [vmem:[%s10687_s1 + $0xe0] sm:$0xff]  ;;  %v8022_v11 = vpack.c.bf16 %v4799_v59, %v4798_v56  ;;  %v8024_v16 = vpack.c.bf16 %v4817_v0, %v4816_v63  ;;  %p8446_p7 = pnand %p8445_p4, %p8439_p12 }
  0x44   : > { %v4800_v5 = vld [vmem:[%s10687_s1 + $0x150] sm:$0xff]  ;;  %v4801_v6 = vld [vmem:[%s10687_s1 + $0x158] sm:$0xff]  ;;  %v4787_v9 = vld [vmem:[%s10687_s1 + $0xe8] sm:$0xff]  ;;  %v7994_v21 = vpack.c.bf16 %v4769_v4, %v4768_v1 }
  0x45   : > { %7987 = vmatpush3.bf16.msra.mxu0 %v7986_v53  ;;  %v4818_v10 = vld [vmem:[%s10687_s1 + $0x1e0] sm:$0xff]  ;;  %v4819_v13 = vld [vmem:[%s10687_s1 + $0x1e8] sm:$0xff]  ;;  %v8806_v19 = vld [vmem:[%s10687_s1 + $0xf0] sm:$0xff]  ;;  %v8026_v22 = vpack.c.bf16 %v4801_v6, %v4800_v5  ;;  %v7996_v26 = vpack.c.bf16 %v4787_v9, %v4786_v8 }
  0x46   : > { %8019 = vmatpush3.bf16.msra.mxu1 %v8018_v57  ;;  %7989 = vmatprep.subr.bf16.mxu0 %v7988_v58  ;;  %v4770_v14 = vld [vmem:[%s10687_s1 + $0x60] sm:$0xff]  ;;  %v4771_v15 = vld [vmem:[%s10687_s1 + $0x68] sm:$0xff]  ;;  %v4789_v23 = vld [vmem:[%s10687_s1 + $0xf8] sm:$0xff]  ;;  %v8028_v27 = vpack.c.bf16 %v4819_v13, %v4818_v10 }
  0x47   : > { %8021 = vmatprep.subr.bf16.mxu1 %v8020_v62  ;;  %v8796_v17 = vld [vmem:[%s10687_s1 + $0x160] sm:$0xff]  ;;  %v8801_v18 = vld [vmem:[%s10687_s1 + $0x168] sm:$0xff]  ;;  %v8822_v24 = vld [vmem:[%s10687_s1 + $0x1f0] sm:$0xff]  ;;  %v7998_v28 = vpack.c.bf16 %v4771_v15, %v4770_v14  ;;  %v8000_v33 = vpack.c.bf16 %v4789_v23, %v8806_v19 }
  0x48   : > { %v4821_v25 = vld [vmem:[%s10687_s1 + $0x1f8] sm:$0xff]  ;;  %v8030_v29 = vpack.c.bf16 %v8801_v18, %v8796_v17  ;;  %v8832_v30 = vld [vmem:[%s10687_s1 + $0x70] sm:$0xff]  ;;  %v491_v37 = vld [vmem:[%s8811_s28 + $0x1] sm:$0xff] }
  0x49   : > { %7991 = vmatpush3.bf16.msra.mxu0 %v7990_v7  ;;  %v8837_v31 = vld [vmem:[%s10687_s1 + $0x78] sm:$0xff]  ;;  %v8842_v32 = vld [vmem:[%s10687_s1 + $0x170] sm:$0xff]  ;;  %v8032_v34 = vpack.c.bf16 %v4821_v25, %v8822_v24  ;;  %v531_v40 = vcombine.high %v491_v37, %v491_v37  ;;  %v538_v41 = vrot.slane %v491_v37, %v8814_v20  ;;  %v211_v43 = vld [vmem:[%s8811_s28] sm:$0xff] }
  0x4a   : > { %8023 = vmatpush3.bf16.msra.mxu1 %v8022_v11  ;;  %7993 = vmatprep.subr.bf16.mxu0 %v7992_v12  ;;  %v8002_v35 = vpack.c.bf16 %v8837_v31, %v8832_v30  ;;  %v8851_v36 = vld [vmem:[%s10687_s1 + $0x178] sm:$0xff]  ;;  %v7076_v38 = vld [vmem:[%s8811_s28 + $0x10] sm:$0xff]  ;;  %v771_v44 = vld [vmem:[%s8811_s28 + $0x2] sm:$0xff]  ;;  %v251_v46 = vcombine.high %v211_v43, %v211_v43  ;;  %v258_v47 = vrot.slane %v211_v43, %v8814_v20 }
  0x4b   : > { %8025 = vmatprep.subr.bf16.mxu1 %v8024_v16  ;;  %v8034_v39 = vpack.c.bf16 %v8851_v36, %v8842_v32  ;;  %v1092_v42 = vcombine.high %v7076_v38, %v7076_v38  ;;  %v8861_v45 = vrot.slane %v7076_v38, %v8814_v20  ;;  %v811_v48 = vcombine.high %v771_v44, %v771_v44  ;;  %v4838_v0 = vld [vmem:[%s10687_s1 + $0x280] sm:$0xff]  ;;  %v4839_v1 = vld [vmem:[%s10687_s1 + $0x288] sm:$0xff]  ;;  %v493_v9 = vld [vmem:[%s8811_s28 + $0x11] sm:$0xff] }
  0x4c   : > { %v545_v49 = vrot.slane %v531_v40, %v8814_v20  ;;  %v546_v50 = vcombine.high %v538_v41, %v538_v41  ;;  %v818_v52 = vrot.slane %v771_v44, %v8814_v20  ;;  %v265_v54 = vrot.slane %v251_v46, %v8814_v20  ;;  %v4822_v7 = vld [vmem:[%s10687_s1 + $0x200] sm:$0xff]  ;;  %v4823_v8 = vld [vmem:[%s10687_s1 + $0x208] sm:$0xff]  ;;  %v8910_v32 = vld.sshfl [vmem:[%s8811_s28 + $0x18] sm:$0x3 pattern:$0x76325410] }
  0x4d   : > { %7995 = vmatpush3.bf16.msra.mxu0 %v7994_v21  ;;  %v8866_v51 = vrot.slane %v1092_v42, %v8814_v20  ;;  %v8871_v53 = vcombine.high %v8861_v45, %v8861_v45  ;;  %v266_v55 = vcombine.high %v258_v47, %v258_v47  ;;  %v825_v59 = vrot.slane %v811_v48, %v8814_v20  ;;  %v7056_v21 = vld.sshfl [vmem:[%s8811_s28 + $0x9] sm:$0x3 pattern:$0x76325410]  ;;  %v7078_v23 = vld [vmem:[%s8811_s28 + $0x20] sm:$0xff]  ;;  %v773_v40 = vld [vmem:[%s8811_s28 + $0x12] sm:$0xff] }
  0x4e   : > { %8027 = vmatpush3.bf16.msra.mxu1 %v8026_v22  ;;  %7997 = vmatprep.subr.bf16.mxu0 %v7996_v26  ;;  %v547_v56 = vcombine.high %v545_v49, %v545_v49  ;;  %v2958_v57 = vcombine.low %v538_v41, %v546_v50  ;;  %v267_v61 = vcombine.high %v265_v54, %v265_v54  ;;  %v8927_v44 = vld [vmem:[%s8811_s28 + $0x21] sm:$0xff] }
  0x4f   : > { %8029 = vmatprep.subr.bf16.mxu1 %v8028_v27  ;;  %v8876_v58 = vcombine.high %v8866_v51, %v8866_v51  ;;  %v3408_v60 = vcombine.low %v8861_v45, %v8871_v53  ;;  %v2733_v62 = vcombine.low %v258_v47, %v266_v55  ;;  %v826_v63 = vcombine.high %v818_v52, %v818_v52 }
  0x50   : > { %v2959_v2 = vcombine.low %v545_v49, %v547_v56  ;;  %v2966_v4 = vrot.slane %v2958_v57, %v8814_v20  ;;  %v827_v6 = vcombine.high %v825_v59, %v825_v59  ;;  %v2734_v11 = vcombine.low %v265_v54, %v267_v61  ;;  %v7066_v49 = vld.sshfl [vmem:[%s8811_s28 + $0xa] sm:$0x3 pattern:$0x76325410] }
  0x51   : > { %7999 = vmatpush3.bf16.msra.mxu0 %v7998_v28  ;;  %v3409_v5 = vcombine.low %v8866_v51, %v8876_v58  ;;  %v3416_v10 = vrot.slane %v3408_v60, %v8814_v20  ;;  %v2741_v12 = vrot.slane %v2733_v62, %v8814_v20  ;;  %v3183_v15 = vcombine.low %v818_v52, %v826_v63  ;;  %v7046_v28 = vld.sshfl [vmem:[%s8811_s28 + $0x8] sm:$0x3 pattern:$0x76325410]  ;;  %v8941_v60 = vld [vmem:[%s8811_s28 + $0x30] sm:$0xff] }
  0x52   : > { %8031 = vmatpush3.bf16.msra.mxu1 %v8030_v29  ;;  %8001 = vmatprep.subr.bf16.mxu0 %v8000_v33  ;;  %v2973_v13 = vrot.slane %v2959_v2, %v8814_v20  ;;  %v3184_v16 = vcombine.low %v825_v59, %v827_v6  ;;  %v2748_v17 = vrot.slane %v2734_v11, %v8814_v20  ;;  %v7057_v54 = vld.sshfl [vmem:[%s8811_s28 + $0x19] sm:$0x3 pattern:$0x76325410]  ;;  %v4840_v2 = vld [vmem:[%s10687_s1 + $0x290] sm:$0xff] }
  0x53   : > { %8033 = vmatprep.subr.bf16.mxu1 %v8032_v34  ;;  %v3423_v14 = vrot.slane %v3409_v5, %v8814_v20  ;;  %v8036_v18 = vpack.c.bf16 %v4839_v1, %v4838_v0  ;;  %v8038_v19 = vpack.c.bf16 %v4823_v8, %v4822_v7  ;;  %v555_v22 = vcombine.high %v493_v9, %v493_v9  ;;  %v8946_v1 = vld.sshfl [vmem:[%s8811_s28 + $0x28] sm:$0x3 pattern:$0x76325410] }
  0x54   : > { %v2974_v24 = vcombine.low %v2966_v4, %v2973_v13  ;;  %v3191_v26 = vrot.slane %v3183_v15, %v8814_v20  ;;  %v3198_v27 = vrot.slane %v3184_v16, %v8814_v20  ;;  %v2749_v29 = vcombine.low %v2741_v12, %v2748_v17  ;;  %v4841_v4 = vld [vmem:[%s10687_s1 + $0x298] sm:$0xff]  ;;  %v8967_v17 = vld [vmem:[%s8811_s28 + $0x22] sm:$0xff] }
  0x55   : > { %8003 = vmatpush3.bf16.msra.mxu0 %v8002_v35  ;;  %v3424_v25 = vcombine.low %v3416_v10, %v3423_v14  ;;  %v562_v30 = vrot.slane %v493_v9, %v8814_v20  ;;  %v569_v31 = vrot.slane %v555_v22, %v8814_v20  ;;  %v1116_v34 = vcombine.high %v7078_v23, %v7078_v23  ;;  %v7067_v22 = vld.sshfl [vmem:[%s8811_s28 + $0x1a] sm:$0x3 pattern:$0x76325410] }
  0x56   : > { %8035 = vmatpush3.bf16.msra.mxu1 %v8034_v39  ;;  %8037 = vmatprep.subr.bf16.mxu0 %v8036_v18  ;;  %v3199_v33 = vcombine.low %v3191_v26, %v3198_v27  ;;  %v8913_v35 = vrot.slane %v7078_v23, %v8814_v20  ;;  %v2750_v38 = vcombine.low %v7046_v28, %v8861_v45  ;;  %v4824_v23 = vld [vmem:[%s10687_s1 + $0x210] sm:$0xff] }
  0x57   : > { %4966 = vmatprep.mubr.f32.mxu0 %v2974_v24  ;;  %5096 = vmatprep.mubr.f32.mxu1 %v3424_v25  ;;  %v570_v36 = vcombine.high %v562_v30, %v562_v30  ;;  %v2975_v37 = vcombine.low %v7056_v21, %v562_v30  ;;  %v2751_v39 = vcombine.low %v8871_v53, %v8866_v51  ;;  %v4825_v24 = vld [vmem:[%s10687_s1 + $0x218] sm:$0xff] }
  0x58   : > { %4967 = vmatmul.mubr.f32.vlgmr.msra.gmra.mrb[0].mxu0 %v2749_v29  ;;  %v8920_v41 = vrot.slane %v1116_v34, %v8814_v20  ;;  %v1131_v42 = vcombine.high %v8913_v35, %v8913_v35  ;;  %v3425_v43 = vcombine.low %v8910_v32, %v8913_v35  ;;  %v2758_v47 = vrot.slane %v2750_v38, %v8814_v20  ;;  %v7058_v38 = vld.sshfl [vmem:[%s8811_s28 + $0x29] sm:$0x3 pattern:$0x76325410] }
  0x59   : > { %5097 = vmatmul.mubr.f32.vlgmr.msra.gmra.mrb[0].mxu1 %v3199_v33  ;;  %8039 = vmatpush3.bf16.msra.mxu0 %v8038_v19  ;;  %v2976_v45 = vcombine.low %v570_v36, %v569_v31  ;;  %v2983_v46 = vrot.slane %v2975_v37, %v8814_v20  ;;  %v2765_v48 = vrot.slane %v2751_v39, %v8814_v20 }
  0x5a   : > { %v3426_v50 = vcombine.low %v1131_v42, %v8920_v41  ;;  %v3433_v51 = vrot.slane %v3425_v43, %v8814_v20  ;;  %v835_v52 = vcombine.high %v773_v40, %v773_v40  ;;  %v842_v53 = vrot.slane %v773_v40, %v8814_v20  ;;  %v7082_v43 = vld [vmem:[%s8811_s28 + $0x40] sm:$0xff] }
  0x5b   : > { %v2990_v55 = vrot.slane %v2976_v45, %v8814_v20  ;;  %v2766_v56 = vcombine.low %v2758_v47, %v2765_v48  ;;  %v571_v57 = vcombine.high %v569_v31, %v569_v31  ;;  %v586_v59 = vrot.slane %v8927_v44, %v8814_v20 }
  0x5c   : > { %v3440_v61 = vrot.slane %v3426_v50, %v8814_v20  ;;  %v849_v62 = vrot.slane %v835_v52, %v8814_v20  ;;  %v850_v63 = vcombine.high %v842_v53, %v842_v53  ;;  %v3200_v0 = vcombine.low %v7066_v49, %v842_v53 }
  0x5d   : > { %v2991_v5 = vcombine.low %v2983_v46, %v2990_v55  ;;  %v594_v6 = vcombine.high %v586_v59, %v586_v59  ;;  %v2992_v7 = vcombine.low %v571_v57, %v7057_v54  ;;  %v8956_v8 = vcombine.high %v8920_v41, %v8920_v41 }
  0x5e   : > { %v3441_v9 = vcombine.low %v3433_v51, %v3440_v61  ;;  %v3201_v10 = vcombine.low %v850_v63, %v849_v62  ;;  %v3208_v11 = vrot.slane %v3200_v0, %v8814_v20  ;;  %v8961_v12 = vrot.slane %v8941_v60, %v8814_v20  ;;  %v9010_v51 = vld.sshfl [vmem:[%s8811_s28 + $0x38] sm:$0x3 pattern:$0x76325410] }
  0x5f   : > { %4971 = vmatprep.mubr.f32.mxu0 %v2991_v5  ;;  %v2993_v13 = vcombine.low %v586_v59, %v594_v6  ;;  %v3000_v14 = vrot.slane %v2992_v7, %v8814_v20  ;;  %v3442_v15 = vcombine.low %v8956_v8, %v8946_v1  ;;  %v8040_v16 = vpack.c.bf16 %v4841_v4, %v4840_v2  ;;  %v7068_v4 = vld.sshfl [vmem:[%s8811_s28 + $0x2a] sm:$0x3 pattern:$0x76325410]  ;;  %v4826_v5 = vld [vmem:[%s10687_s1 + $0x220] sm:$0xff] }
  0x60   : > { %5101 = vmatprep.mubr.f32.mxu1 %v3441_v9  ;;  %4972 = vmatmul.mubr.f32.gmra.mrb[2].mxu0 %v2766_v56  ;;  %v3215_v18 = vrot.slane %v3201_v10, %v8814_v20  ;;  %v8972_v19 = vcombine.high %v8961_v12, %v8961_v12  ;;  %v2767_v21 = vcombine.low %v8876_v58, %v8910_v32  ;;  %v8987_v58 = vld [vmem:[%s8811_s28 + $0x31] sm:$0xff]  ;;  %v4827_v6 = vld [vmem:[%s10687_s1 + $0x228] sm:$0xff] }
  0x61   : > { %v3007_v25 = vrot.slane %v2993_v13, %v8814_v20  ;;  %v3450_v26 = vrot.slane %v3442_v15, %v8814_v20  ;;  %8041 = vmatprep.subr.bf16.mxu0 %v8040_v16  ;;  %v2768_v27 = vcombine.low %v8913_v35, %v1131_v42  ;;  %v851_v28 = vcombine.high %v849_v62, %v849_v62  ;;  %v9021_v56 = vld [vmem:[%s8811_s28 + $0x32] sm:$0xff]  ;;  %v4842_v62 = vld [vmem:[%s10687_s1 + $0x2a0] sm:$0xff] }
  0x62   : > { %v3216_v29 = vcombine.low %v3208_v11, %v3215_v18  ;;  %v3443_v30 = vcombine.low %v8961_v12, %v8972_v19  ;;  %v2775_v31 = vrot.slane %v2767_v21, %v8814_v20  ;;  %v866_v32 = vrot.slane %v8967_v17, %v8814_v20 }
  0x63   : > { %v3008_v33 = vcombine.low %v3000_v14, %v3007_v25  ;;  %v2782_v34 = vrot.slane %v2768_v27, %v8814_v20  ;;  %v3217_v36 = vcombine.low %v851_v28, %v7067_v22  ;;  %v8042_v37 = vpack.c.bf16 %v4825_v24, %v4824_v23 }
  0x64   : > { %5102 = vmatmul.mubr.f32.gmra.mrb[2].mxu1 %v3216_v29  ;;  %v3457_v35 = vrot.slane %v3443_v30, %v8814_v20  ;;  %v874_v39 = vcombine.high %v866_v32, %v866_v32  ;;  %v579_v40 = vcombine.high %v8927_v44, %v8927_v44  ;;  %v9001_v42 = vrot.slane %v8987_v58, %v8814_v20  ;;  %v7059_v30 = vld.sshfl [vmem:[%s8811_s28 + $0x39] sm:$0x3 pattern:$0x76325410] }
  0x65   : > { %4976 = vmatprep.mubr.f32.mxu0 %v3008_v33  ;;  %v2783_v45 = vcombine.low %v2775_v31, %v2782_v34  ;;  %v3225_v46 = vrot.slane %v3217_v36, %v8814_v20  ;;  %8043 = vmatpush3.bf16.msra.mxu0 %v8042_v37  ;;  %v1140_v47 = vcombine.high %v8941_v60, %v8941_v60  ;;  %v9067_v34 = vld.sshfl [vmem:[%s8811_s28 + $0x48] sm:$0x3 pattern:$0x76325410] }
  0x66   : > { %v3458_v48 = vcombine.low %v3450_v26, %v3457_v35  ;;  %v3218_v49 = vcombine.low %v866_v32, %v874_v39  ;;  %v593_v50 = vrot.slane %v579_v40, %v8814_v20  ;;  %v3010_v44 = vcombine.low %v7058_v38, %v9001_v42  ;;  %v499_v40 = vld [vmem:[%s8811_s28 + $0x41] sm:$0xff] }
  0x67   : > { %4977 = vmatmul.mubr.f32.gmra.mrb[4].mxu0 %v2783_v45  ;;  %v1154_v52 = vrot.slane %v1140_v47, %v8814_v20  ;;  %v9014_v53 = vrot.slane %v7082_v43, %v8814_v20  ;;  %v2784_v54 = vcombine.low %v8920_v41, %v8956_v8  ;;  %v2785_v55 = vcombine.low %v8946_v1, %v8961_v12  ;;  %v4843_v41 = vld [vmem:[%s10687_s1 + $0x2a8] sm:$0xff] }
  0x68   : > { %5106 = vmatprep.mubr.f32.mxu1 %v3458_v48  ;;  %v3232_v57 = vrot.slane %v3218_v49, %v8814_v20  ;;  %v595_v59 = vcombine.high %v593_v50, %v593_v50  ;;  %v3024_v60 = vrot.slane %v3010_v44, %v8814_v20  ;;  %v859_v61 = vcombine.high %v8967_v17, %v8967_v17  ;;  %v7084_v44 = vld [vmem:[%s8811_s28 + $0x50] sm:$0xff] }
  0x69   : > { %v1156_v63 = vcombine.high %v1154_v52, %v1154_v52  ;;  %v3460_v0 = vcombine.low %v9010_v51, %v9014_v53  ;;  %v2792_v1 = vrot.slane %v2784_v54, %v8814_v20  ;;  %v2799_v2 = vrot.slane %v2785_v55, %v8814_v20  ;;  %v7069_v54 = vld.sshfl [vmem:[%s8811_s28 + $0x3a] sm:$0x3 pattern:$0x76325410] }
  0x6a   : > { %v3233_v7 = vcombine.low %v3225_v46, %v3232_v57  ;;  %v3009_v8 = vcombine.low %v593_v50, %v595_v59  ;;  %v873_v9 = vrot.slane %v859_v61, %v8814_v20  ;;  %v890_v10 = vrot.slane %v9021_v56, %v8814_v20 }
  0x6b   : > { %v3459_v11 = vcombine.low %v1154_v52, %v1156_v63  ;;  %v3474_v12 = vrot.slane %v3460_v0, %v8814_v20  ;;  %v2800_v13 = vcombine.low %v2792_v1, %v2799_v2  ;;  %v8044_v14 = vpack.c.bf16 %v4843_v41, %v4842_v62 }
  0x6c   : > { %5107 = vmatmul.mubr.f32.gmra.mrb[4].mxu1 %v3233_v7  ;;  %v3017_v15 = vrot.slane %v3009_v8, %v8814_v20  ;;  %v875_v16 = vcombine.high %v873_v9, %v873_v9  ;;  %v3235_v17 = vcombine.low %v7068_v4, %v890_v10  ;;  %v8046_v18 = vpack.c.bf16 %v4827_v6, %v4826_v5 }
  0x6d   : > { %v3467_v21 = vrot.slane %v3459_v11, %v8814_v20  ;;  %8045 = vmatprep.subr.bf16.mxu0 %v8044_v14  ;;  %v603_v22 = vcombine.high %v8987_v58, %v8987_v58  ;;  %v618_v23 = vcombine.high %v9001_v42, %v9001_v42  ;;  %v1164_v24 = vcombine.high %v7082_v43, %v7082_v43  ;;  %v4844_v14 = vld [vmem:[%s10687_s1 + $0x2b0] sm:$0xff] }
  0x6e   : > { %v3025_v25 = vcombine.low %v3017_v15, %v3024_v60  ;;  %v3234_v26 = vcombine.low %v873_v9, %v875_v16  ;;  %v3249_v27 = vrot.slane %v3235_v17, %v8814_v20  ;;  %8047 = vmatpush3.bf16.msra.mxu0 %v8046_v18  ;;  %v9057_v28 = vcombine.high %v9014_v53, %v9014_v53 }
  0x6f   : > { %v3475_v29 = vcombine.low %v3467_v21, %v3474_v12  ;;  %v617_v31 = vrot.slane %v603_v22, %v8814_v20  ;;  %v9062_v58 = vrot.slane %v1164_v24, %v8814_v20  ;;  %v2801_v32 = vcombine.low %v8972_v19, %v1154_v52  ;;  %v4828_v21 = vld [vmem:[%s10687_s1 + $0x230] sm:$0xff]  ;;  %v4829_v22 = vld [vmem:[%s10687_s1 + $0x238] sm:$0xff] }
  0x70   : > { %4981 = vmatprep.mubr.f32.mxu0 %v3025_v25  ;;  %v3242_v33 = vrot.slane %v3234_v26, %v8814_v20  ;;  %v2802_v36 = vcombine.low %v1156_v63, %v9010_v51  ;;  %v883_v37 = vcombine.high %v9021_v56, %v9021_v56  ;;  %v898_v38 = vcombine.high %v890_v10, %v890_v10  ;;  %v779_v10 = vld [vmem:[%s8811_s28 + $0x42] sm:$0xff] }
  0x71   : > { %5111 = vmatprep.mubr.f32.mxu1 %v3475_v29  ;;  %4982 = vmatmul.mubr.f32.gmra.mrb[6].mxu0 %v2800_v13  ;;  %v619_v35 = vcombine.high %v617_v31, %v617_v31  ;;  %v3026_v39 = vcombine.low %v618_v23, %v617_v31  ;;  %v1180_v19 = vcombine.high %v9062_v58, %v9062_v58 }
  0x72   : > { %v3250_v42 = vcombine.low %v3242_v33, %v3249_v27  ;;  %v3476_v43 = vcombine.low %v9057_v28, %v9062_v58  ;;  %v2809_v45 = vrot.slane %v2801_v32, %v8814_v20  ;;  %v2816_v46 = vrot.slane %v2802_v36, %v8814_v20  ;;  %v4870_v27 = vld [vmem:[%s10687_s1 + $0x380] sm:$0xff]  ;;  %v501_v32 = vld [vmem:[%s8811_s28 + $0x51] sm:$0xff] }
  0x73   : > { %v3027_v47 = vcombine.low %v619_v35, %v7059_v30  ;;  %v3034_v48 = vrot.slane %v3026_v39, %v8814_v20  ;;  %v3477_v49 = vcombine.low %v1180_v19, %v9067_v34  ;;  %v897_v50 = vrot.slane %v883_v37, %v8814_v20  ;;  %v7086_v33 = vld [vmem:[%s8811_s28 + $0x60] sm:$0xff] }
  0x74   : > { %5112 = vmatmul.mubr.f32.gmra.mrb[6].mxu1 %v3250_v42  ;;  %v3484_v51 = vrot.slane %v3476_v43, %v8814_v20  ;;  %v2817_v52 = vcombine.low %v2809_v45, %v2816_v46  ;;  %v627_v55 = vcombine.high %v499_v40, %v499_v40  ;;  %v634_v56 = vrot.slane %v499_v40, %v8814_v20  ;;  %v7060_v45 = vld.sshfl [vmem:[%s8811_s28 + $0x49] sm:$0x3 pattern:$0x76325410] }
  0x75   : > { %v3041_v57 = vrot.slane %v3027_v47, %v8814_v20  ;;  %v3491_v59 = vrot.slane %v3477_v49, %v8814_v20  ;;  %v899_v60 = vcombine.high %v897_v50, %v897_v50  ;;  %v3251_v61 = vcombine.low %v898_v38, %v897_v50 }
  0x76   : > { %v641_v62 = vrot.slane %v627_v55, %v8814_v20  ;;  %v642_v41 = vcombine.high %v634_v56, %v634_v56  ;;  %v1188_v63 = vcombine.high %v7084_v44, %v7084_v44  ;;  %v9090_v0 = vrot.slane %v7084_v44, %v8814_v20  ;;  %v9144_v44 = vld.sshfl [vmem:[%s8811_s28 + $0x58] sm:$0x3 pattern:$0x76325410] }
  0x77   : > { %v3042_v1 = vcombine.low %v3034_v48, %v3041_v57  ;;  %v3492_v2 = vcombine.low %v3484_v51, %v3491_v59  ;;  %v3252_v4 = vcombine.low %v899_v60, %v7069_v54  ;;  %v3259_v5 = vrot.slane %v3251_v61, %v8814_v20  ;;  %v4855_v54 = vld [vmem:[%s10687_s1 + $0x308] sm:$0xff] }
  0x78   : > { %v643_v6 = vcombine.high %v641_v62, %v641_v62  ;;  %v3043_v7 = vcombine.low %v634_v56, %v642_v41  ;;  %v9094_v8 = vrot.slane %v1188_v63, %v8814_v20  ;;  %v9098_v9 = vcombine.high %v9090_v0, %v9090_v0  ;;  %v781_v41 = vld [vmem:[%s8811_s28 + $0x52] sm:$0xff] }
  0x79   : > { %4986 = vmatprep.mubr.f32.mxu0 %v3042_v1  ;;  %5116 = vmatprep.mubr.f32.mxu1 %v3492_v2  ;;  %v3266_v11 = vrot.slane %v3252_v4, %v8814_v20  ;;  %v2818_v12 = vcombine.low %v9014_v53, %v9057_v28  ;;  %v2819_v13 = vcombine.low %v9062_v58, %v1180_v19  ;;  %v4845_v53 = vld [vmem:[%s10687_s1 + $0x2b8] sm:$0xff]  ;;  %v4871_v28 = vld [vmem:[%s10687_s1 + $0x388] sm:$0xff] }
  0x7a   : > { %4987 = vmatmul.mubr.f32.gmra.mrb[8].mxu0 %v2817_v52  ;;  %v3044_v15 = vcombine.low %v641_v62, %v643_v6  ;;  %v3051_v16 = vrot.slane %v3043_v7, %v8814_v20  ;;  %v9111_v17 = vcombine.high %v9094_v8, %v9094_v8  ;;  %v3493_v18 = vcombine.low %v9090_v0, %v9098_v9  ;;  %v4854_v52 = vld [vmem:[%s10687_s1 + $0x300] sm:$0xff] }
  0x7b   : > { %v3267_v23 = vcombine.low %v3259_v5, %v3266_v11  ;;  %v2826_v24 = vrot.slane %v2818_v12, %v8814_v20  ;;  %v2833_v25 = vrot.slane %v2819_v13, %v8814_v20  ;;  %v907_v26 = vcombine.high %v779_v10, %v779_v10  ;;  %v4846_v5 = vld [vmem:[%s10687_s1 + $0x2c0] sm:$0xff]  ;;  %v4847_v12 = vld [vmem:[%s10687_s1 + $0x2c8] sm:$0xff]  ;;  %v4872_v13 = vld [vmem:[%s10687_s1 + $0x390] sm:$0xff] }
  0x7c   : > { %v3058_v29 = vrot.slane %v3044_v15, %v8814_v20  ;;  %v3494_v30 = vcombine.low %v9094_v8, %v9111_v17  ;;  %v3501_v31 = vrot.slane %v3493_v18, %v8814_v20  ;;  %v914_v58 = vrot.slane %v779_v10, %v8814_v20 }
  0x7d   : > { %5117 = vmatmul.mubr.f32.gmra.mrb[8].mxu1 %v3267_v23  ;;  %v2834_v36 = vcombine.low %v2826_v24, %v2833_v25  ;;  %v921_v37 = vrot.slane %v907_v26, %v8814_v20  ;;  %v8048_v38 = vpack.c.bf16 %v4845_v53, %v4844_v14  ;;  %v8050_v35 = vpack.c.bf16 %v4829_v22, %v4828_v21  ;;  %v4873_v14 = vld [vmem:[%s10687_s1 + $0x398] sm:$0xff]  ;;  %v9195_v22 = vld [vmem:[%s8811_s28 + $0x61] sm:$0xff] }
  0x7e   : > { %v3059_v39 = vcombine.low %v3051_v16, %v3058_v29  ;;  %v3508_v19 = vrot.slane %v3494_v30, %v8814_v20  ;;  %v922_v40 = vcombine.high %v914_v58, %v914_v58  ;;  %v8068_v42 = vpack.c.bf16 %v4871_v28, %v4870_v27  ;;  %v7061_v27 = vld.sshfl [vmem:[%s8811_s28 + $0x59] sm:$0x3 pattern:$0x76325410]  ;;  %v9200_v28 = vld [vmem:[%s8811_s28 + $0x70] sm:$0xff] }
  0x7f   : > { %v923_v43 = vcombine.high %v921_v37, %v921_v37  ;;  %8049 = vmatprep.subr.bf16.mxu0 %v8048_v38  ;;  %v651_v46 = vcombine.high %v501_v32, %v501_v32  ;;  %v658_v47 = vrot.slane %v501_v32, %v8814_v20  ;;  %v1212_v48 = vcombine.high %v7086_v33, %v7086_v33  ;;  %v9203_v32 = vld.sshfl [vmem:[%s8811_s28 + $0x68] sm:$0x3 pattern:$0x76325410] }
  0x80   : > { %4991 = vmatprep.mubr.f32.mxu0 %v3059_v39  ;;  %v3509_v49 = vcombine.low %v3501_v31, %v3508_v19  ;;  %v3268_v50 = vcombine.low %v914_v58, %v922_v40  ;;  %8051 = vmatpush3.bf16.msra.mxu0 %v8050_v35  ;;  %v9147_v51 = vrot.slane %v7086_v33, %v8814_v20  ;;  %v4830_v33 = vld [vmem:[%s10687_s1 + $0x240] sm:$0xff]  ;;  %v4856_v39 = vld [vmem:[%s10687_s1 + $0x310] sm:$0xff]  ;;  %v4857_v19 = vld [vmem:[%s10687_s1 + $0x318] sm:$0xff] }
  0x81   : > { %4992 = vmatmul.mubr.f32.gmra.mrb[10].mxu0 %v2834_v36  ;;  %v3269_v55 = vcombine.low %v921_v37, %v923_v43  ;;  %8069 = vmatprep.subr.bf16.mxu1 %v8068_v42  ;;  %v665_v56 = vrot.slane %v651_v46, %v8814_v20  ;;  %v666_v57 = vcombine.high %v658_v47, %v658_v47  ;;  %v4831_v36 = vld [vmem:[%s10687_s1 + $0x248] sm:$0xff] }
  0x82   : > { %5121 = vmatprep.mubr.f32.mxu1 %v3509_v49  ;;  %v3276_v59 = vrot.slane %v3268_v50, %v8814_v20  ;;  %v3060_v60 = vcombine.low %v7060_v45, %v658_v47  ;;  %v9158_v61 = vrot.slane %v1212_v48, %v8814_v20  ;;  %v9162_v62 = vcombine.high %v9147_v51, %v9147_v51 }
  0x83   : > { %v3283_v63 = vrot.slane %v3269_v55, %v8814_v20  ;;  %v3061_v1 = vcombine.low %v666_v57, %v665_v56  ;;  %v3510_v2 = vcombine.low %v9144_v44, %v9147_v51  ;;  %v8070_v4 = vpack.c.bf16 %v4855_v54, %v4854_v52  ;;  %v9238_v55 = vld [vmem:[%s8811_s28 + $0x62] sm:$0xff] }
  0x84   : > { %v3068_v6 = vrot.slane %v3060_v60, %v8814_v20  ;;  %v3511_v7 = vcombine.low %v9162_v62, %v9158_v61  ;;  %v2835_v10 = vcombine.low %v9067_v34, %v9090_v0  ;;  %v2836_v11 = vcombine.low %v9098_v9, %v9094_v8  ;;  %v7070_v0 = vld.sshfl [vmem:[%s8811_s28 + $0x4a] sm:$0x3 pattern:$0x76325410] }
  0x85   : > { %v3284_v15 = vcombine.low %v3276_v59, %v3283_v63  ;;  %v3075_v16 = vrot.slane %v3061_v1, %v8814_v20  ;;  %v3518_v34 = vrot.slane %v3510_v2, %v8814_v20  ;;  %8071 = vmatpush3.bf16.msra.mxu1 %v8070_v4  ;;  %v931_v8 = vcombine.high %v781_v41, %v781_v41  ;;  %v4875_v57 = vld [vmem:[%s10687_s1 + $0x3a8] sm:$0xff]  ;;  %v9252_v63 = vld [vmem:[%s8811_s28 + $0x71] sm:$0xff] }
  0x86   : > { %v3525_v9 = vrot.slane %v3511_v7, %v8814_v20  ;;  %v2843_v18 = vrot.slane %v2835_v10, %v8814_v20  ;;  %v2850_v53 = vrot.slane %v2836_v11, %v8814_v20  ;;  %v938_v21 = vrot.slane %v781_v41, %v8814_v20 }
  0x87   : > { %5122 = vmatmul.mubr.f32.gmra.mrb[10].mxu1 %v3284_v15  ;;  %v3076_v23 = vcombine.low %v3068_v6, %v3075_v16  ;;  %v945_v24 = vrot.slane %v931_v8, %v8814_v20  ;;  %v8052_v25 = vpack.c.bf16 %v4847_v12, %v4846_v5  ;;  %v8072_v26 = vpack.c.bf16 %v4873_v14, %v4872_v13  ;;  %v9270_v15 = vld [vmem:[%s8811_s28 + $0x80] sm:$0xff] }
  0x88   : > { %v3526_v29 = vcombine.low %v3518_v34, %v3525_v9  ;;  %v2851_v30 = vcombine.low %v2843_v18, %v2850_v53  ;;  %v946_v31 = vcombine.high %v938_v21, %v938_v21  ;;  %v3285_v58 = vcombine.low %v7070_v0, %v938_v21  ;;  %v4858_v16 = vld [vmem:[%s10687_s1 + $0x320] sm:$0xff]  ;;  %v4859_v34 = vld [vmem:[%s10687_s1 + $0x328] sm:$0xff] }
  0x89   : > { %4996 = vmatprep.mubr.f32.mxu0 %v3076_v23  ;;  %8053 = vmatprep.subr.bf16.mxu0 %v8052_v25  ;;  %v667_v37 = vcombine.high %v665_v56, %v665_v56  ;;  %v682_v38 = vrot.slane %v9195_v22, %v8814_v20  ;;  %v9215_v35 = vcombine.high %v9158_v61, %v9158_v61  ;;  %v4874_v56 = vld [vmem:[%s10687_s1 + $0x3a0] sm:$0xff] }
  0x8a   : > { %5126 = vmatprep.mubr.f32.mxu1 %v3526_v29  ;;  %4997 = vmatmul.mubr.f32.gmra.mrb[12].mxu0 %v2851_v30  ;;  %v3286_v40 = vcombine.low %v946_v31, %v945_v24  ;;  %v3293_v42 = vrot.slane %v3285_v58, %v8814_v20  ;;  %v9226_v43 = vrot.slane %v9200_v28, %v8814_v20  ;;  %v9294_v29 = vld [vmem:[%s8811_s28 + $0x72] sm:$0xff] }
  0x8b   : > { %8073 = vmatprep.subr.bf16.mxu1 %v8072_v26  ;;  %v690_v45 = vcombine.high %v682_v38, %v682_v38  ;;  %v3077_v46 = vcombine.low %v667_v37, %v7061_v27  ;;  %v3527_v47 = vcombine.low %v9215_v35, %v9203_v32  ;;  %v8054_v48 = vpack.c.bf16 %v4831_v36, %v4830_v33  ;;  %v7072_v33 = vld.sshfl [vmem:[%s8811_s28 + $0x6a] sm:$0x3 pattern:$0x76325410] }
  0x8c   : > { %v3300_v49 = vrot.slane %v3286_v40, %v8814_v20  ;;  %v9233_v50 = vcombine.high %v9226_v43, %v9226_v43  ;;  %v8074_v52 = vpack.c.bf16 %v4857_v19, %v4856_v39  ;;  %v2852_v54 = vcombine.low %v9111_v17, %v9144_v44  ;;  %v7071_v44 = vld.sshfl [vmem:[%s8811_s28 + $0x5a] sm:$0x3 pattern:$0x76325410]  ;;  %v4848_v19 = vld [vmem:[%s10687_s1 + $0x2d0] sm:$0xff] }
  0x8d   : > { %v3078_v59 = vcombine.low %v682_v38, %v690_v45  ;;  %v3085_v60 = vrot.slane %v3077_v46, %v8814_v20  ;;  %v3535_v41 = vrot.slane %v3527_v47, %v8814_v20  ;;  %8055 = vmatpush3.bf16.msra.mxu0 %v8054_v48  ;;  %v2853_v17 = vcombine.low %v9147_v51, %v9162_v62  ;;  %v7062_v62 = vld.sshfl [vmem:[%s8811_s28 + $0x69] sm:$0x3 pattern:$0x76325410]  ;;  %v4876_v46 = vld [vmem:[%s10687_s1 + $0x3b0] sm:$0xff]  ;;  %v4877_v47 = vld [vmem:[%s10687_s1 + $0x3b8] sm:$0xff] }
  0x8e   : > { %v3301_v1 = vcombine.low %v3293_v42, %v3300_v49  ;;  %v3528_v2 = vcombine.low %v9226_v43, %v9233_v50  ;;  %8075 = vmatpush3.bf16.msra.mxu1 %v8074_v52  ;;  %v2860_v4 = vrot.slane %v2852_v54, %v8814_v20  ;;  %v947_v5 = vcombine.high %v945_v24, %v945_v24  ;;  %v9284_v24 = vld.sshfl [vmem:[%s8811_s28 + $0x78] sm:$0x3 pattern:$0x76325410] }
  0x8f   : > { %v3092_v6 = vrot.slane %v3078_v59, %v8814_v20  ;;  %v2867_v7 = vrot.slane %v2853_v17, %v8814_v20  ;;  %v962_v10 = vrot.slane %v9238_v55, %v8814_v20  ;;  %v8076_v51 = vpack.c.bf16 %v4875_v57, %v4874_v56 }
  0x90   : > { %5127 = vmatmul.mubr.f32.gmra.mrb[12].mxu1 %v3301_v1  ;;  %v3542_v11 = vrot.slane %v3528_v2, %v8814_v20  ;;  %v3302_v12 = vcombine.low %v947_v5, %v7071_v44  ;;  %v675_v13 = vcombine.high %v9195_v22, %v9195_v22  ;;  %v9267_v14 = vrot.slane %v9252_v63, %v8814_v20  ;;  %v4860_v1 = vld [vmem:[%s10687_s1 + $0x330] sm:$0xff]  ;;  %v4861_v2 = vld [vmem:[%s10687_s1 + $0x338] sm:$0xff] }
  0x91   : > { %v3093_v0 = vcombine.low %v3085_v60, %v3092_v6  ;;  %v2868_v8 = vcombine.low %v2860_v4, %v2867_v7  ;;  %v970_v9 = vcombine.high %v962_v10, %v962_v10  ;;  %8077 = vmatprep.subr.bf16.mxu1 %v8076_v51  ;;  %v1236_v18 = vcombine.high %v9200_v28, %v9200_v28 }
  0x92   : > { %v3543_v53 = vcombine.low %v3535_v41, %v3542_v11  ;;  %v3310_v21 = vrot.slane %v3302_v12, %v8814_v20  ;;  %v689_v22 = vrot.slane %v675_v13, %v8814_v20  ;;  %v3095_v23 = vcombine.low %v7062_v62, %v9267_v14 }
  0x93   : > { %5001 = vmatprep.mubr.f32.mxu0 %v3093_v0  ;;  %v3303_v25 = vcombine.low %v962_v10, %v970_v9  ;;  %v9287_v26 = vrot.slane %v1236_v18, %v8814_v20  ;;  %v9291_v27 = vrot.slane %v9270_v15, %v8814_v20  ;;  %v8078_v28 = vpack.c.bf16 %v4859_v34, %v4858_v16  ;;  %v9366_v18 = vld.sshfl [vmem:[%s8811_s28 + $0x88] sm:$0x3 pattern:$0x76325410] }
  0x94   : > { %5131 = vmatprep.mubr.f32.mxu1 %v3543_v53  ;;  %5002 = vmatmul.mubr.f32.gmra.mrb[14].mxu0 %v2868_v8  ;;  %v691_v30 = vcombine.high %v689_v22, %v689_v22  ;;  %v3109_v31 = vrot.slane %v3095_v23, %v8814_v20  ;;  %v2869_v58 = vcombine.low %v9158_v61, %v9215_v35  ;;  %v4849_v61 = vld [vmem:[%s10687_s1 + $0x2d8] sm:$0xff]  ;;  %v4832_v35 = vld [vmem:[%s10687_s1 + $0x250] sm:$0xff] }
  0x95   : > { %v3317_v36 = vrot.slane %v3303_v25, %v8814_v20  ;;  %v1252_v37 = vcombine.high %v9287_v26, %v9287_v26  ;;  %v3545_v38 = vcombine.low %v9284_v24, %v9291_v27  ;;  %8079 = vmatpush3.bf16.msra.mxu1 %v8078_v28  ;;  %v2870_v39 = vcombine.low %v9203_v32, %v9226_v43  ;;  %v4833_v43 = vld [vmem:[%s10687_s1 + $0x258] sm:$0xff]  ;;  %v4879_v25 = vld [vmem:[%s10687_s1 + $0x3c8] sm:$0xff] }
  0x96   : > { %v3094_v40 = vcombine.low %v689_v22, %v691_v30  ;;  %v2877_v42 = vrot.slane %v2869_v58, %v8814_v20  ;;  %v955_v45 = vcombine.high %v9238_v55, %v9238_v55  ;;  %v9321_v32 = vrot.slane %v9294_v29, %v8814_v20  ;;  %v7092_v58 = vld [vmem:[%s8811_s28 + $0x90] sm:$0xff] }
  0x97   : > { %v3318_v48 = vcombine.low %v3310_v21, %v3317_v36  ;;  %v3544_v49 = vcombine.low %v9287_v26, %v1252_v37  ;;  %v3559_v52 = vrot.slane %v3545_v38, %v8814_v20  ;;  %v2884_v54 = vrot.slane %v2870_v39, %v8814_v20  ;;  %v7073_v38 = vld.sshfl [vmem:[%s8811_s28 + $0x7a] sm:$0x3 pattern:$0x76325410] }
  0x98   : > { %v3102_v55 = vrot.slane %v3094_v40, %v8814_v20  ;;  %v969_v56 = vrot.slane %v955_v45, %v8814_v20  ;;  %v3320_v57 = vcombine.low %v7072_v33, %v9321_v32  ;;  %v8056_v59 = vpack.c.bf16 %v4849_v61, %v4848_v19 }
  0x99   : > { %5132 = vmatmul.mubr.f32.gmra.mrb[14].mxu1 %v3318_v48  ;;  %v3552_v60 = vrot.slane %v3544_v49, %v8814_v20  ;;  %v2885_v41 = vcombine.low %v2877_v42, %v2884_v54  ;;  %v8058_v17 = vpack.c.bf16 %v4833_v43, %v4832_v35  ;;  %v8080_v44 = vpack.c.bf16 %v4877_v47, %v4876_v46  ;;  %v4850_v47 = vld [vmem:[%s10687_s1 + $0x2e0] sm:$0xff] }
  0x9a   : > { %v3110_v4 = vcombine.low %v3102_v55, %v3109_v31  ;;  %v971_v5 = vcombine.high %v969_v56, %v969_v56  ;;  %v3334_v6 = vrot.slane %v3320_v57, %v8814_v20  ;;  %8057 = vmatprep.subr.bf16.mxu0 %v8056_v59  ;;  %v699_v7 = vcombine.high %v9252_v63, %v9252_v63  ;;  %v7063_v63 = vld.sshfl [vmem:[%s8811_s28 + $0x79] sm:$0x3 pattern:$0x76325410]  ;;  %v4862_v55 = vld [vmem:[%s10687_s1 + $0x340] sm:$0xff] }
  0x9b   : > { %v3560_v10 = vcombine.low %v3552_v60, %v3559_v52  ;;  %8059 = vmatpush3.bf16.msra.mxu0 %v8058_v17  ;;  %8081 = vmatprep.subr.bf16.mxu1 %v8080_v44  ;;  %v714_v51 = vcombine.high %v9267_v14, %v9267_v14  ;;  %v1260_v62 = vcombine.high %v9270_v15, %v9270_v15 }
  0x9c   : > { %5006 = vmatprep.mubr.f32.mxu0 %v3110_v4  ;;  %v3319_v11 = vcombine.low %v969_v56, %v971_v5  ;;  %v713_v12 = vrot.slane %v699_v7, %v8814_v20  ;;  %v9355_v13 = vcombine.high %v9291_v27, %v9291_v27  ;;  %v8082_v16 = vpack.c.bf16 %v4861_v2, %v4860_v1  ;;  %v4863_v56 = vld [vmem:[%s10687_s1 + $0x348] sm:$0xff] }
  0x9d   : > { %5136 = vmatprep.mubr.f32.mxu1 %v3560_v10  ;;  %5007 = vmatmul.mubr.f32.gmra.mrb[16].mxu0 %v2885_v41  ;;  %v9359_v34 = vrot.slane %v1260_v62, %v8814_v20  ;;  %v2886_v14 = vcombine.low %v9233_v50, %v9287_v26  ;;  %v2887_v15 = vcombine.low %v1252_v37, %v9284_v24  ;;  %v4878_v24 = vld [vmem:[%s10687_s1 + $0x3c0] sm:$0xff] }
  0x9e   : > { %v3327_v0 = vrot.slane %v3319_v11, %v8814_v20  ;;  %v715_v8 = vcombine.high %v713_v12, %v713_v12  ;;  %v3111_v9 = vcombine.low %v714_v51, %v713_v12  ;;  %8083 = vmatpush3.bf16.msra.mxu1 %v8082_v16  ;;  %v979_v53 = vcombine.high %v9294_v29, %v9294_v29  ;;  %v507_v26 = vld [vmem:[%s8811_s28 + $0x81] sm:$0xff] }
  0x9f   : > { %v9372_v21 = vcombine.high %v9359_v34, %v9359_v34  ;;  %v3561_v50 = vcombine.low %v9355_v13, %v9359_v34  ;;  %v2894_v22 = vrot.slane %v2886_v14, %v8814_v20  ;;  %v2901_v23 = vrot.slane %v2887_v15, %v8814_v20  ;;  %v787_v4 = vld [vmem:[%s8811_s28 + $0x82] sm:$0xff] }
  0xa0   : > { %v3335_v28 = vcombine.low %v3327_v0, %v3334_v6  ;;  %v3112_v29 = vcombine.low %v715_v8, %v7063_v63  ;;  %v3119_v30 = vrot.slane %v3111_v9, %v8814_v20  ;;  %v993_v31 = vrot.slane %v979_v53, %v8814_v20  ;;  %v4834_v12 = vld [vmem:[%s10687_s1 + $0x260] sm:$0xff]  ;;  %v4835_v16 = vld [vmem:[%s10687_s1 + $0x268] sm:$0xff]  ;;  %v509_v8 = vld [vmem:[%s8811_s28 + $0x91] sm:$0xff] }
  0xa1   : > { %v3562_v33 = vcombine.low %v9372_v21, %v9366_v18  ;;  %v3569_v36 = vrot.slane %v3561_v50, %v8814_v20  ;;  %v2902_v37 = vcombine.low %v2894_v22, %v2901_v23  ;;  %v994_v39 = vcombine.high %v9321_v32, %v9321_v32  ;;  %v4851_v32 = vld [vmem:[%s10687_s1 + $0x2e8] sm:$0xff] }
  0xa2   : > { %5137 = vmatmul.mubr.f32.gmra.mrb[16].mxu1 %v3335_v28  ;;  %v3126_v19 = vrot.slane %v3112_v29, %v8814_v20  ;;  %v995_v61 = vcombine.high %v993_v31, %v993_v31  ;;  %v8084_v35 = vpack.c.bf16 %v4879_v25, %v4878_v24  ;;  %v723_v40 = vcombine.high %v507_v26, %v507_v26  ;;  %v7094_v25 = vld [vmem:[%s8811_s28 + $0xa0] sm:$0xff] }
  0xa3   : > { %v3576_v42 = vrot.slane %v3562_v33, %v8814_v20  ;;  %v3336_v45 = vcombine.low %v994_v39, %v993_v31  ;;  %v730_v43 = vrot.slane %v507_v26, %v8814_v20  ;;  %v1284_v46 = vcombine.high %v7092_v58, %v7092_v58  ;;  %v4865_v39 = vld [vmem:[%s10687_s1 + $0x358] sm:$0xff] }
  0xa4   : > { %v3127_v48 = vcombine.low %v3119_v30, %v3126_v19  ;;  %v3337_v49 = vcombine.low %v995_v61, %v7073_v38  ;;  %8085 = vmatprep.subr.bf16.mxu1 %v8084_v35  ;;  %v737_v52 = vrot.slane %v723_v40, %v8814_v20  ;;  %v9405_v54 = vrot.slane %v7092_v58, %v8814_v20  ;;  %v7064_v30 = vld.sshfl [vmem:[%s8811_s28 + $0x89] sm:$0x3 pattern:$0x76325410]  ;;  %v4864_v38 = vld [vmem:[%s10687_s1 + $0x350] sm:$0xff] }
  0xa5   : > { %v3577_v57 = vcombine.low %v3569_v36, %v3576_v42  ;;  %v3344_v59 = vrot.slane %v3336_v45, %v8814_v20  ;;  %v738_v60 = vcombine.high %v730_v43, %v730_v43  ;;  %v9415_v41 = vrot.slane %v1284_v46, %v8814_v20  ;;  %v789_v46 = vld [vmem:[%s8811_s28 + $0x92] sm:$0xff] }
  0xa6   : > { %5011 = vmatprep.mubr.f32.mxu0 %v3127_v48  ;;  %v3351_v17 = vrot.slane %v3337_v49, %v8814_v20  ;;  %v739_v44 = vcombine.high %v737_v52, %v737_v52  ;;  %v9420_v1 = vcombine.high %v9405_v54, %v9405_v54  ;;  %v8060_v2 = vpack.c.bf16 %v4851_v32, %v4850_v47 }
  0xa7   : > { %5141 = vmatprep.mubr.f32.mxu1 %v3577_v57  ;;  %5012 = vmatmul.mubr.f32.gmra.mrb[18].mxu0 %v2902_v37  ;;  %v3128_v5 = vcombine.low %v730_v43, %v738_v60  ;;  %v9425_v6 = vcombine.high %v9415_v41, %v9415_v41  ;;  %v8086_v7 = vpack.c.bf16 %v4863_v56, %v4862_v55  ;;  %v9467_v43 = vld.sshfl [vmem:[%s8811_s28 + $0x98] sm:$0x3 pattern:$0x76325410] }
  0xa8   : > { %v3352_v10 = vcombine.low %v3344_v59, %v3351_v17  ;;  %v3129_v51 = vcombine.low %v737_v52, %v739_v44  ;;  %v3578_v62 = vcombine.low %v9405_v54, %v9420_v1  ;;  %8061 = vmatprep.subr.bf16.mxu0 %v8060_v2  ;;  %v2903_v11 = vcombine.low %v9291_v27, %v9355_v13  ;;  %v4880_v27 = vld [vmem:[%s10687_s1 + $0x3d0] sm:$0xff]  ;;  %v4881_v13 = vld [vmem:[%s10687_s1 + $0x3d8] sm:$0xff]  ;;  %v9483_v44 = vld.sshfl [vmem:[%s8811_s28 + $0x8a] sm:$0x3 pattern:$0x76325410] }
  0xa9   : > { %v3136_v63 = vrot.slane %v3128_v5, %v8814_v20  ;;  %v3579_v14 = vcombine.low %v9415_v41, %v9425_v6  ;;  %8087 = vmatpush3.bf16.msra.mxu1 %v8086_v7  ;;  %v2904_v15 = vcombine.low %v9359_v34, %v9372_v21  ;;  %v1003_v0 = vcombine.high %v787_v4, %v787_v4  ;;  %v4853_v5 = vld [vmem:[%s10687_s1 + $0x2f8] sm:$0xff] }
  0xaa   : > { %5142 = vmatmul.mubr.f32.gmra.mrb[18].mxu1 %v3352_v10  ;;  %v3143_v9 = vrot.slane %v3129_v51, %v8814_v20  ;;  %v3586_v53 = vrot.slane %v3578_v62, %v8814_v20  ;;  %v2911_v50 = vrot.slane %v2903_v11, %v8814_v20  ;;  %v1010_v34 = vrot.slane %v787_v4, %v8814_v20  ;;  %v4852_v4 = vld [vmem:[%s10687_s1 + $0x2f0] sm:$0xff] }
  0xab   : > { %v3593_v21 = vrot.slane %v3579_v14, %v8814_v20  ;;  %v2918_v22 = vrot.slane %v2904_v15, %v8814_v20  ;;  %v1017_v23 = vrot.slane %v1003_v0, %v8814_v20  ;;  %v8062_v24 = vpack.c.bf16 %v4835_v16, %v4834_v12  ;;  %v4836_v16 = vld [vmem:[%s10687_s1 + $0x270] sm:$0xff] }
  0xac   : > { %v3144_v26 = vcombine.low %v3136_v63, %v3143_v9  ;;  %v1018_v28 = vcombine.high %v1010_v34, %v1010_v34  ;;  %v8088_v29 = vpack.c.bf16 %v4881_v13, %v4880_v27  ;;  %v747_v31 = vcombine.high %v509_v8, %v509_v8  ;;  %v4837_v63 = vld [vmem:[%s10687_s1 + $0x278] sm:$0xff]  ;;  %v4867_v9 = vld [vmem:[%s10687_s1 + $0x368] sm:$0xff] }
  0xad   : > { %v3594_v58 = vcombine.low %v3586_v53, %v3593_v21  ;;  %v2919_v33 = vcombine.low %v2911_v50, %v2918_v22  ;;  %v1019_v36 = vcombine.high %v1017_v23, %v1017_v23  ;;  %8063 = vmatpush3.bf16.msra.mxu0 %v8062_v24  ;;  %v754_v37 = vrot.slane %v509_v8, %v8814_v20  ;;  %v9512_v13 = vld.sshfl [vmem:[%s8811_s28 + $0x99] sm:$0x3 pattern:$0x76325410]  ;;  %v4866_v8 = vld [vmem:[%s10687_s1 + $0x360] sm:$0xff] }
  0xae   : > { %5016 = vmatprep.mubr.f32.mxu0 %v3144_v26  ;;  %v3353_v19 = vcombine.low %v1010_v34, %v1018_v28  ;;  %8089 = vmatprep.subr.bf16.mxu1 %v8088_v29  ;;  %v761_v61 = vrot.slane %v747_v31, %v8814_v20  ;;  %v1308_v35 = vcombine.high %v7094_v25, %v7094_v25  ;;  %v7105_v22 = vld.sshfl [vmem:[%s8811_s28 + $0xa8] sm:$0x3 pattern:$0x76325410]  ;;  %v4884_v26 = vld [vmem:[%s10687_s1 + $0x3f0] sm:$0xff]  ;;  %v4885_v28 = vld [vmem:[%s10687_s1 + $0x3f8] sm:$0xff] }
  0xaf   : > { %5146 = vmatprep.mubr.f32.mxu1 %v3594_v58  ;;  %5017 = vmatmul.mubr.f32.gmra.mrb[20].mxu0 %v2919_v33  ;;  %v3354_v40 = vcombine.low %v1017_v23, %v1019_v36  ;;  %v762_v42 = vcombine.high %v754_v37, %v754_v37  ;;  %v3145_v45 = vcombine.low %v7064_v30, %v754_v37  ;;  %v7136_v29 = vld [vmem:[%s8811_s28 + $0x12] sm:$0xff]  ;;  %v7075_v33 = vld.sshfl [vmem:[%s8811_s28 + $0x9a] sm:$0x3 pattern:$0x76325410] }
  0xb0   : > { %v3361_v47 = vrot.slane %v3353_v19, %v8814_v20  ;;  %v1315_v32 = vrot.slane %v7094_v25, %v8814_v20  ;;  %v9473_v48 = vrot.slane %v1308_v35, %v8814_v20  ;;  %v8090_v49 = vpack.c.bf16 %v4865_v39, %v4864_v38  ;;  %v4868_v19 = vld [vmem:[%s10687_s1 + $0x370] sm:$0xff] }
  0xb1   : > { %v3368_v52 = vrot.slane %v3354_v40, %v8814_v20  ;;  %v3146_v55 = vcombine.low %v762_v42, %v761_v61  ;;  %v3153_v56 = vrot.slane %v3145_v45, %v8814_v20  ;;  %v2920_v57 = vcombine.low %v9366_v18, %v9405_v54 }
  0xb2   : > { %v1323_v59 = vcombine.high %v1315_v32, %v1315_v32  ;;  %v3595_v60 = vcombine.low %v9467_v43, %v1315_v32  ;;  %8091 = vmatpush3.bf16.msra.mxu1 %v8090_v49  ;;  %v2921_v17 = vcombine.low %v9420_v1, %v9415_v41  ;;  %v1027_v2 = vcombine.high %v789_v46, %v789_v46  ;;  %v4882_v41 = vld [vmem:[%s10687_s1 + $0x3e0] sm:$0xff]  ;;  %v4883_v1 = vld [vmem:[%s10687_s1 + $0x3e8] sm:$0xff] }
  0xb3   : > { %v3369_v7 = vcombine.low %v3361_v47, %v3368_v52  ;;  %v3160_v18 = vrot.slane %v3146_v55, %v8814_v20  ;;  %v2928_v54 = vrot.slane %v2920_v57, %v8814_v20  ;;  %v1034_v10 = vrot.slane %v789_v46, %v8814_v20  ;;  %v9558_v57 = vld [vmem:[%s10687_s1 + $0x408] sm:$0xff] }
  0xb4   : > { %v3596_v51 = vcombine.low %v1323_v59, %v9473_v48  ;;  %v3603_v62 = vrot.slane %v3595_v60, %v8814_v20  ;;  %v2935_v11 = vrot.slane %v2921_v17, %v8814_v20  ;;  %v1041_v12 = vrot.slane %v1027_v2, %v8814_v20  ;;  %v7166_v59 = vld [vmem:[%s8811_s28 + $0x20] sm:$0xff] }
  0xb5   : > { %5147 = vmatmul.mubr.f32.gmra.mrb[20].mxu1 %v3369_v7  ;;  %v3161_v14 = vcombine.low %v3153_v56, %v3160_v18  ;;  %v1042_v15 = vcombine.high %v1034_v10, %v1034_v10  ;;  %v3370_v0 = vcombine.low %v9483_v44, %v1034_v10  ;;  %v8064_v27 = vpack.c.bf16 %v4853_v5, %v4852_v4  ;;  %v9553_v56 = vld [vmem:[%s10687_s1 + $0x400] sm:$0xff] }
  0xb6   : > { %v3610_v53 = vrot.slane %v3596_v51, %v8814_v20  ;;  %v2936_v50 = vcombine.low %v2928_v54, %v2935_v11  ;;  %v8092_v34 = vpack.c.bf16 %v4883_v1, %v4882_v41  ;;  %v763_v21 = vcombine.high %v761_v61, %v761_v61  ;;  %v4869_v61 = vld [vmem:[%s10687_s1 + $0x378] sm:$0xff] }
  0xb7   : > { %5021 = vmatprep.mubr.f32.mxu0 %v3161_v14  ;;  %v3371_v23 = vcombine.low %v1042_v15, %v1041_v12  ;;  %v3378_v24 = vrot.slane %v3370_v0, %v8814_v20  ;;  %8065 = vmatprep.subr.bf16.mxu0 %v8064_v27  ;;  %v8066_v25 = vpack.c.bf16 %v4837_v63, %v4836_v16  ;;  %v8508_v32 = vmov 0.0|0.0   ;;  %v7138_v0 = vld [vmem:[%s8811_s28 + $0x22] sm:$0xff] }
  0xb8   : > { %v3611_v30 = vcombine.low %v3603_v62, %v3610_v53  ;;  %5022 = vmatmul.mubr.f32.gmra.mrb[22].mxu0 %v2936_v50  ;;  %8093 = vmatprep.subr.bf16.mxu1 %v8092_v34  ;;  %v3162_v31 = vcombine.low %v763_v21, %v9512_v13  ;;  %v8094_v58 = vpack.c.bf16 %v4867_v9, %v4866_v8 }
  0xb9   : > { %v3385_v36 = vrot.slane %v3371_v23, %v8814_v20  ;;  %8067 = vmatpush3.bf16.msra.mxu0 %v8066_v25  ;;  %v2937_v37 = vcombine.low %v9425_v6, %v9467_v43  ;;  %v1324_v38 = vcombine.high %v9473_v48, %v9473_v48  ;;  %v1043_v39 = vcombine.high %v1041_v12, %v1041_v12  ;;  %v7106_v6 = vld [vmem:[%s8811_s28 + $0x11] sm:$0xff]  ;;  %v7196_v48 = vld [vmem:[%s8811_s28 + $0x21] sm:$0xff]  ;;  %v7126_v23 = vld.sshfl [vmem:[%s8811_s28 + $0x19] sm:$0x3 pattern:$0x76325410] }
  0xba   : > { %5151 = vmatprep.mubr.f32.mxu1 %v3611_v30  ;;  %v3169_v35 = vrot.slane %v3162_v31, %v8814_v20  ;;  %8095 = vmatpush3.bf16.msra.mxu1 %v8094_v58  ;;  %v8096_v40 = vpack.c.bf16 %v4885_v28, %v4884_v26  ;;  %v1652_v42 = vcombine.high %v7136_v29, %v7136_v29 }
  0xbb   : > { %v3386_v45 = vcombine.low %v3378_v24, %v3385_v36  ;;  %v2944_v43 = vrot.slane %v2937_v37, %v8814_v20  ;;  %v3612_v46 = vcombine.low %v1324_v38, %v7105_v22  ;;  %v3387_v47 = vcombine.low %v1043_v39, %v7075_v33  ;;  %8100 = vmatprep.subr.bf16.mxu0 %v8508_v32  ;;  %v7156_v33 = vld.sshfl [vmem:[%s8811_s28 + $0x1a] sm:$0x3 pattern:$0x76325410] }
  0xbc   : > { %5026 = vmatprep.mubr.f32.mxu0 %v3169_v35  ;;  %8097 = vmatprep.subr.bf16.mxu1 %v8096_v40  ;;  %v1659_v49 = vrot.slane %v7136_v29, %v8814_v20  ;;  %v1666_v52 = vrot.slane %v1652_v42, %v8814_v20  ;;  %v8098_v55 = vpack.c.bf16 %v4869_v61, %v4868_v19  ;;  %v7198_v19 = vld [vmem:[%s8811_s28 + $0x31] sm:$0xff] }
  0xbd   : > { %5152 = vmatmul.mubr.f32.gmra.mrb[22].mxu1 %v3386_v45  ;;  %5027 = vmatmul.mubr.f32.gmra.mrb[24].mxu0 %v2944_v43  ;;  %v3619_v60 = vrot.slane %v3612_v46, %v8814_v20  ;;  %v3394_v17 = vrot.slane %v3387_v47, %v8814_v20  ;;  %v1372_v2 = vcombine.high %v7106_v6, %v7106_v6 }
  0xbe   : > { %v1667_v4 = vcombine.high %v1659_v49, %v1659_v49  ;;  %v1668_v5 = vcombine.high %v1666_v52, %v1666_v52  ;;  %8099 = vmatpush3.bf16.msra.mxu1 %v8098_v55  ;;  %v1379_v7 = vrot.slane %v7106_v6, %v8814_v20  ;;  %v2213_v18 = vcombine.high %v7196_v48, %v7196_v48  ;;  %v7168_v6 = vld [vmem:[%s8811_s28 + $0x30] sm:$0xff] }
  0xbf   : > { %5156 = vmatprep.mubr.f32.mxu1 %v3619_v60  ;;  %v1386_v54 = vrot.slane %v1372_v2, %v8814_v20  ;;  %v2220_v10 = vrot.slane %v7196_v48, %v8814_v20  ;;  %v8101_v41 = vpack.c.bf16 %v9558_v57, %v9553_v56  ;;  %v1933_v1 = vcombine.high %v7166_v59, %v7166_v59  ;;  %v7216_v48 = vld.sshfl [vmem:[%s8811_s28 + $0x29] sm:$0x3 pattern:$0x76325410]  ;;  %v7140_v2 = vld [vmem:[%s8811_s28 + $0x32] sm:$0xff] }
  0xc0   : > { %v3858_v51 = vcombine.low %v1659_v49, %v1667_v4  ;;  %v3859_v62 = vcombine.low %v1666_v52, %v1668_v5  ;;  %v1387_v11 = vcombine.high %v1379_v7, %v1379_v7  ;;  %v2227_v12 = vrot.slane %v2213_v18, %v8814_v20  ;;  %v7186_v60 = vld.sshfl [vmem:[%s8811_s28 + $0x28] sm:$0x3 pattern:$0x76325410] }
  0xc1   : > { %5157 = vmatmul.mubr.f32.gmra.mrb[24].mxu1 %v3394_v17  ;;  %v1388_v16 = vcombine.high %v1386_v54, %v1386_v54  ;;  %v2228_v63 = vcombine.high %v2220_v10, %v2220_v10  ;;  %v1940_v14 = vrot.slane %v7166_v59, %v8814_v20  ;;  %v1947_v15 = vrot.slane %v1933_v1, %v8814_v20 }
  0xc2   : > { %v3866_v27 = vrot.slane %v3858_v51, %v8814_v20  ;;  %v3873_v8 = vrot.slane %v3859_v62, %v8814_v20  ;;  %v3633_v9 = vcombine.low %v1379_v7, %v1387_v11  ;;  %v9574_v53 = vcombine.high %v2227_v12, %v2227_v12 }
  0xc3   : > { %v3634_v50 = vcombine.low %v1386_v54, %v1388_v16  ;;  %v4308_v34 = vcombine.low %v2220_v10, %v2228_v63  ;;  %v1948_v21 = vcombine.high %v1940_v14, %v1940_v14  ;;  %v1949_v22 = vcombine.high %v1947_v15, %v1947_v15  ;;  %v7157_v54 = vld.sshfl [vmem:[%s8811_s28 + $0x2a] sm:$0x3 pattern:$0x76325410] }
  0xc4   : > { %v3874_v24 = vcombine.low %v3866_v27, %v3873_v8  ;;  %v3641_v25 = vrot.slane %v3633_v9, %v8814_v20  ;;  %v4309_v26 = vcombine.low %v2227_v12, %v9574_v53  ;;  %v1676_v28 = vcombine.high %v7138_v0, %v7138_v0 }
  0xc5   : > { %v3648_v29 = vrot.slane %v3634_v50, %v8814_v20  ;;  %v4316_v30 = vrot.slane %v4308_v34, %v8814_v20  ;;  %v4083_v31 = vcombine.low %v1940_v14, %v1948_v21  ;;  %v4084_v58 = vcombine.low %v1947_v15, %v1949_v22  ;;  %v4889_v14 = vld [vmem:[%s10687_s1 + $0x418] sm:$0xff]  ;;  %v7200_v21 = vld [vmem:[%s8811_s28 + $0x41] sm:$0xff] }
  0xc6   : > { %5226 = vmatprep.mubr.f32.mxu0 %v3874_v24  ;;  %v4323_v36 = vrot.slane %v4309_v26, %v8814_v20  ;;  %v1683_v37 = vrot.slane %v7138_v0, %v8814_v20  ;;  %v1690_v38 = vrot.slane %v1676_v28, %v8814_v20  ;;  %v3650_v39 = vcombine.low %v7126_v23, %v2220_v10  ;;  %v9618_v22 = vld [vmem:[%s8811_s28 + $0x40] sm:$0xff]  ;;  %v7217_v28 = vld.sshfl [vmem:[%s8811_s28 + $0x39] sm:$0x3 pattern:$0x76325410] }
  0xc7   : > { %v3649_v61 = vcombine.low %v3641_v25, %v3648_v29  ;;  %v4091_v35 = vrot.slane %v4083_v31, %v8814_v20  ;;  %v4098_v40 = vrot.slane %v4084_v58, %v8814_v20  ;;  %v3651_v42 = vcombine.low %v2228_v63, %v2227_v12  ;;  %v4888_v63 = vld [vmem:[%s10687_s1 + $0x410] sm:$0xff] }
  0xc8   : > { %v4324_v45 = vcombine.low %v4316_v30, %v4323_v36  ;;  %v1691_v43 = vcombine.high %v1683_v37, %v1683_v37  ;;  %v3875_v46 = vcombine.low %v7156_v33, %v1683_v37  ;;  %v3658_v47 = vrot.slane %v3650_v39, %v8814_v20  ;;  %v7187_v33 = vld.sshfl [vmem:[%s8811_s28 + $0x38] sm:$0x3 pattern:$0x76325410] }
  0xc9   : > { %5227 = vmatmul.mubr.f32.vlgmr.msra.gmra.mrb[26].mxu0 %v3649_v61  ;;  %v4099_v49 = vcombine.low %v4091_v35, %v4098_v40  ;;  %v3665_v52 = vrot.slane %v3651_v42, %v8814_v20  ;;  %v2237_v55 = vcombine.high %v7198_v19, %v7198_v19  ;;  %v2244_v56 = vrot.slane %v7198_v19, %v8814_v20  ;;  %v7142_v19 = vld [vmem:[%s8811_s28 + $0x42] sm:$0xff] }
  0xca   : > { %5356 = vmatprep.mubr.f32.mxu1 %v4324_v45  ;;  %8102 = vmatpush3.bf16.msra.mxu0 %v8101_v41  ;;  %v3876_v57 = vcombine.low %v1691_v43, %v1690_v38  ;;  %v3883_v59 = vrot.slane %v3875_v46, %v8814_v20  ;;  %v1957_v17 = vcombine.high %v7168_v6, %v7168_v6 }
  0xcb   : > { %5357 = vmatmul.mubr.f32.vlgmr.msra.gmra.mrb[26].mxu1 %v4099_v49  ;;  %v3666_v4 = vcombine.low %v3658_v47, %v3665_v52  ;;  %v9597_v5 = vrot.slane %v2237_v55, %v8814_v20  ;;  %v2252_v7 = vcombine.high %v2244_v56, %v2244_v56  ;;  %v4325_v18 = vcombine.low %v7216_v48, %v2244_v56  ;;  %v9636_v47 = vld.sshfl [vmem:[%s8811_s28 + $0x3a] sm:$0x3 pattern:$0x76325410] }
  0xcc   : > { %v3890_v10 = vrot.slane %v3876_v57, %v8814_v20  ;;  %v1964_v1 = vrot.slane %v7168_v6, %v8814_v20  ;;  %v1971_v41 = vrot.slane %v1957_v17, %v8814_v20  ;;  %v1692_v51 = vcombine.high %v1690_v38, %v1690_v38  ;;  %8103 = vmatprep.subr.bf16.mxu0 %v8508_v32 }
  0xcd   : > { %v4326_v62 = vcombine.low %v2252_v7, %v9597_v5  ;;  %v4333_v11 = vrot.slane %v4325_v18, %v8814_v20  ;;  %v1707_v12 = vrot.slane %v7140_v2, %v8814_v20  ;;  %v3667_v16 = vcombine.low %v9574_v53, %v7216_v48  ;;  %v7218_v18 = vld.sshfl [vmem:[%s8811_s28 + $0x49] sm:$0x3 pattern:$0x76325410] }
  0xce   : > { %v3891_v15 = vcombine.low %v3883_v59, %v3890_v10  ;;  %v1972_v0 = vcombine.high %v1964_v1, %v1964_v1  ;;  %v4100_v27 = vcombine.low %v7186_v60, %v1964_v1  ;;  %v3892_v8 = vcombine.low %v1692_v51, %v7157_v54 }
  0xcf   : > { %v4340_v9 = vrot.slane %v4326_v62, %v8814_v20  ;;  %v1715_v50 = vcombine.high %v1707_v12, %v1707_v12  ;;  %v3668_v34 = vcombine.low %v2244_v56, %v2252_v7  ;;  %v3675_v53 = vrot.slane %v3667_v16, %v8814_v20  ;;  %v7202_v56 = vld [vmem:[%s8811_s28 + $0x51] sm:$0xff] }
  0xd0   : > { %5231 = vmatprep.mubr.f32.mxu0 %v3891_v15  ;;  %v4101_v23 = vcombine.low %v1972_v0, %v1971_v41  ;;  %v4108_v24 = vrot.slane %v4100_v27, %v8814_v20  ;;  %v3900_v25 = vrot.slane %v3892_v8, %v8814_v20  ;;  %v8104_v26 = vpack.c.bf16 %v4889_v14, %v4888_v63  ;;  %v4890_v63 = vld [vmem:[%s10687_s1 + $0x420] sm:$0xff]  ;;  %v4891_v14 = vld [vmem:[%s10687_s1 + $0x428] sm:$0xff] }
  0xd1   : > { %5232 = vmatmul.mubr.f32.gmra.mrb[28].mxu0 %v3666_v4  ;;  %v4341_v29 = vcombine.low %v4333_v11, %v4340_v9  ;;  %v3893_v30 = vcombine.low %v1707_v12, %v1715_v50  ;;  %v3682_v31 = vrot.slane %v3668_v34, %v8814_v20  ;;  %v2253_v58 = vcombine.high %v9597_v5, %v9597_v5  ;;  %v7188_v8 = vld.sshfl [vmem:[%s8811_s28 + $0x48] sm:$0x3 pattern:$0x76325410] }
  0xd2   : > { %v4115_v36 = vrot.slane %v4101_v23, %v8814_v20  ;;  %8105 = vmatpush3.bf16.msra.mxu0 %v8104_v26  ;;  %v2268_v37 = vrot.slane %v7200_v21, %v8814_v20  ;;  %v1973_v38 = vcombine.high %v1971_v41, %v1971_v41  ;;  %v1988_v39 = vrot.slane %v9618_v22, %v8814_v20 }
  0xd3   : > { %5361 = vmatprep.mubr.f32.mxu1 %v4341_v29  ;;  %v3907_v61 = vrot.slane %v3893_v30, %v8814_v20  ;;  %v3683_v35 = vcombine.low %v3675_v53, %v3682_v31  ;;  %v4342_v40 = vcombine.low %v2253_v58, %v7217_v28  ;;  %v1700_v42 = vcombine.high %v7140_v2, %v7140_v2 }
  0xd4   : > { %v4116_v6 = vcombine.low %v4108_v24, %v4115_v36  ;;  %v9633_v45 = vcombine.high %v2268_v37, %v2268_v37  ;;  %v1996_v43 = vcombine.high %v1988_v39, %v1988_v39  ;;  %v4117_v46 = vcombine.low %v1973_v38, %v7187_v33  ;;  %8106 = vmatprep.subr.bf16.mxu0 %v8508_v32 }
  0xd5   : > { %v3908_v48 = vcombine.low %v3900_v25, %v3907_v61  ;;  %v4350_v49 = vrot.slane %v4342_v40, %v8814_v20  ;;  %v1714_v52 = vrot.slane %v1700_v42, %v8814_v20  ;;  %v9642_v55 = vrot.slane %v7142_v19, %v8814_v20 }
  0xd6   : > { %5362 = vmatmul.mubr.f32.gmra.mrb[28].mxu1 %v4116_v6  ;;  %v4343_v57 = vcombine.low %v2268_v37, %v9633_v45  ;;  %v4118_v59 = vcombine.low %v1988_v39, %v1996_v43  ;;  %v4125_v60 = vrot.slane %v4117_v46, %v8814_v20  ;;  %v3684_v17 = vcombine.low %v9597_v5, %v2253_v58  ;;  %v7172_v5 = vld [vmem:[%s8811_s28 + $0x50] sm:$0xff]  ;;  %v9686_v39 = vld.sshfl [vmem:[%s8811_s28 + $0x4a] sm:$0x3 pattern:$0x76325410] }
  0xd7   : > { %5236 = vmatprep.mubr.f32.mxu0 %v3908_v48  ;;  %v1716_v2 = vcombine.high %v1714_v52, %v1714_v52  ;;  %v3910_v4 = vcombine.low %v9636_v47, %v9642_v55  ;;  %v3685_v7 = vcombine.low %v7217_v28, %v2268_v37  ;;  %v2261_v54 = vcombine.high %v7200_v21, %v7200_v21 }
  0xd8   : > { %5237 = vmatmul.mubr.f32.gmra.mrb[30].mxu0 %v3683_v35  ;;  %v4357_v10 = vrot.slane %v4343_v57, %v8814_v20  ;;  %v4132_v1 = vrot.slane %v4118_v59, %v8814_v20  ;;  %v3692_v41 = vrot.slane %v3684_v17, %v8814_v20  ;;  %v9655_v51 = vrot.slane %v7202_v56, %v8814_v20  ;;  %v9706_v59 = vld.sshfl [vmem:[%s8811_s28 + $0x59] sm:$0x3 pattern:$0x76325410] }
  0xd9   : > { %v3909_v62 = vcombine.low %v1714_v52, %v1716_v2  ;;  %v3924_v11 = vrot.slane %v3910_v4, %v8814_v20  ;;  %v3699_v12 = vrot.slane %v3685_v7, %v8814_v20  ;;  %v2275_v16 = vrot.slane %v2261_v54, %v8814_v20 }
  0xda   : > { %v4358_v15 = vcombine.low %v4350_v49, %v4357_v10  ;;  %v4133_v0 = vcombine.low %v4125_v60, %v4132_v1  ;;  %v4360_v27 = vcombine.low %v7218_v18, %v9655_v51  ;;  %v1981_v9 = vcombine.high %v9618_v22, %v9618_v22  ;;  %v7144_v49 = vld [vmem:[%s8811_s28 + $0x52] sm:$0xff] }
  0xdb   : > { %v3917_v50 = vrot.slane %v3909_v62, %v8814_v20  ;;  %v3700_v34 = vcombine.low %v3692_v41, %v3699_v12  ;;  %v2277_v53 = vcombine.high %v2275_v16, %v2275_v16  ;;  %v2012_v21 = vrot.slane %v7172_v5, %v8814_v20  ;;  %v7189_v10 = vld.sshfl [vmem:[%s8811_s28 + $0x58] sm:$0x3 pattern:$0x76325410] }
  0xdc   : > { %5366 = vmatprep.mubr.f32.mxu1 %v4358_v15  ;;  %v4374_v23 = vrot.slane %v4360_v27, %v8814_v20  ;;  %v1995_v24 = vrot.slane %v1981_v9, %v8814_v20  ;;  %v8107_v25 = vpack.c.bf16 %v4891_v14, %v4890_v63  ;;  %v1724_v26 = vcombine.high %v7142_v19, %v7142_v19 }
  0xdd   : > { %5367 = vmatmul.mubr.f32.gmra.mrb[30].mxu1 %v4133_v0  ;;  %v3925_v28 = vcombine.low %v3917_v50, %v3924_v11  ;;  %v4359_v29 = vcombine.low %v2275_v16, %v2277_v53  ;;  %v4135_v30 = vcombine.low %v7188_v8, %v2012_v21  ;;  %v9677_v22 = vcombine.high %v9642_v55, %v9642_v55 }
  0xde   : > { %v1997_v31 = vcombine.high %v1995_v24, %v1995_v24  ;;  %8108 = vmatpush3.bf16.msra.mxu0 %v8107_v25  ;;  %v9680_v58 = vrot.slane %v1724_v26, %v8814_v20  ;;  %v3701_v33 = vcombine.low %v9633_v45, %v2275_v16  ;;  %v3702_v36 = vcombine.low %v2277_v53, %v7218_v18  ;;  %v7204_v16 = vld [vmem:[%s8811_s28 + $0x61] sm:$0xff]  ;;  %v4893_v53 = vld [vmem:[%s10687_s1 + $0x438] sm:$0xff] }
  0xdf   : > { %5241 = vmatprep.mubr.f32.mxu0 %v3925_v28  ;;  %v4367_v37 = vrot.slane %v4359_v29, %v8814_v20  ;;  %v4149_v38 = vrot.slane %v4135_v30, %v8814_v20  ;;  %v2285_v19 = vcombine.high %v7202_v56, %v7202_v56  ;;  %v2300_v61 = vcombine.high %v9655_v51, %v9655_v51  ;;  %v7174_v25 = vld [vmem:[%s8811_s28 + $0x60] sm:$0xff] }
  0xe0   : > { %5242 = vmatmul.mubr.f32.gmra.mrb[32].mxu0 %v3700_v34  ;;  %v4134_v35 = vcombine.low %v1995_v24, %v1997_v31  ;;  %v9692_v40 = vcombine.high %v9680_v58, %v9680_v58  ;;  %v3926_v42 = vcombine.low %v9677_v22, %v9680_v58  ;;  %v3709_v6 = vrot.slane %v3701_v33, %v8814_v20  ;;  %v4892_v34 = vld [vmem:[%s10687_s1 + $0x430] sm:$0xff]  ;;  %v7146_v31 = vld [vmem:[%s8811_s28 + $0x62] sm:$0xff] }
  0xe1   : > { %v4375_v45 = vcombine.low %v4367_v37, %v4374_v23  ;;  %v3716_v43 = vrot.slane %v3702_v36, %v8814_v20  ;;  %v2299_v46 = vrot.slane %v2285_v19, %v8814_v20  ;;  %v2005_v48 = vcombine.high %v7172_v5, %v7172_v5  ;;  %8109 = vmatprep.subr.bf16.mxu0 %v8508_v32 }
  0xe2   : > { %v4142_v52 = vrot.slane %v4134_v35, %v8814_v20  ;;  %v3927_v56 = vcombine.low %v9692_v40, %v9686_v39  ;;  %v3934_v57 = vrot.slane %v3926_v42, %v8814_v20  ;;  %v2020_v60 = vcombine.high %v2012_v21, %v2012_v21 }
  0xe3   : > { %5371 = vmatprep.mubr.f32.mxu1 %v4375_v45  ;;  %v3717_v17 = vcombine.low %v3709_v6, %v3716_v43  ;;  %v2301_v2 = vcombine.high %v2299_v46, %v2299_v46  ;;  %v4376_v4 = vcombine.low %v2300_v61, %v2299_v46  ;;  %v2019_v7 = vrot.slane %v2005_v48, %v8814_v20 }
  0xe4   : > { %v4150_v18 = vcombine.low %v4142_v52, %v4149_v38  ;;  %v3941_v54 = vrot.slane %v3927_v56, %v8814_v20  ;;  %v1748_v1 = vcombine.high %v7144_v49, %v7144_v49  ;;  %v9712_v41 = vrot.slane %v7144_v49, %v8814_v20 }
  0xe5   : > { %v4377_v5 = vcombine.low %v2301_v2, %v9706_v59  ;;  %v4384_v62 = vrot.slane %v4376_v4, %v8814_v20  ;;  %v2021_v11 = vcombine.high %v2019_v7, %v2019_v7  ;;  %v4151_v12 = vcombine.low %v2020_v60, %v2019_v7  ;;  %v7206_v7 = vld [vmem:[%s8811_s28 + $0x71] sm:$0xff] }
  0xe6   : > { %5372 = vmatmul.mubr.f32.gmra.mrb[32].mxu1 %v4150_v18  ;;  %v3942_v63 = vcombine.low %v3934_v57, %v3941_v54  ;;  %v9718_v14 = vrot.slane %v1748_v1, %v8814_v20  ;;  %v9722_v15 = vcombine.high %v9712_v41, %v9712_v41  ;;  %v3718_v0 = vcombine.low %v9655_v51, %v2300_v61 }
  0xe7   : > { %v4391_v27 = vrot.slane %v4377_v5, %v8814_v20  ;;  %v4152_v8 = vcombine.low %v2021_v11, %v7189_v10  ;;  %v4159_v9 = vrot.slane %v4151_v12, %v8814_v20  ;;  %v3719_v50 = vcombine.low %v2299_v46, %v2301_v2  ;;  %v9754_v46 = vld.sshfl [vmem:[%s8811_s28 + $0x5a] sm:$0x3 pattern:$0x76325410]  ;;  %v7176_v12 = vld [vmem:[%s8811_s28 + $0x70] sm:$0xff] }
  0xe8   : > { %5246 = vmatprep.mubr.f32.mxu0 %v3942_v63  ;;  %v9735_v21 = vcombine.high %v9718_v14, %v9718_v14  ;;  %v3943_v51 = vcombine.low %v9712_v41, %v9722_v15  ;;  %v3726_v23 = vrot.slane %v3718_v0, %v8814_v20  ;;  %v2309_v24 = vcombine.high %v7204_v16, %v7204_v16 }
  0xe9   : > { %5247 = vmatmul.mubr.f32.gmra.mrb[34].mxu0 %v3717_v17  ;;  %v4392_v26 = vcombine.low %v4384_v62, %v4391_v27  ;;  %v4166_v28 = vrot.slane %v4152_v8, %v8814_v20  ;;  %v3733_v29 = vrot.slane %v3719_v50, %v8814_v20  ;;  %v2316_v30 = vrot.slane %v7204_v16, %v8814_v20  ;;  %v7220_v27 = vld.sshfl [vmem:[%s8811_s28 + $0x69] sm:$0x3 pattern:$0x76325410] }
  0xea   : > { %v3944_v33 = vcombine.low %v9718_v14, %v9735_v21  ;;  %v3951_v36 = vrot.slane %v3943_v51, %v8814_v20  ;;  %v2323_v37 = vrot.slane %v2309_v24, %v8814_v20  ;;  %v8110_v38 = vpack.c.bf16 %v4893_v53, %v4892_v34 }
  0xeb   : > { %5376 = vmatprep.mubr.f32.mxu1 %v4392_v26  ;;  %v4167_v19 = vcombine.low %v4159_v9, %v4166_v28  ;;  %v3734_v61 = vcombine.low %v3726_v23, %v3733_v29  ;;  %v2324_v35 = vcombine.high %v2316_v30, %v2316_v30  ;;  %v2029_v42 = vcombine.high %v7174_v25, %v7174_v25  ;;  %v7148_v28 = vld [vmem:[%s8811_s28 + $0x72] sm:$0xff] }
  0xec   : > { %v3958_v6 = vrot.slane %v3944_v33, %v8814_v20  ;;  %v9750_v45 = vcombine.high %v2323_v37, %v2323_v37  ;;  %8111 = vmatpush3.bf16.msra.mxu0 %v8110_v38  ;;  %v2036_v43 = vrot.slane %v7174_v25, %v8814_v20  ;;  %v1772_v48 = vcombine.high %v7146_v31, %v7146_v31  ;;  %v7190_v25 = vld.sshfl [vmem:[%s8811_s28 + $0x68] sm:$0x3 pattern:$0x76325410] }
  0xed   : > { %5377 = vmatmul.mubr.f32.gmra.mrb[34].mxu1 %v4167_v19  ;;  %v4393_v49 = vcombine.low %v2316_v30, %v2324_v35  ;;  %v2043_v52 = vrot.slane %v2029_v42, %v8814_v20  ;;  %v9758_v56 = vrot.slane %v7146_v31, %v8814_v20  ;;  %v3735_v57 = vcombine.low %v9706_v59, %v2316_v30  ;;  %v4895_v38 = vld [vmem:[%s10687_s1 + $0x448] sm:$0xff] }
  0xee   : > { %v3959_v60 = vcombine.low %v3951_v36, %v3958_v6  ;;  %v4394_v17 = vcombine.low %v2323_v37, %v9750_v45  ;;  %v2044_v2 = vcombine.high %v2036_v43, %v2036_v43  ;;  %v9763_v4 = vrot.slane %v1772_v48, %v8814_v20  ;;  %8112 = vmatprep.subr.bf16.mxu0 %v8508_v32  ;;  %v9793_v36 = vld.sshfl [vmem:[%s8811_s28 + $0x6a] sm:$0x3 pattern:$0x76325410] }
  0xef   : > { %v4401_v18 = vrot.slane %v4393_v49, %v8814_v20  ;;  %v2045_v54 = vcombine.high %v2043_v52, %v2043_v52  ;;  %v9770_v10 = vcombine.high %v9758_v56, %v9758_v56  ;;  %v3960_v59 = vcombine.low %v9754_v46, %v9758_v56 }
  0xf0   : > { %5251 = vmatprep.mubr.f32.mxu0 %v3959_v60  ;;  %v4408_v1 = vrot.slane %v4394_v17, %v8814_v20  ;;  %v4168_v5 = vcombine.low %v2036_v43, %v2044_v2  ;;  %v3736_v62 = vcombine.low %v2324_v35, %v2323_v37  ;;  %v3743_v11 = vrot.slane %v3735_v57, %v8814_v20  ;;  %v4894_v37 = vld [vmem:[%s10687_s1 + $0x440] sm:$0xff] }
  0xf1   : > { %5252 = vmatmul.mubr.f32.gmra.mrb[36].mxu0 %v3734_v61  ;;  %v4169_v16 = vcombine.low %v2043_v52, %v2045_v54  ;;  %v3961_v63 = vcombine.low %v9770_v10, %v9763_v4  ;;  %v3968_v0 = vrot.slane %v3960_v59, %v8814_v20  ;;  %v2333_v8 = vcombine.high %v7206_v7, %v7206_v7  ;;  %v9814_v17 = vld [vmem:[%s8811_s28 + $0x81] sm:$0xff]  ;;  %v7221_v59 = vld.sshfl [vmem:[%s8811_s28 + $0x79] sm:$0x3 pattern:$0x76325410] }
  0xf2   : > { %v4409_v9 = vcombine.low %v4401_v18, %v4408_v1  ;;  %v4176_v50 = vrot.slane %v4168_v5, %v8814_v20  ;;  %v3750_v34 = vrot.slane %v3736_v62, %v8814_v20  ;;  %v2340_v53 = vrot.slane %v7206_v7, %v8814_v20 }
  0xf3   : > { %v4183_v51 = vrot.slane %v4169_v16, %v8814_v20  ;;  %v3975_v23 = vrot.slane %v3961_v63, %v8814_v20  ;;  %v9787_v24 = vrot.slane %v2333_v8, %v8814_v20  ;;  %v2053_v26 = vcombine.high %v7176_v12, %v7176_v12 }
  0xf4   : > { %5381 = vmatprep.mubr.f32.mxu1 %v4409_v9  ;;  %v3751_v29 = vcombine.low %v3743_v11, %v3750_v34  ;;  %v2348_v30 = vcombine.high %v2340_v53, %v2340_v53  ;;  %v4410_v31 = vcombine.low %v7220_v27, %v2340_v53  ;;  %v2060_v33 = vrot.slane %v7176_v12, %v8814_v20  ;;  %v9828_v12 = vld [vmem:[%s8811_s28 + $0x80] sm:$0xff] }
  0xf5   : > { %v4184_v19 = vcombine.low %v4176_v50, %v4183_v51  ;;  %v3976_v61 = vcombine.low %v3968_v0, %v3975_v23  ;;  %v2067_v35 = vrot.slane %v2053_v26, %v8814_v20  ;;  %v9804_v42 = vcombine.high %v9763_v4, %v9763_v4 }
  0xf6   : > { %v4411_v6 = vcombine.low %v2348_v30, %v9787_v24  ;;  %v4418_v43 = vrot.slane %v4410_v31, %v8814_v20  ;;  %v2068_v48 = vcombine.high %v2060_v33, %v2060_v33  ;;  %v4185_v49 = vcombine.low %v7190_v25, %v2060_v33 }
  0xf7   : > { %5382 = vmatmul.mubr.f32.gmra.mrb[36].mxu1 %v4184_v19  ;;  %5256 = vmatprep.mubr.f32.mxu0 %v3976_v61  ;;  %v9809_v52 = vrot.slane %v7148_v28, %v8814_v20  ;;  %v3977_v57 = vcombine.low %v9804_v42, %v9793_v36  ;;  %v8113_v60 = vpack.c.bf16 %v4895_v38, %v4894_v37  ;;  %v9847_v37 = vld.sshfl [vmem:[%s8811_s28 + $0x7a] sm:$0x3 pattern:$0x76325410] }
  0xf8   : > { %5257 = vmatmul.mubr.f32.gmra.mrb[38].mxu0 %v3751_v29  ;;  %v4425_v2 = vrot.slane %v4411_v6, %v8814_v20  ;;  %v4186_v7 = vcombine.low %v2068_v48, %v2067_v35  ;;  %v4193_v18 = vrot.slane %v4185_v49, %v8814_v20  ;;  %v3752_v54 = vcombine.low %v9750_v45, %v7220_v27  ;;  %v7191_v27 = vld.sshfl [vmem:[%s8811_s28 + $0x78] sm:$0x3 pattern:$0x76325410] }
  0xf9   : > { %v9822_v1 = vcombine.high %v9809_v52, %v9809_v52  ;;  %v3985_v5 = vrot.slane %v3977_v57, %v8814_v20  ;;  %8114 = vmatpush3.bf16.msra.mxu0 %v8113_v60  ;;  %v3753_v62 = vcombine.low %v2340_v53, %v2348_v30  ;;  %v2349_v11 = vcombine.high %v9787_v24, %v9787_v24  ;;  %v7150_v53 = vld [vmem:[%s8811_s28 + $0x82] sm:$0xff] }
  0xfa   : > { %v4426_v16 = vcombine.low %v4418_v43, %v4425_v2  ;;  %v4200_v63 = vrot.slane %v4186_v7, %v8814_v20  ;;  %v3760_v45 = vrot.slane %v3752_v54, %v8814_v20  ;;  %v2364_v0 = vrot.slane %v9814_v17, %v8814_v20  ;;  %8115 = vmatprep.subr.bf16.mxu0 %v8508_v32 }
  0xfb   : > { %v3978_v8 = vcombine.low %v9809_v52, %v9822_v1  ;;  %v3767_v9 = vrot.slane %v3753_v62, %v8814_v20  ;;  %v4427_v50 = vcombine.low %v2349_v11, %v7221_v59  ;;  %v2069_v34 = vcombine.high %v2067_v35, %v2067_v35  ;;  %v7180_v62 = vld [vmem:[%s8811_s28 + $0x90] sm:$0xff] }
  0xfc   : > { %5386 = vmatprep.mubr.f32.mxu1 %v4426_v16  ;;  %v4201_v51 = vcombine.low %v4193_v18, %v4200_v63  ;;  %v9840_v23 = vcombine.high %v2364_v0, %v2364_v0  ;;  %v2084_v25 = vrot.slane %v9828_v12, %v8814_v20  ;;  %v1796_v26 = vcombine.high %v7148_v28, %v7148_v28  ;;  %v7210_v28 = vld [vmem:[%s8811_s28 + $0x91] sm:$0xff]  ;;  %v7222_v18 = vld.sshfl [vmem:[%s8811_s28 + $0x89] sm:$0x3 pattern:$0x76325410] }
  0xfd   : > { %v3992_v29 = vrot.slane %v3978_v8, %v8814_v20  ;;  %v3768_v30 = vcombine.low %v3760_v45, %v3767_v9  ;;  %v4435_v31 = vrot.slane %v4427_v50, %v8814_v20  ;;  %v4202_v33 = vcombine.low %v2069_v34, %v7191_v27  ;;  %v4897_v16 = vld [vmem:[%s10687_s1 + $0x458] sm:$0xff]  ;;  %v7192_v50 = vld.sshfl [vmem:[%s8811_s28 + $0x88] sm:$0x3 pattern:$0x76325410] }
  0xfe   : > { %5387 = vmatmul.mubr.f32.gmra.mrb[38].mxu1 %v4201_v51  ;;  %v4428_v38 = vcombine.low %v2364_v0, %v9840_v23  ;;  %v2092_v19 = vcombine.high %v2084_v25, %v2084_v25  ;;  %v9851_v61 = vrot.slane %v1796_v26, %v8814_v20  ;;  %v9854_v35 = vrot.slane %v7150_v53, %v8814_v20 }
  0xff   : > { %v3993_v6 = vcombine.low %v3985_v5, %v3992_v29  ;;  %v4210_v43 = vrot.slane %v4202_v33, %v8814_v20  ;;  %v3769_v48 = vcombine.low %v9787_v24, %v2349_v11  ;;  %v3770_v49 = vcombine.low %v7221_v59, %v2364_v0  ;;  %v4896_v11 = vld [vmem:[%s10687_s1 + $0x450] sm:$0xff] }
 0x100   : > { %v4442_v57 = vrot.slane %v4428_v38, %v8814_v20  ;;  %v4203_v60 = vcombine.low %v2084_v25, %v2092_v19  ;;  %v9862_v2 = vcombine.high %v9851_v61, %v9851_v61  ;;  %v3995_v7 = vcombine.low %v9847_v37, %v9854_v35 }
 0x101   : > { %5261 = vmatprep.mubr.f32.mxu0 %v3993_v6  ;;  %v3777_v54 = vrot.slane %v3769_v48, %v8814_v20  ;;  %v3784_v5 = vrot.slane %v3770_v49, %v8814_v20  ;;  %v2357_v24 = vcombine.high %v9814_v17, %v9814_v17  ;;  %v9872_v59 = vrot.slane %v7210_v28, %v8814_v20 }
 0x102   : > { %5262 = vmatmul.mubr.f32.gmra.mrb[40].mxu0 %v3768_v30  ;;  %v4443_v63 = vcombine.low %v4435_v31, %v4442_v57  ;;  %v4217_v45 = vrot.slane %v4203_v60, %v8814_v20  ;;  %v3994_v0 = vcombine.low %v9851_v61, %v9862_v2  ;;  %v4009_v17 = vrot.slane %v3995_v7, %v8814_v20 }
 0x103   : > { %v3785_v27 = vcombine.low %v3777_v54, %v3784_v5  ;;  %v2371_v8 = vrot.slane %v2357_v24, %v8814_v20  ;;  %v4445_v9 = vcombine.low %v7222_v18, %v9872_v59  ;;  %v2077_v34 = vcombine.high %v9828_v12, %v9828_v12 }
 0x104   : > { %5391 = vmatprep.mubr.f32.mxu1 %v4443_v63  ;;  %v4218_v51 = vcombine.low %v4210_v43, %v4217_v45  ;;  %v4002_v25 = vrot.slane %v3994_v0, %v8814_v20  ;;  %v2108_v26 = vrot.slane %v7180_v62, %v8814_v20  ;;  %v8116_v29 = vpack.c.bf16 %v4897_v16, %v4896_v11  ;;  %v7152_v45 = vld [vmem:[%s8811_s28 + $0x92] sm:$0xff] }
 0x105   : > { %v2373_v30 = vcombine.high %v2371_v8, %v2371_v8  ;;  %v4459_v31 = vrot.slane %v4445_v9, %v8814_v20  ;;  %v2091_v33 = vrot.slane %v2077_v34, %v8814_v20  ;;  %v1820_v38 = vcombine.high %v7150_v53, %v7150_v53 }
 0x106   : > { %5392 = vmatmul.mubr.f32.gmra.mrb[40].mxu1 %v4218_v51  ;;  %v4010_v19 = vcombine.low %v4002_v25, %v4009_v17  ;;  %v4220_v6 = vcombine.low %v7192_v50, %v2108_v26  ;;  %8117 = vmatpush3.bf16.msra.mxu0 %v8116_v29  ;;  %v9896_v12 = vcombine.high %v9854_v35, %v9854_v35 }
 0x107   : > { %v4444_v43 = vcombine.low %v2371_v8, %v2373_v30  ;;  %v2093_v48 = vcombine.high %v2091_v33, %v2091_v33  ;;  %v9899_v49 = vrot.slane %v1820_v38, %v8814_v20  ;;  %v3786_v57 = vcombine.low %v9840_v23, %v2371_v8  ;;  %8118 = vmatprep.subr.bf16.mxu0 %v8508_v32 }
 0x108   : > { %5266 = vmatprep.mubr.f32.mxu0 %v4010_v19  ;;  %v4234_v53 = vrot.slane %v4220_v6, %v8814_v20  ;;  %v3787_v60 = vcombine.low %v2373_v30, %v7222_v18  ;;  %v2381_v7 = vcombine.high %v7210_v28, %v7210_v28  ;;  %v2396_v54 = vcombine.high %v9872_v59, %v9872_v59  ;;  %v7193_v30 = vld.sshfl [vmem:[%s8811_s28 + $0x98] sm:$0x3 pattern:$0x76325410]  ;;  %v4898_v6 = vld [vmem:[%s10687_s1 + $0x460] sm:$0xff] }
 0x109   : > { %5267 = vmatmul.mubr.f32.gmra.mrb[42].mxu0 %v3785_v27  ;;  %v4452_v5 = vrot.slane %v4444_v43, %v8814_v20  ;;  %v4219_v24 = vcombine.low %v2091_v33, %v2093_v48  ;;  %v9909_v11 = vcombine.high %v9899_v49, %v9899_v49  ;;  %v4011_v23 = vcombine.low %v9896_v12, %v9899_v49  ;;  %v4899_v43 = vld [vmem:[%s10687_s1 + $0x468] sm:$0xff] }
 0x10a   : > { %v3794_v16 = vrot.slane %v3786_v57, %v8814_v20  ;;  %v3801_v18 = vrot.slane %v3787_v60, %v8814_v20  ;;  %v2395_v28 = vrot.slane %v2381_v7, %v8814_v20  ;;  %v2101_v63 = vcombine.high %v7180_v62, %v7180_v62 }
 0x10b   : > { %v4460_v0 = vcombine.low %v4452_v5, %v4459_v31  ;;  %v4227_v17 = vrot.slane %v4219_v24, %v8814_v20  ;;  %v4012_v27 = vcombine.low %v9909_v11, %v9483_v44  ;;  %v4019_v8 = vrot.slane %v4011_v23, %v8814_v20  ;;  %v7212_v24 = vld [vmem:[%s8811_s28 + $0xa1] sm:$0xff] }
 0x10c   : > { %v3802_v9 = vcombine.low %v3794_v16, %v3801_v18  ;;  %v2397_v50 = vcombine.high %v2395_v28, %v2395_v28  ;;  %v4461_v34 = vcombine.low %v2396_v54, %v2395_v28  ;;  %v2115_v51 = vrot.slane %v2101_v63, %v8814_v20  ;;  %v7182_v23 = vld [vmem:[%s8811_s28 + $0xa0] sm:$0xff] }
 0x10d   : > { %5396 = vmatprep.mubr.f32.mxu1 %v4460_v0  ;;  %v4235_v25 = vcombine.low %v4227_v17, %v4234_v53  ;;  %v4026_v29 = vrot.slane %v4012_v27, %v8814_v20  ;;  %v2116_v62 = vcombine.high %v2108_v26, %v2108_v26  ;;  %v1844_v33 = vcombine.high %v7152_v45, %v7152_v45 }
 0x10e   : > { %v4462_v31 = vcombine.low %v2397_v50, %v9512_v13  ;;  %v4469_v44 = vrot.slane %v4461_v34, %v8814_v20  ;;  %v2117_v38 = vcombine.high %v2115_v51, %v2115_v51  ;;  %v9927_v19 = vrot.slane %v7152_v45, %v8814_v20  ;;  %v7154_v34 = vld [vmem:[%s8811_s28 + $0xa2] sm:$0xff] }
 0x10f   : > { %5397 = vmatmul.mubr.f32.gmra.mrb[42].mxu1 %v4235_v25  ;;  %v4027_v26 = vcombine.low %v4019_v8, %v4026_v29  ;;  %v4236_v48 = vcombine.low %v2116_v62, %v2115_v51  ;;  %v9936_v13 = vrot.slane %v1844_v33, %v8814_v20  ;;  %v3803_v57 = vcombine.low %v9872_v59, %v2396_v54  ;;  %v7134_v51 = vld.sshfl [vmem:[%s8811_s28 + $0x99] sm:$0x3 pattern:$0x76325410] }
 0x110   : > { %v4476_v53 = vrot.slane %v4462_v31, %v8814_v20  ;;  %v4237_v60 = vcombine.low %v2117_v38, %v7193_v30  ;;  %v9942_v7 = vcombine.high %v9927_v19, %v9927_v19  ;;  %v3804_v5 = vcombine.low %v2395_v28, %v2397_v50  ;;  %v9967_v38 = vld.sshfl [vmem:[%s8811_s28 + $0x9a] sm:$0x3 pattern:$0x76325410] }
 0x111   : > { %5271 = vmatprep.mubr.f32.mxu0 %v4027_v26  ;;  %v4244_v16 = vrot.slane %v4236_v48, %v8814_v20  ;;  %v9949_v18 = vcombine.high %v9936_v13, %v9936_v13  ;;  %v3811_v59 = vrot.slane %v3803_v57, %v8814_v20  ;;  %v8119_v54 = vpack.c.bf16 %v4899_v43, %v4898_v6 }
 0x112   : > { %5272 = vmatmul.mubr.f32.gmra.mrb[44].mxu0 %v3802_v9  ;;  %v4477_v63 = vcombine.low %v4469_v44, %v4476_v53  ;;  %v4251_v45 = vrot.slane %v4237_v60, %v8814_v20  ;;  %v4028_v28 = vcombine.low %v9927_v19, %v9942_v7  ;;  %v3818_v0 = vrot.slane %v3804_v5, %v8814_v20 }
 0x113   : > { %v4029_v17 = vcombine.low %v9936_v13, %v9949_v18  ;;  %8120 = vmatpush3.bf16.msra.mxu0 %v8119_v54  ;;  %v2405_v27 = vcombine.high %v7212_v24, %v7212_v24  ;;  %v2412_v8 = vrot.slane %v7212_v24, %v8814_v20  ;;  %v2125_v50 = vcombine.high %v7182_v23, %v7182_v23 }
 0x114   : > { %5401 = vmatprep.mubr.f32.mxu1 %v4477_v63  ;;  %v4252_v9 = vcombine.low %v4244_v16, %v4251_v45  ;;  %v4036_v25 = vrot.slane %v4028_v28, %v8814_v20  ;;  %v3819_v29 = vcombine.low %v3811_v59, %v3818_v0  ;;  %v2132_v30 = vrot.slane %v7182_v23, %v8814_v20  ;;  %v7214_v59 = vld [vmem:[%s8811_s28 + $0xb1] sm:$0xff] }
 0x115   : > { %v4043_v62 = vrot.slane %v4029_v17, %v8814_v20  ;;  %v2419_v33 = vrot.slane %v2405_v27, %v8814_v20  ;;  %v2420_v31 = vcombine.high %v2412_v8, %v2412_v8  ;;  %v2139_v44 = vrot.slane %v2125_v50, %v8814_v20  ;;  %8121 = vmatprep.subr.bf16.mxu0 %v8508_v32  ;;  %v7184_v0 = vld [vmem:[%s8811_s28 + $0xb0] sm:$0xff] }
 0x116   : > { %5402 = vmatmul.mubr.f32.gmra.mrb[44].mxu1 %v4252_v9  ;;  %v2140_v6 = vcombine.high %v2132_v30, %v2132_v30  ;;  %v1868_v43 = vcombine.high %v7154_v34, %v7154_v34  ;;  %v9971_v26 = vrot.slane %v7154_v34, %v8814_v20  ;;  %v3820_v48 = vcombine.low %v7134_v51, %v2412_v8 }
 0x117   : > { %v4044_v57 = vcombine.low %v4036_v25, %v4043_v62  ;;  %v2421_v53 = vcombine.high %v2419_v33, %v2419_v33  ;;  %v4478_v60 = vcombine.low %v2412_v8, %v2420_v31  ;;  %v2141_v5 = vcombine.high %v2139_v44, %v2139_v44  ;;  %v7224_v25 = vld.sshfl [vmem:[%s8811_s28 + $0xa9] sm:$0x3 pattern:$0x76325410] }
 0x118   : > { %v4253_v24 = vcombine.low %v2132_v30, %v2140_v6  ;;  %v9974_v23 = vrot.slane %v1868_v43, %v8814_v20  ;;  %v9978_v16 = vcombine.high %v9971_v26, %v9971_v26  ;;  %v4045_v32 = vcombine.low %v9967_v38, %v9971_v26  ;;  %v4900_v6 = vld [vmem:[%s10687_s1 + $0x470] sm:$0xff]  ;;  %v4901_v43 = vld [vmem:[%s10687_s1 + $0x478] sm:$0xff] }
 0x119   : > { %5276 = vmatprep.mubr.f32.mxu0 %v4044_v57  ;;  %v4479_v54 = vcombine.low %v2419_v33, %v2421_v53  ;;  %v4486_v63 = vrot.slane %v4478_v60, %v8814_v20  ;;  %v4254_v45 = vcombine.low %v2139_v44, %v2141_v5  ;;  %v3821_v28 = vcombine.low %v2420_v31, %v2419_v33  ;;  %v7194_v33 = vld.sshfl [vmem:[%s8811_s28 + $0xa8] sm:$0x3 pattern:$0x76325410] }
 0x11a   : > { %5277 = vmatmul.mubr.f32.gmra.mrb[46].mxu0 %v3819_v29  ;;  %v4261_v17 = vrot.slane %v4253_v24, %v8814_v20  ;;  %v4046_v27 = vcombine.low %v9978_v16, %v9974_v23  ;;  %v4053_v8 = vrot.slane %v4045_v32, %v8814_v20  ;;  %v3828_v50 = vrot.slane %v3820_v48, %v8814_v20 }
 0x11b   : > { %v4493_v34 = vrot.slane %v4479_v54, %v8814_v20  ;;  %v4268_v51 = vrot.slane %v4254_v45, %v8814_v20  ;;  %v3835_v9 = vrot.slane %v3821_v28, %v8814_v20  ;;  %v2429_v30 = vcombine.high %v7214_v59, %v7214_v59  ;;  %v10011_v45 = vld.sshfl [vmem:[%s8811_s28 + $0xaa] sm:$0x3 pattern:$0x76325410]  ;;  %v7226_v28 = vld [vmem:[%s8811_s28 + $0x22] sm:$0xff] }
 0x11c   : > { %v4060_v29 = vrot.slane %v4046_v27, %v8814_v20  ;;  %v2436_v62 = vrot.slane %v7214_v59, %v8814_v20  ;;  %v2149_v31 = vcombine.high %v7184_v0, %v7184_v0  ;;  %v2156_v44 = vrot.slane %v7184_v0, %v8814_v20 }
 0x11d   : > { %v4494_v48 = vcombine.low %v4486_v63, %v4493_v34  ;;  %v4269_v57 = vcombine.low %v4261_v17, %v4268_v51  ;;  %v3836_v60 = vcombine.low %v3828_v50, %v3835_v9  ;;  %v10005_v5 = vrot.slane %v2429_v30, %v8814_v20  ;;  %v7228_v50 = vld [vmem:[%s8811_s28 + $0x32] sm:$0xff] }
 0x11e   : > { %v4061_v24 = vcombine.low %v4053_v8, %v4060_v29  ;;  %v2444_v32 = vcombine.high %v2436_v62, %v2436_v62  ;;  %v4495_v59 = vcombine.low %v7224_v25, %v2436_v62  ;;  %v10008_v54 = vrot.slane %v2149_v31, %v8814_v20 }
 0x11f   : > { %5406 = vmatprep.mubr.f32.mxu1 %v4494_v48  ;;  %v2164_v0 = vcombine.high %v2156_v44, %v2156_v44  ;;  %v4270_v27 = vcombine.low %v7194_v33, %v2156_v44  ;;  %v10016_v63 = vcombine.high %v9974_v23, %v9974_v23  ;;  %v8122_v17 = vpack.c.bf16 %v4901_v43, %v4900_v6  ;;  %v7246_v6 = vld.sshfl [vmem:[%s8811_s28 + $0x2a] sm:$0x3 pattern:$0x76325410] }
 0x120   : > { %5407 = vmatmul.mubr.f32.gmra.mrb[46].mxu1 %v4269_v57  ;;  %5281 = vmatprep.mubr.f32.mxu0 %v4061_v24  ;;  %v4496_v8 = vcombine.low %v2444_v32, %v10005_v5  ;;  %v4503_v34 = vrot.slane %v4495_v59, %v8814_v20  ;;  %v3837_v51 = vcombine.low %v2421_v53, %v7224_v25 }
 0x121   : > { %5282 = vmatmul.mubr.f32.gmra.mrb[48].mxu0 %v3836_v60  ;;  %v4271_v9 = vcombine.low %v2164_v0, %v10008_v54  ;;  %v4278_v30 = vrot.slane %v4270_v27, %v8814_v20  ;;  %v4062_v29 = vcombine.low %v10016_v63, %v10011_v45  ;;  %v2493_v62 = vcombine.high %v7226_v28, %v7226_v28 }
 0x122   : > { %v4510_v33 = vrot.slane %v4496_v8, %v8814_v20  ;;  %8123 = vmatpush3.bf16.msra.mxu0 %v8122_v17  ;;  %v3844_v31 = vrot.slane %v3837_v51, %v8814_v20  ;;  %v2500_v44 = vrot.slane %v7226_v28, %v8814_v20  ;;  %v2517_v43 = vcombine.high %v7228_v50, %v7228_v50 }
 0x123   : > { %v4285_v53 = vrot.slane %v4271_v9, %v8814_v20  ;;  %v4069_v25 = vrot.slane %v4062_v29, %v8814_v20  ;;  %v2507_v48 = vrot.slane %v2493_v62, %v8814_v20  ;;  %v2524_v57 = vrot.slane %v7228_v50, %v8814_v20 }
 0x124   : > { %v4511_v60 = vcombine.low %v4503_v34, %v4510_v33  ;;  %v2508_v24 = vcombine.high %v2500_v44, %v2500_v44  ;;  %v2531_v32 = vrot.slane %v2517_v43, %v8814_v20  ;;  %v8510_v51 = vmov 0.0  }
 0x125   : > { %v4286_v59 = vcombine.low %v4278_v30, %v4285_v53  ;;  %5286 = vmatprep.mubr.f32.mxu0 %v4069_v25  ;;  %v2509_v0 = vcombine.high %v2507_v48, %v2507_v48  ;;  %v2532_v27 = vcombine.high %v2524_v57, %v2524_v57  ;;  %v4550_v17 = vcombine.low %v7246_v6, %v2524_v57 }
 0x126   : > { %5411 = vmatprep.mubr.f32.mxu1 %v4511_v60  ;;  %5287 = vmatmul.mubr.f32.gmra.mrb[50].mxu0 %v3844_v31  ;;  %v4533_v28 = vcombine.low %v2500_v44, %v2508_v24  ;;  %v2533_v8 = vcombine.high %v2531_v32, %v2531_v32  ;;  %v4568_v9 = vcombine.low %v9642_v55, %v9677_v22 }
 0x127   : > { %5412 = vmatmul.mubr.f32.gmra.mrb[48].mxu1 %v4286_v59  ;;  %7889 = vmatprep.mubr.msk.f32.mxu0 %vm8509_vm0, %v8510_v51  ;;  %v4534_v50 = vcombine.low %v2507_v48, %v2509_v0  ;;  %v4551_v34 = vcombine.low %v2532_v27, %v2531_v32  ;;  %v4558_v33 = vrot.slane %v4550_v17, %v8814_v20 }
 0x128   : > { %v4541_v30 = vrot.slane %v4533_v28, %v8814_v20  ;;  %v4567_v29 = vcombine.low %v2533_v8, %v9636_v47  ;;  %v4602_v44 = vcombine.low %v9735_v21, %v9754_v46  ;;  %v4618_v6 = vcombine.low %v9758_v56, %v9770_v10 }
 0x129   : > { %v4548_v62 = vrot.slane %v4534_v50, %v8814_v20  ;;  %v4565_v31 = vrot.slane %v4551_v34, %v8814_v20  ;;  %v4582_v55 = vrot.slane %v4568_v9, %v8814_v20  ;;  %v4584_v22 = vcombine.low %v9680_v58, %v9692_v40 }
 0x12a   : > { %v4575_v48 = vrot.slane %v4567_v29, %v8814_v20  ;;  %v4585_v57 = vcombine.low %v9686_v39, %v9712_v41  ;;  %v4619_v21 = vcombine.low %v9763_v4, %v9804_v42  ;;  %v4626_v46 = vrot.slane %v4618_v6, %v8814_v20 }
 0x12b   : > { %v7328_v43 = vpop.f32.mrb[0].mxu0  ;;  %v4549_v53 = vcombine.low %v4541_v30, %v4548_v62  ;;  %v4566_v10 = vcombine.low %v4558_v33, %v4565_v31  ;;  %v4635_v60 = vcombine.low %v9793_v36, %v9809_v52  ;;  %v4636_v58 = vcombine.low %v9822_v1, %v9851_v61  ;;  %v7252_v62 = vld.sshfl [vmem:[%s8811_s28 + $0x8a] sm:$0x3 pattern:$0x76325410] }
 0x12c   : > { %v7329_v47 = vpop.f32.mrb[1].mxu0  ;;  %v7399_v25 = vpop.f32.mrb[0].mxu1  ;;  %v4652_v40 = vcombine.low %v9862_v2, %v9847_v37  ;;  %v4633_v39 = vrot.slane %v4619_v21, %v8814_v20  ;;  %v4653_v41 = vcombine.low %v9854_v35, %v9896_v12  ;;  %v4601_v52 = vcombine.low %v9722_v15, %v9718_v14 }
 0x12d   : > { %v7400_v56 = vpop.f32.mrb[1].mxu1  ;;  %7890 = vmatmul.mubr.f32.vlgmr.msra.gmra.mrb[52].mxu0 %v4549_v53  ;;  %v4643_v4 = vrot.slane %v4635_v60, %v8814_v20  ;;  %v4650_v42 = vrot.slane %v4636_v58, %v8814_v20  ;;  %v4583_v61 = vcombine.low %v4575_v48, %v4582_v55  ;;  %v4592_v2 = vrot.slane %v4584_v22, %v8814_v20  ;;  %v7244_v53 = vld [vmem:[%s8811_s28 + $0xb2] sm:$0xff] }
 0x12e   : > { %7892 = vmatprep.mubr.msk.f32.mxu0 %vm8509_vm0, %v8510_v51  ;;  %v4660_v36 = vrot.slane %v4652_v40, %v8814_v20  ;;  %v4634_v1 = vcombine.low %v4626_v46, %v4633_v39  ;;  %v4667_v37 = vrot.slane %v4653_v41, %v8814_v20  ;;  %v4599_v24 = vrot.slane %v4585_v57, %v8814_v20 }
 0x12f   : > { %v4651_v32 = vcombine.low %v4643_v4, %v4650_v42  ;;  %v4609_v14 = vrot.slane %v4601_v52, %v8814_v20  ;;  %v4616_v15 = vrot.slane %v4602_v44, %v8814_v20  ;;  %v4669_v31 = vcombine.low %v9899_v49, %v9909_v11 }
 0x130   : > { %v4668_v35 = vcombine.low %v4660_v36, %v4667_v37  ;;  %v4600_v0 = vcombine.low %v4592_v2, %v4599_v24  ;;  %v4670_v44 = vcombine.low %v7252_v62, %v9927_v19  ;;  %v4686_v25 = vcombine.low %v9942_v7, %v9936_v13  ;;  %v6224_v62 = vld [vmem:[#allocation2 + $0x8] sm:$0xff] }
 0x131   : > { %7893 = vmatmul.mubr.f32.gmra.mrb[54].mxu0 %v4566_v10  ;;  %v4617_v8 = vcombine.low %v4609_v14, %v4616_v15  ;;  %v4677_v22 = vrot.slane %v4669_v31, %v8814_v20  ;;  %v4687_v49 = vcombine.low %v9949_v18, %v9967_v38  ;;  %v2709_v11 = vcombine.high %v7244_v53, %v7244_v53 }
 0x132   : > { %7895 = vmatprep.mubr.msk.f32.mxu0 %vm8509_vm0, %v8510_v51  ;;  %v4684_v47 = vrot.slane %v4670_v44, %v8814_v20  ;;  %v2716_v19 = vrot.slane %v7244_v53, %v8814_v20  ;;  %v4694_v10 = vrot.slane %v4686_v25, %v8814_v20  ;;  %v4703_v13 = vcombine.low %v9971_v26, %v9978_v16  ;;  %v6241_v25 = vld [vmem:[#allocation2 + $0x90] sm:$0xff] }
 0x133   : > { %v7331_v12 = vpop.f32.mrb[2].mxu0  ;;  %v4704_v7 = vcombine.low %v9974_v23, %v10016_v63  ;;  %v4701_v18 = vrot.slane %v4687_v49, %v8814_v20  ;;  %v10112_v38 = vrot.slane %v2709_v11, %v8814_v20 }
 0x134   : > { %v7332_v59 = vpop.f32.mrb[3].mxu0  ;;  %v4685_v56 = vcombine.low %v4677_v22, %v4684_v47  ;;  %v2724_v58 = vcombine.high %v2716_v19, %v2716_v19  ;;  %v4711_v41 = vrot.slane %v4703_v13, %v8814_v20  ;;  %v4720_v16 = vcombine.low %v10011_v45, %v2716_v19 }
 0x135   : > { %7896 = vmatmul.mubr.f32.gmra.mrb[56].mxu0 %v4583_v61  ;;  %v7333_v27 = vadd.f32 %v7332_v59, %v7331_v12  ;;  %v4702_v26 = vcombine.low %v4694_v10, %v4701_v18  ;;  %v4718_v23 = vrot.slane %v4704_v7, %v8814_v20 }
 0x136   : > { %7898 = vmatprep.mubr.msk.f32.mxu0 %vm8509_vm0, %v8510_v51  ;;  %v4721_v63 = vcombine.low %v2724_v58, %v10112_v38  ;;  %v4728_v37 = vrot.slane %v4720_v16, %v8814_v20 }
 0x137   : > { %v7402_v17 = vpop.f32.mrb[2].mxu1 }
 0x138   : > { %v7403_v28 = vpop.f32.mrb[3].mxu1  ;;  %v4735_v61 = vrot.slane %v4721_v63, %v8814_v20 }
 0x139   : > { %7899 = vmatmul.mubr.f32.gmra.mrb[58].mxu0 %v4600_v0  ;;  %v7404_v50 = vadd.f32 %v7403_v28, %v7402_v17  ;;  %v6240_v17 = vld [vmem:[#allocation2 + $0x88] sm:$0xff] }
 0x13a   : > { %7901 = vmatprep.mubr.msk.f32.mxu0 %vm8509_vm0, %v8510_v51  ;;  %v7334_v34 = vpop.f32.mrb[4].mxu0 }
 0x13b   : > { %v10083_v9 = vadd.f32 %v7404_v50, %v7333_v27  ;;  %v7335_v30 = vpop.f32.mrb[5].mxu0  ;;  %v6239_v27 = vld [vmem:[#allocation2 + $0x80] sm:$0xff] }
 0x13c   : > { %v7336_v29 = vadd.f32 %v7335_v30, %v7334_v34 }
 0x13d   : > { %7902 = vmatmul.mubr.f32.gmra.mrb[60].mxu0 %v4617_v8  ;;  %v8124_v8 = vpack.c.bf16 %v6240_v17, %v6239_v27  ;;  %v6245_v27 = vld [vmem:[#allocation2 + $0xb0] sm:$0xff]  ;;  %v6246_v17 = vld [vmem:[#allocation2 + $0xb8] sm:$0xff] }
 0x13e   : > { %7904 = vmatprep.mubr.msk.f32.mxu0 %vm8509_vm0, %v8510_v51 }
 0x13f   : > { %v7405_v33 = vpop.f32.mrb[4].mxu1  ;;  %8125 = vmatprep.subr.bf16.mxu1 %v8124_v8  ;;  %v6289_v8 = vld [vmem:[#allocation2 + $0x210] sm:$0xff] }
 0x140   : > { %v7406_v6 = vpop.f32.mrb[5].mxu1 }
 0x141   : > { %7905 = vmatmul.mubr.f32.gmra.mrb[62].mxu0 %v4634_v1  ;;  %v7407_v43 = vadd.f32 %v7406_v6, %v7405_v33  ;;  %v4719_v1 = vcombine.low %v4711_v41, %v4718_v23  ;;  %v6243_v41 = vld [vmem:[#allocation2 + $0xa0] sm:$0xff] }
 0x142   : > { %7907 = vmatprep.mubr.msk.f32.mxu0 %vm8509_vm0, %v8510_v51 }
 0x143   : > { %v10094_v55 = vadd.f32 %v7407_v43, %v7336_v29  ;;  %v6223_v29 = vld [vmem:[#allocation2] sm:$0xff] }
 0x144   : > { %v7337_v48 = vpop.f32.mrb[6].mxu0  ;;  %v8126_v33 = vpack.c.bf16 %v6224_v62, %v6223_v29  ;;  %v6229_v29 = vld [vmem:[#allocation2 + $0x30] sm:$0xff]  ;;  %v6230_v62 = vld [vmem:[#allocation2 + $0x38] sm:$0xff] }
 0x145   : > { %7908 = vmatmul.mubr.f32.gmra.mrb[64].mxu0 %v4651_v32  ;;  %v7338_v57 = vpop.f32.mrb[7].mxu0 }
 0x146   : > { %7910 = vmatprep.mubr.msk.f32.mxu0 %vm8509_vm0, %v8510_v51  ;;  %v7339_v21 = vadd.f32 %v7338_v57, %v7337_v48  ;;  %8127 = vmatpush3.bf16.msra.mxu1 %v8126_v33  ;;  %v6242_v48 = vld [vmem:[#allocation2 + $0x98] sm:$0xff]  ;;  %v6225_v57 = vld [vmem:[#allocation2 + $0x10] sm:$0xff] }
 0x147   : > { %v7408_v46 = vpop.f32.mrb[6].mxu1  ;;  %v8128_v11 = vpack.c.bf16 %v6242_v48, %v6241_v25  ;;  %v6290_v33 = vld [vmem:[#allocation2 + $0x218] sm:$0xff] }
 0x148   : > { %v7409_v60 = vpop.f32.mrb[7].mxu1 }
 0x149   : > { %7911 = vmatmul.mubr.f32.gmra.mrb[66].mxu0 %v4668_v35  ;;  %v7410_v40 = vadd.f32 %v7409_v60, %v7408_v46  ;;  %v4736_v35 = vcombine.low %v4728_v37, %v4735_v61  ;;  %8129 = vmatprep.subr.bf16.mxu1 %v8128_v11  ;;  %v6304_v37 = vld [vmem:[#allocation2 + $0x288] sm:$0xff] }
 0x14a   : > { %7913 = vmatprep.mubr.msk.f32.mxu0 %vm8509_vm0, %v8510_v51  ;;  %v6292_v11 = vld [vmem:[#allocation2 + $0x228] sm:$0xff] }
 0x14b   : > { %v10116_v39 = vadd.f32 %v7410_v40, %v7339_v21  ;;  %v6226_v21 = vld [vmem:[#allocation2 + $0x18] sm:$0xff] }
 0x14d   : > { %7914 = vmatmul.mubr.f32.gmra.mrb[68].mxu0 %v4685_v56  ;;  %v7340_v4 = vpop.f32.mrb[8].mxu0  ;;  %v8130_v56 = vpack.c.bf16 %v6226_v21, %v6225_v57  ;;  %v6247_v57 = vld [vmem:[#allocation2 + $0xc0] sm:$0xff]  ;;  %v6248_v21 = vld [vmem:[#allocation2 + $0xc8] sm:$0xff] }
 0x14e   : > { %7916 = vmatprep.mubr.msk.f32.mxu0 %vm8509_vm0, %v8510_v51  ;;  %v7341_v42 = vpop.f32.mrb[9].mxu0 }
 0x14f   : > { %v7342_v36 = vadd.f32 %v7341_v42, %v7340_v4  ;;  %8131 = vmatpush3.bf16.msra.mxu1 %v8130_v56  ;;  %v6227_v4 = vld [vmem:[#allocation2 + $0x20] sm:$0xff]  ;;  %v6228_v42 = vld [vmem:[#allocation2 + $0x28] sm:$0xff]  ;;  %v8140_v56 = vpack.c.bf16 %v6248_v21, %v6247_v57  ;;  %v7225_v57 = vld.sshfl [vmem:[%s8811_s28 + $0xb9] sm:$0x3 pattern:$0x76325410] }
 0x150   : > { %v7411_v52 = vpop.f32.mrb[8].mxu1 }
 0x151   : > { %7917 = vmatmul.mubr.f32.gmra.mrb[70].mxu0 %v4702_v26  ;;  %v7412_v2 = vpop.f32.mrb[9].mxu1  ;;  %v6244_v26 = vld [vmem:[#allocation2 + $0xa8] sm:$0xff] }
 0x152   : > { %7919 = vmatprep.mubr.msk.f32.mxu0 %vm8509_vm0, %v8510_v51  ;;  %v7413_v45 = vadd.f32 %v7412_v2, %v7411_v52  ;;  %v8132_v16 = vpack.c.bf16 %v6244_v26, %v6243_v41  ;;  %v8134_v52 = vpack.c.bf16 %v6228_v42, %v6227_v4  ;;  %v6293_v41 = vld [vmem:[#allocation2 + $0x230] sm:$0xff]  ;;  %v6294_v26 = vld [vmem:[#allocation2 + $0x238] sm:$0xff] }
 0x153   : > { %v8202_v4 = vpack.c.bf16 %v6294_v26, %v6293_v41  ;;  %v6316_v26 = vld [vmem:[#allocation2 + $0x2e8] sm:$0xff] }
 0x154   : > { %v10128_v24 = vadd.f32 %v7413_v45, %v7342_v36  ;;  %v7343_v32 = vpop.f32.mrb[10].mxu0  ;;  %8133 = vmatprep.subr.bf16.mxu1 %v8132_v16  ;;  %v6287_v45 = vld [vmem:[#allocation2 + $0x200] sm:$0xff] }
 0x155   : > { %7920 = vmatmul.mubr.f32.gmra.mrb[72].mxu0 %v4719_v1  ;;  %v7344_v12 = vpop.f32.mrb[11].mxu0  ;;  %v6303_v1 = vld [vmem:[#allocation2 + $0x280] sm:$0xff]  ;;  %8135 = vmatpush3.bf16.msra.mxu1 %v8134_v52 }
 0x156   : > { %7922 = vmatprep.mubr.msk.f32.mxu0 %vm8509_vm0, %v8510_v51  ;;  %v7345_v59 = vadd.f32 %v7344_v12, %v7343_v32  ;;  %v8188_v2 = vpack.c.bf16 %v6304_v37, %v6303_v1  ;;  %v6288_v32 = vld [vmem:[#allocation2 + $0x208] sm:$0xff]  ;;  %v6249_v1 = vld [vmem:[#allocation2 + $0xd0] sm:$0xff]  ;;  %v6250_v37 = vld [vmem:[#allocation2 + $0xd8] sm:$0xff] }
 0x157   : > { %v8190_v12 = vpack.c.bf16 %v6288_v32, %v6287_v45  ;;  %v8144_v45 = vpack.c.bf16 %v6250_v37, %v6249_v1  ;;  %v6233_v32 = vld [vmem:[#allocation2 + $0x50] sm:$0xff]  ;;  %v6299_v37 = vld [vmem:[#allocation2 + $0x260] sm:$0xff] }
 0x158   : > { %8189 = vmatprep.subr.bf16.mxu0 %v8188_v2 }
 0x159   : > { %7923 = vmatmul.mubr.f32.gmra.mrb[74].mxu0 %v4736_v35 }
 0x15a   : > { %v7414_v0 = vpop.f32.mrb[10].mxu1  ;;  %7925 = vmatprep.mubr.msk.f32.mxu0 %vm8509_vm0, %v8510_v51  ;;  %8191 = vmatpush3.bf16.msra.mxu0 %v8190_v12  ;;  %v6312_v12 = vld [vmem:[#allocation2 + $0x2c8] sm:$0xff] }
 0x15b   : > { %v7415_v14 = vpop.f32.mrb[11].mxu1 }
 0x15c   : > { %v7416_v15 = vadd.f32 %v7415_v14, %v7414_v0  ;;  %v6305_v14 = vld [vmem:[#allocation2 + $0x290] sm:$0xff] }
 0x15d   : > { %v7346_v28 = vpop.f32.mrb[12].mxu0 }
 0x15e   : > { %v10134_v50 = vadd.f32 %v7416_v15, %v7345_v59  ;;  %v7347_v34 = vpop.f32.mrb[13].mxu0  ;;  %v6306_v15 = vld [vmem:[#allocation2 + $0x298] sm:$0xff] }
 0x15f   : > { %v7348_v30 = vadd.f32 %v7347_v34, %v7346_v28  ;;  %v8192_v28 = vpack.c.bf16 %v6306_v15, %v6305_v14  ;;  %v6295_v14 = vld [vmem:[#allocation2 + $0x240] sm:$0xff]  ;;  %v6296_v15 = vld [vmem:[#allocation2 + $0x248] sm:$0xff] }
 0x161   : > { %8193 = vmatprep.subr.bf16.mxu0 %v8192_v28 }
 0x163   : > { %v7417_v31 = vpop.f32.mrb[12].mxu1 }
 0x164   : > { %v7418_v44 = vpop.f32.mrb[13].mxu1 }
 0x165   : > { %v7419_v6 = vadd.f32 %v7418_v44, %v7417_v31  ;;  %v8138_v44 = vpack.c.bf16 %v6230_v62, %v6229_v29  ;;  %v6313_v29 = vld [vmem:[#allocation2 + $0x2d0] sm:$0xff]  ;;  %v2445_v62 = vcombine.high %v10005_v5, %v10005_v5 }
 0x167   : > { %v10136_v43 = vadd.f32 %v7419_v6, %v7348_v30  ;;  %v7349_v53 = vpop.f32.mrb[14].mxu0  ;;  %v8136_v30 = vpack.c.bf16 %v6246_v17, %v6245_v27  ;;  %v8194_v6 = vpack.c.bf16 %v6290_v33, %v6289_v8  ;;  %v8206_v27 = vpack.c.bf16 %v6296_v15, %v6295_v14  ;;  %v6251_v8 = vld [vmem:[#allocation2 + $0xe0] sm:$0xff]  ;;  %v6301_v14 = vld [vmem:[#allocation2 + $0x270] sm:$0xff]  ;;  %v6302_v15 = vld [vmem:[#allocation2 + $0x278] sm:$0xff] }
 0x168   : > { %v7350_v22 = vpop.f32.mrb[15].mxu0  ;;  %v4512_v5 = vcombine.low %v2445_v62, %v7225_v57 }
 0x169   : > { %v7351_v47 = vadd.f32 %v7350_v22, %v7349_v53  ;;  %8137 = vmatprep.subr.bf16.mxu1 %v8136_v30  ;;  %v6307_v22 = vld [vmem:[#allocation2 + $0x2a0] sm:$0xff]  ;;  %8195 = vmatpush3.bf16.msra.mxu0 %v8194_v6  ;;  %v6252_v30 = vld [vmem:[#allocation2 + $0xe8] sm:$0xff]  ;;  %v6314_v6 = vld [vmem:[#allocation2 + $0x2d8] sm:$0xff] }
 0x16a   : > { %8139 = vmatpush3.bf16.msra.mxu1 %v8138_v44  ;;  %v8148_v44 = vpack.c.bf16 %v6252_v30, %v6251_v8 }
 0x16b   : > { %8141 = vmatprep.subr.bf16.mxu1 %v8140_v56 }
 0x16c   : > { %v7420_v49 = vpop.f32.mrb[14].mxu1 }
 0x16d   : > { %v7421_v19 = vpop.f32.mrb[15].mxu1 }
 0x16e   : > { %v7422_v46 = vadd.f32 %v7421_v19, %v7420_v49  ;;  %v6291_v49 = vld [vmem:[#allocation2 + $0x220] sm:$0xff] }
 0x16f   : > { %v8198_v19 = vpack.c.bf16 %v6292_v11, %v6291_v49  ;;  %v6297_v11 = vld [vmem:[#allocation2 + $0x250] sm:$0xff] }
 0x170   : > { %v10138_v10 = vadd.f32 %v7422_v46, %v7351_v47  ;;  %v7352_v13 = vpop.f32.mrb[16].mxu0  ;;  %v6308_v47 = vld [vmem:[#allocation2 + $0x2a8] sm:$0xff] }
 0x171   : > { %v7353_v7 = vpop.f32.mrb[17].mxu0  ;;  %v8196_v48 = vpack.c.bf16 %v6308_v47, %v6307_v22  ;;  %v6236_v22 = vld [vmem:[#allocation2 + $0x68] sm:$0xff]  ;;  %v2165_v47 = vcombine.high %v10008_v54, %v10008_v54  ;;  %v6315_v54 = vld [vmem:[#allocation2 + $0x2e0] sm:$0xff] }
 0x172   : > { %v7354_v60 = vadd.f32 %v7353_v7, %v7352_v13  ;;  %v6231_v13 = vld [vmem:[#allocation2 + $0x40] sm:$0xff]  ;;  %v6232_v7 = vld [vmem:[#allocation2 + $0x48] sm:$0xff] }
 0x173   : > { %8197 = vmatprep.subr.bf16.mxu0 %v8196_v48  ;;  %v8208_v48 = vpack.c.bf16 %v6314_v6, %v6313_v29 }
 0x174   : > { %8199 = vmatpush3.bf16.msra.mxu0 %v8198_v19  ;;  %v6298_v19 = vld [vmem:[#allocation2 + $0x258] sm:$0xff] }
 0x175   : > { %v7423_v18 = vpop.f32.mrb[16].mxu1  ;;  %v8210_v21 = vpack.c.bf16 %v6298_v19, %v6297_v11 }
 0x176   : > { %v7424_v58 = vpop.f32.mrb[17].mxu1 }
 0x177   : > { %v7425_v40 = vadd.f32 %v7424_v58, %v7423_v18  ;;  %v8142_v58 = vpack.c.bf16 %v6232_v7, %v6231_v13 }
 0x179   : > { %v10140_v23 = vadd.f32 %v7425_v40, %v7354_v60  ;;  %v6309_v60 = vld [vmem:[#allocation2 + $0x2b0] sm:$0xff]  ;;  %v6310_v40 = vld [vmem:[#allocation2 + $0x2b8] sm:$0xff]  ;;  %8143 = vmatpush3.bf16.msra.mxu1 %v8142_v58 }
 0x17a   : > { %v7355_v63 = vpop.f32.mrb[18].mxu0  ;;  %8145 = vmatprep.subr.bf16.mxu1 %v8144_v45 }
 0x17b   : > { %v7356_v36 = vpop.f32.mrb[19].mxu0 }
 0x17c   : > { %v7357_v61 = vadd.f32 %v7356_v36, %v7355_v63  ;;  %v8200_v63 = vpack.c.bf16 %v6310_v40, %v6309_v60  ;;  %v6253_v60 = vld [vmem:[#allocation2 + $0xf0] sm:$0xff]  ;;  %v4519_v40 = vrot.slane %v4512_v5, %v8814_v20 }
 0x17d   : > { %v7426_v35 = vpop.f32.mrb[18].mxu1 }
 0x17e   : > { %v7427_v59 = vpop.f32.mrb[19].mxu1  ;;  %8201 = vmatprep.subr.bf16.mxu0 %v8200_v63  ;;  %v6238_v63 = vld [vmem:[#allocation2 + $0x78] sm:$0xff]  ;;  %5416 = vmatprep.mubr.f32.mxu1 %v4519_v40 }
 0x17f   : > { %v7428_v0 = vadd.f32 %v7427_v59, %v7426_v35  ;;  %8203 = vmatpush3.bf16.msra.mxu0 %v8202_v4  ;;  %v6234_v35 = vld [vmem:[#allocation2 + $0x58] sm:$0xff]  ;;  %v2725_v4 = vcombine.high %v10112_v38, %v10112_v38 }
 0x180   : > { %v8146_v59 = vpack.c.bf16 %v6234_v35, %v6233_v32  ;;  %v10160_v35 = vrot.slane %v8510_v51, 1 }
 0x181   : > { %v10142_v34 = vadd.f32 %v7428_v0, %v7357_v61  ;;  %v6311_v61 = vld [vmem:[#allocation2 + $0x2c0] sm:$0xff] }
 0x182   : > { %v7358_v31 = vpop.f32.mrb[20].mxu0  ;;  %v8204_v0 = vpack.c.bf16 %v6312_v12, %v6311_v61  ;;  %8147 = vmatpush3.bf16.msra.mxu1 %v8146_v59  ;;  %v6300_v61 = vld [vmem:[#allocation2 + $0x268] sm:$0xff]  ;;  %v6317_v12 = vld [vmem:[#allocation2 + $0x2f0] sm:$0xff]  ;;  %v6318_v59 = vld [vmem:[#allocation2 + $0x2f8] sm:$0xff] }
 0x183   : > { %v7359_v53 = vpop.f32.mrb[21].mxu0  ;;  %8149 = vmatprep.subr.bf16.mxu1 %v8148_v44  ;;  %v8214_v45 = vpack.c.bf16 %v6300_v61, %v6299_v37  ;;  %v6260_v37 = vld [vmem:[#allocation2 + $0x128] sm:$0xff] }
 0x184   : > { %v7360_v25 = vadd.f32 %v7359_v53, %v7358_v31  ;;  %8205 = vmatprep.subr.bf16.mxu0 %v8204_v0  ;;  %v6235_v53 = vld [vmem:[#allocation2 + $0x60] sm:$0xff]  ;;  %v8216_v0 = vpack.c.bf16 %v6318_v59, %v6317_v12  ;;  %v6277_v12 = vld [vmem:[#allocation2 + $0x1b0] sm:$0xff]  ;;  %v6278_v59 = vld [vmem:[#allocation2 + $0x1b8] sm:$0xff] }
 0x185   : > { %8207 = vmatpush3.bf16.msra.mxu0 %v8206_v27  ;;  %v8150_v49 = vpack.c.bf16 %v6236_v22, %v6235_v53  ;;  %v8218_v27 = vpack.c.bf16 %v6302_v15, %v6301_v14  ;;  %v6255_v53 = vld [vmem:[#allocation2 + $0x100] sm:$0xff]  ;;  %v6256_v22 = vld [vmem:[#allocation2 + $0x108] sm:$0xff]  ;;  %v6261_v14 = vld [vmem:[#allocation2 + $0x130] sm:$0xff] }
 0x186   : > { %8209 = vmatprep.subr.bf16.mxu0 %v8208_v48  ;;  %v6262_v15 = vld [vmem:[#allocation2 + $0x138] sm:$0xff] }
 0x187   : > { %8151 = vmatpush3.bf16.msra.mxu1 %v8150_v49 }
 0x188   : > { %v7429_v46 = vpop.f32.mrb[20].mxu1 }
 0x189   : > { %v7430_v18 = vpop.f32.mrb[21].mxu1  ;;  %8211 = vmatpush3.bf16.msra.mxu0 %v8210_v21 }
 0x18a   : > { %v7431_v16 = vadd.f32 %v7430_v18, %v7429_v46  ;;  %v7195_v46 = vld.sshfl [vmem:[%s8811_s28 + $0xb8] sm:$0x3 pattern:$0x76325410] }
 0x18b   : > { %v7361_v42 = vpop.f32.mrb[22].mxu0  ;;  %v4287_v7 = vcombine.low %v2165_v47, %v7195_v46  ;;  %v6254_v18 = vld [vmem:[#allocation2 + $0xf8] sm:$0xff]  ;;  %v8158_v47 = vpack.c.bf16 %v6256_v22, %v6255_v53  ;;  %v6273_v46 = vld [vmem:[#allocation2 + $0x190] sm:$0xff] }
 0x18c   : > { %v10144_v36 = vadd.f32 %v7431_v16, %v7360_v25  ;;  %v7362_v52 = vpop.f32.mrb[23].mxu0  ;;  %v8152_v41 = vpack.c.bf16 %v6254_v18, %v6253_v60  ;;  %v6237_v16 = vld [vmem:[#allocation2 + $0x70] sm:$0xff] }
 0x18d   : > { %v7363_v2 = vadd.f32 %v7362_v52, %v7361_v42  ;;  %v4294_v42 = vrot.slane %v4287_v7, %v8814_v20  ;;  %v8212_v52 = vpack.c.bf16 %v6316_v26, %v6315_v54  ;;  %v8154_v1 = vpack.c.bf16 %v6238_v63, %v6237_v16  ;;  %v6257_v18 = vld [vmem:[#allocation2 + $0x110] sm:$0xff]  ;;  %v6258_v54 = vld [vmem:[#allocation2 + $0x118] sm:$0xff] }
 0x18e   : > { %8153 = vmatprep.subr.bf16.mxu1 %v8152_v41  ;;  %v8162_v40 = vpack.c.bf16 %v6258_v54, %v6257_v18  ;;  %v6352_v41 = vld [vmem:[#allocation2 + $0x408] sm:$0xff] }
 0x18f   : > { %5417 = vmatmul.mubr.f32.gmra.mrb[50].mxu1 %v4294_v42  ;;  %8213 = vmatprep.subr.bf16.mxu0 %v8212_v52  ;;  %v6276_v42 = vld [vmem:[#allocation2 + $0x1a8] sm:$0xff] }
 0x190   : > { %v7432_v17 = vpop.f32.mrb[22].mxu1  ;;  %v7364_v28 = vpop.f32.mrb[24].mxu0  ;;  %8155 = vmatpush3.bf16.msra.mxu1 %v8154_v1  ;;  %8215 = vmatpush3.bf16.msra.mxu0 %v8214_v45 }
 0x191   : > { %v7433_v33 = vpop.f32.mrb[23].mxu1  ;;  %v7365_v31 = vpop.f32.mrb[25].mxu0  ;;  %6431 = vmatprep.mubr.f32.mxu1 %v10160_v35  ;;  %8217 = vmatprep.subr.bf16.mxu0 %v8216_v0  ;;  %v8168_v0 = vpack.c.bf16 %v6278_v59, %v6277_v12 }
 0x192   : > { %v7434_v25 = vadd.f32 %v7433_v33, %v7432_v17  ;;  %v6271_v33 = vld [vmem:[#allocation2 + $0x180] sm:$0xff]  ;;  %v6272_v31 = vld [vmem:[#allocation2 + $0x188] sm:$0xff] }
 0x193   : > { %6432 = vmatmul.mubr.f32.vlgmr.msra.gmra.mrb[52].mxu1 %v8510_v51  ;;  %v8156_v6 = vpack.c.bf16 %v6272_v31, %v6271_v33  ;;  %v6263_v31 = vld [vmem:[#allocation2 + $0x140] sm:$0xff] }
 0x194   : > { %v10152_v56 = vadd.f32 %v7434_v25, %v7363_v2  ;;  %v7435_v13 = vpop.f32.mrb[24].mxu1  ;;  %v7255_v2 = vld.sshfl [vmem:[%s8811_s28 + $0xba] sm:$0x3 pattern:$0x76325410]  ;;  %8219 = vmatpush3.bf16.msra.mxu0 %v8218_v27  ;;  %v8170_v27 = vpack.c.bf16 %v6262_v15, %v6261_v14 }
 0x195   : > { %v7436_v58 = vpop.f32.mrb[25].mxu1  ;;  %v4737_v32 = vcombine.low %v2725_v4, %v7255_v2  ;;  %8157 = vmatprep.subr.bf16.mxu1 %v8156_v6  ;;  %v6274_v13 = vld [vmem:[#allocation2 + $0x198] sm:$0xff]  ;;  %v6275_v4 = vld [vmem:[#allocation2 + $0x1a0] sm:$0xff] }
 0x196   : > { %8159 = vmatpush3.bf16.msra.mxu1 %v8158_v47  ;;  %v8160_v60 = vpack.c.bf16 %v6274_v13, %v6273_v46  ;;  %v8164_v1 = vpack.c.bf16 %v6276_v42, %v6275_v4  ;;  %v6281_v47 = vld [vmem:[#allocation2 + $0x1d0] sm:$0xff]  ;;  %v6283_v13 = vld [vmem:[#allocation2 + $0x1e0] sm:$0xff] }
 0x197   : > { %v4744_v38 = vrot.slane %v4737_v32, %v8814_v20 }
 0x198   : > { %8161 = vmatprep.subr.bf16.mxu1 %v8160_v60  ;;  %v6267_v60 = vld [vmem:[#allocation2 + $0x160] sm:$0xff] }
 0x199   : > { %7926 = vmatmul.mubr.f32.gmra.mrb[76].mxu0 %v4744_v38 }
 0x19a   : > { %8163 = vmatpush3.bf16.msra.mxu1 %v8162_v40 }
 0x19b   : > { %8165 = vmatprep.subr.bf16.mxu1 %v8164_v1 }
 0x19c   : > { %v7470_v17 = vpop.f32.mrb[26].mxu0 }
 0x19d   : > { %v7471_v28 = vpop.f32.mrb[27].mxu0 }
 0x19e   : > { %v7541_v8 = vpop.f32.mrb[26].mxu1 }
 0x19f   : > { %v7542_v30 = vpop.f32.mrb[27].mxu1 }
 0x1a0   : > { %v6279_v30 = vld [vmem:[#allocation2 + $0x1c0] sm:$0xff] }
 0x1a4   : > { %v7473_v29 = vpop.f32.mrb[28].mxu0 }
 0x1a5   : > { %v7474_v62 = vpop.f32.mrb[29].mxu0 }
 0x1a6   : > { %v7475_v44 = vadd.f32 %v7474_v62, %v7473_v29  ;;  %v6280_v29 = vld [vmem:[#allocation2 + $0x1c8] sm:$0xff] }
 0x1a7   : > { %v8172_v33 = vpack.c.bf16 %v6280_v29, %v6279_v30 }
 0x1a8   : > { %v5234_v25 = vadd.f32 %v7475_v44, %v10083_v9  ;;  %v6351_v9 = vld [vmem:[#allocation2 + $0x400] sm:$0xff]  ;;  %v6264_v44 = vld [vmem:[#allocation2 + $0x148] sm:$0xff] }
 0x1a9   : > { %v7544_v48 = vpop.f32.mrb[28].mxu1  ;;  %v10169_v16 = vpack.c.bf16 %v6352_v41, %v6351_v9  ;;  %v8174_v22 = vpack.c.bf16 %v6264_v44, %v6263_v31 }
 0x1aa   : > { %v7545_v49 = vpop.f32.mrb[29].mxu1 }
 0x1ab   : > { %v7546_v11 = vadd.f32 %v7545_v49, %v7544_v48  ;;  %v7476_v19 = vpop.f32.mrb[30].mxu0  ;;  %8253 = vmatprep.subr.bf16.mxu0 %v10169_v16  ;;  %v6265_v48 = vld [vmem:[#allocation2 + $0x150] sm:$0xff] }
 0x1ac   : > { %v7477_v57 = vpop.f32.mrb[31].mxu0 }
 0x1ad   : > { %v7478_v21 = vadd.f32 %v7477_v57, %v7476_v19  ;;  %v10166_v5 = vadd.f32 %v7546_v11, %v5234_v25  ;;  %v6282_v25 = vld [vmem:[#allocation2 + $0x1d8] sm:$0xff] }
 0x1ae   : > { %v8176_v19 = vpack.c.bf16 %v6282_v25, %v6281_v47  ;;  %v6266_v57 = vld [vmem:[#allocation2 + $0x158] sm:$0xff] }
 0x1af   : > { %v5239_v7 = vadd.f32 %v7478_v21, %v10094_v55  ;;  %v6259_v55 = vld [vmem:[#allocation2 + $0x120] sm:$0xff]  ;;  %v8178_v46 = vpack.c.bf16 %v6266_v57, %v6265_v48 }
 0x1b0   : > { %v7547_v58 = vpop.f32.mrb[30].mxu1  ;;  %v8166_v45 = vpack.c.bf16 %v6260_v37, %v6259_v55 }
 0x1b1   : > { %v7548_v26 = vpop.f32.mrb[31].mxu1 }
 0x1b2   : > { %v7549_v63 = vadd.f32 %v7548_v26, %v7547_v58  ;;  %8167 = vmatpush3.bf16.msra.mxu1 %v8166_v45  ;;  %v6268_v58 = vld [vmem:[#allocation2 + $0x168] sm:$0xff]  ;;  %v6285_v26 = vld [vmem:[#allocation2 + $0x1f0] sm:$0xff] }
 0x1b3   : > { %v7479_v52 = vpop.f32.mrb[32].mxu0  ;;  %8169 = vmatprep.subr.bf16.mxu1 %v8168_v0  ;;  %v8182_v40 = vpack.c.bf16 %v6268_v58, %v6267_v60  ;;  %v6336_v45 = vld [vmem:[#allocation2 + $0x388] sm:$0xff] }
 0x1b4   : > { %v7480_v61 = vpop.f32.mrb[33].mxu0  ;;  %v10172_v2 = vadd.f32 %v7549_v63, %v5239_v7  ;;  %v6284_v7 = vld [vmem:[#allocation2 + $0x1e8] sm:$0xff]  ;;  %v6269_v63 = vld [vmem:[#allocation2 + $0x170] sm:$0xff] }
 0x1b5   : > { %v7481_v32 = vadd.f32 %v7480_v61, %v7479_v52  ;;  %v8180_v54 = vpack.c.bf16 %v6284_v7, %v6283_v13  ;;  %v6270_v52 = vld [vmem:[#allocation2 + $0x178] sm:$0xff]  ;;  %v6335_v61 = vld [vmem:[#allocation2 + $0x380] sm:$0xff] }
 0x1b6   : > { %8171 = vmatpush3.bf16.msra.mxu1 %v8170_v27  ;;  %v8186_v55 = vpack.c.bf16 %v6270_v52, %v6269_v63 }
 0x1b7   : > { %v5244_v38 = vadd.f32 %v7481_v32, %v10116_v39  ;;  %8173 = vmatprep.subr.bf16.mxu1 %v8172_v33  ;;  %v8220_v32 = vpack.c.bf16 %v6336_v45, %v6335_v61 }
 0x1b9   : > { %v7550_v17 = vpop.f32.mrb[32].mxu1 }
 0x1ba   : > { %v7551_v28 = vpop.f32.mrb[33].mxu1  ;;  %8175 = vmatpush3.bf16.msra.mxu1 %v8174_v22 }
 0x1bb   : > { %v7552_v8 = vadd.f32 %v7551_v28, %v7550_v17  ;;  %8177 = vmatprep.subr.bf16.mxu1 %v8176_v19 }
 0x1bc   : > { %v7482_v62 = vpop.f32.mrb[34].mxu0 }
 0x1bd   : > { %v7483_v6 = vpop.f32.mrb[35].mxu0  ;;  %v10175_v53 = vadd.f32 %v7552_v8, %v5244_v38 }
 0x1be   : > { %v7484_v39 = vadd.f32 %v7483_v6, %v7482_v62  ;;  %8179 = vmatpush3.bf16.msra.mxu1 %v8178_v46 }
 0x1bf   : > { %8181 = vmatprep.subr.bf16.mxu1 %v8180_v54 }
 0x1c0   : > { %v5249_v49 = vadd.f32 %v7484_v39, %v10128_v24  ;;  %v7553_v11 = vpop.f32.mrb[34].mxu1  ;;  %v6286_v24 = vld [vmem:[#allocation2 + $0x1f8] sm:$0xff] }
 0x1c1   : > { %v7554_v21 = vpop.f32.mrb[35].mxu1  ;;  %v8184_v42 = vpack.c.bf16 %v6286_v24, %v6285_v26 }
 0x1c2   : > { %v7555_v18 = vadd.f32 %v7554_v21, %v7553_v11  ;;  %8183 = vmatpush3.bf16.msra.mxu1 %v8182_v40 }
 0x1c3   : > { %8185 = vmatprep.subr.bf16.mxu1 %v8184_v42 }
 0x1c4   : > { %v7485_v9 = vpop.f32.mrb[36].mxu0  ;;  %v10178_v41 = vadd.f32 %v7555_v18, %v5249_v49 }
 0x1c5   : > { %v7486_v4 = vpop.f32.mrb[37].mxu0 }
 0x1c6   : > { %v7487_v1 = vadd.f32 %v7486_v4, %v7485_v9  ;;  %8187 = vmatpush3.bf16.msra.mxu1 %v8186_v55 }
 0x1c7   : > { %8221 = vmatprep.subr.bf16.mxu1 %v8220_v32 }
 0x1c8   : > { %v5254_v37 = vadd.f32 %v7487_v1, %v10134_v50 }
 0x1ca   : > { %v7556_v12 = vpop.f32.mrb[36].mxu1 }
 0x1cb   : > { %v7557_v59 = vpop.f32.mrb[37].mxu1  ;;  %v7488_v38 = vpop.f32.mrb[38].mxu0 }
 0x1cc   : > { %v7558_v0 = vadd.f32 %v7557_v59, %v7556_v12  ;;  %v7489_v14 = vpop.f32.mrb[39].mxu0 }
 0x1cd   : > { %v7490_v15 = vadd.f32 %v7489_v14, %v7488_v38 }
 0x1ce   : > { %v10181_v27 = vadd.f32 %v7558_v0, %v5254_v37  ;;  %v10204_v0 = vld [vmem:[%s10689_s3] ss:$0 sm:$0xff] }
 0x1cf   : > { %v5259_v17 = vadd.f32 %v7490_v15, %v10136_v43 }
 0x1d1   : > { %v7559_v28 = vpop.f32.mrb[38].mxu1 }
 0x1d2   : > { %v7560_v8 = vpop.f32.mrb[39].mxu1 }
 0x1d3   : > { %v7561_v30 = vadd.f32 %v7560_v8, %v7559_v28 }
 0x1d5   : > { %v7491_v50 = vpop.f32.mrb[40].mxu0  ;;  %v10184_v29 = vadd.f32 %v7561_v30, %v5259_v17 }
 0x1d6   : > { %v7492_v62 = vpop.f32.mrb[41].mxu0 }
 0x1d7   : > { %v7493_v33 = vadd.f32 %v7492_v62, %v7491_v50 }
 0x1d9   : > { %v5264_v31 = vadd.f32 %v7493_v33, %v10138_v10  ;;  %v7562_v44 = vpop.f32.mrb[40].mxu1 }
 0x1da   : > { %v7563_v6 = vpop.f32.mrb[41].mxu1 }
 0x1db   : > { %v7564_v22 = vadd.f32 %v7563_v6, %v7562_v44 }
 0x1dc   : > { %v7494_v39 = vpop.f32.mrb[42].mxu0 }
 0x1dd   : > { %v7495_v47 = vpop.f32.mrb[43].mxu0  ;;  %v10187_v25 = vadd.f32 %v7564_v22, %v5264_v31 }
 0x1de   : > { %v7496_v48 = vadd.f32 %v7495_v47, %v7494_v39 }
 0x1e0   : > { %v5269_v43 = vadd.f32 %v7496_v48, %v10140_v23  ;;  %v6353_v48 = vld [vmem:[#allocation2 + $0x410] sm:$0xff] }
 0x1e2   : > { %v7565_v49 = vpop.f32.mrb[42].mxu1 }
 0x1e3   : > { %v7566_v11 = vpop.f32.mrb[43].mxu1 }
 0x1e4   : > { %v7567_v19 = vadd.f32 %v7566_v11, %v7565_v49  ;;  %v6355_v49 = vld [vmem:[#allocation2 + $0x420] sm:$0xff] }
 0x1e5   : > { %v7497_v57 = vpop.f32.mrb[44].mxu0 }
 0x1e6   : > { %v7498_v21 = vpop.f32.mrb[45].mxu0  ;;  %v10190_v46 = vadd.f32 %v7567_v19, %v5269_v43  ;;  %v6354_v43 = vld [vmem:[#allocation2 + $0x418] sm:$0xff] }
 0x1e7   : > { %v7499_v13 = vadd.f32 %v7498_v21, %v7497_v57  ;;  %v6356_v21 = vld [vmem:[#allocation2 + $0x428] sm:$0xff] }
 0x1e9   : > { %v5274_v10 = vadd.f32 %v7499_v13, %v10142_v34  ;;  %v7568_v7 = vpop.f32.mrb[44].mxu1  ;;  %v6357_v13 = vld [vmem:[#allocation2 + $0x430] sm:$0xff] }
 0x1ea   : > { %v7569_v60 = vpop.f32.mrb[45].mxu1 }
 0x1eb   : > { %v7570_v18 = vadd.f32 %v7569_v60, %v7568_v7  ;;  %v10226_v60 = vpack.c.bf16 %v6354_v43, %v6353_v48 }
 0x1ed   : > { %v7500_v54 = vpop.f32.mrb[46].mxu0  ;;  %v10193_v58 = vadd.f32 %v7570_v18, %v5274_v10  ;;  %v6358_v10 = vld [vmem:[#allocation2 + $0x438] sm:$0xff]  ;;  %v6360_v18 = vld [vmem:[#allocation2 + $0x448] sm:$0xff] }
 0x1ee   : > { %v7501_v40 = vpop.f32.mrb[47].mxu0 }
 0x1ef   : > { %v7502_v9 = vadd.f32 %v7501_v40, %v7500_v54 }
 0x1f1   : > { %v5279_v23 = vadd.f32 %v7502_v9, %v10144_v36 }
 0x1f3   : > { %v7571_v26 = vpop.f32.mrb[46].mxu1 }
 0x1f4   : > { %v7572_v24 = vpop.f32.mrb[47].mxu1  ;;  %v7503_v63 = vpop.f32.mrb[48].mxu0 }
 0x1f5   : > { %v7573_v4 = vadd.f32 %v7572_v24, %v7571_v26  ;;  %v7504_v42 = vpop.f32.mrb[49].mxu0  ;;  %v6361_v24 = vld [vmem:[#allocation2 + $0x450] sm:$0xff] }
 0x1f6   : > { %v7505_v52 = vadd.f32 %v7504_v42, %v7503_v63  ;;  %v6362_v63 = vld [vmem:[#allocation2 + $0x458] sm:$0xff] }
 0x1f7   : > { %v10196_v1 = vadd.f32 %v7573_v4, %v5279_v23 }
 0x1f8   : > { %v5284_v34 = vadd.f32 %v7505_v52, %v10152_v56  ;;  %v10210_v56 = vld [vmem:[%s10689_s3 + $0x1] ss:$0 sm:$0xff]  ;;  %v10231_v52 = vpack.c.bf16 %v6356_v21, %v6355_v49 }
 0x1f9   : > { %v7506_v55 = vpop.f32.mrb[50].mxu0 }
 0x1fa   : > { %v7574_v37 = vpop.f32.mrb[48].mxu1  ;;  %v7507_v61 = vpop.f32.mrb[51].mxu0 }
 0x1fb   : > { %v7575_v45 = vpop.f32.mrb[49].mxu1 }
 0x1fc   : > { %v7576_v32 = vadd.f32 %v7575_v45, %v7574_v37 }
 0x1fe   : > { %v10199_v12 = vadd.f32 %v7576_v32, %v5284_v34  ;;  %v10233_v34 = vpack.c.bf16 %v6358_v10, %v6357_v13  ;;  %v6363_v32 = vld [vmem:[#allocation2 + $0x460] sm:$0xff] }
 0x200   : > { %v5488_v59 = vpop.f32.mrb[52].mxu0 }
 0x201   : > { %v7891_v38 = vpop.f32.mrb[53].mxu0  ;;  %v6364_v59 = vld [vmem:[#allocation2 + $0x468] sm:$0xff] }
 0x204   : > { %v5493_v36 = vpop.f32.mrb[54].mxu0 }
 0x205   : > { %v5494_v14 = vadd.f32 %v5493_v36, %v10166_v5  ;;  %v7894_v15 = vpop.f32.mrb[55].mxu0  ;;  %v10217_v5 = vadd.s32 8, %v8764_v3 }
 0x207   : > { %v5558_v17 = vmul.f32 %v10204_v0, %v5494_v14  ;;  %vm5836_vm2 = vcmp.le.s32.totalorder %v10217_v5, 8 }
 0x208   : > { %v5498_v28 = vpop.f32.mrb[56].mxu0 }
 0x209   : > { %v5576_v8 = vadd.f32 %v10210_v56, %v5558_v17  ;;  %v5499_v30 = vadd.f32 %v5498_v28, %v10172_v2  ;;  %v7897_v50 = vpop.f32.mrb[57].mxu0  ;;  %v10240_v17 = vpack.c.bf16 %v6362_v63, %v6361_v24 }
 0x20b   : > { %v5589_v62 = vmax.f32 %v5576_v8, 0.0  ;;  %v5559_v33 = vmul.f32 %v10204_v0, %v5499_v30 }
 0x20c   : > { %v5503_v31 = vpop.f32.mrb[58].mxu0 }
 0x20d   : > { %v5631_v44 = vcombine.high %v5589_v62, %v5589_v62  ;;  %v5638_v6 = vrot.slane %v5589_v62, %v8814_v20  ;;  %v5577_v22 = vadd.f32 %v10210_v56, %v5559_v33  ;;  %v5504_v39 = vadd.f32 %v5503_v31, %v10175_v53  ;;  %v7900_v47 = vpop.f32.mrb[59].mxu0  ;;  %v6359_v53 = vld [vmem:[#allocation2 + $0x440] sm:$0xff] }
 0x20e   : > { %v10236_v45 = vpack.c.bf16 %v6360_v18, %v6359_v53 }
 0x20f   : > { %v5645_v2 = vrot.slane %v5631_v44, %v8814_v20  ;;  %v5646_v11 = vcombine.high %v5638_v6, %v5638_v6  ;;  %v5590_v19 = vmax.f32 %v5577_v22, 0.0  ;;  %v5560_v57 = vmul.f32 %v10204_v0, %v5504_v39 }
 0x210   : > { %v5508_v7 = vpop.f32.mrb[60].mxu0  ;;  %v10247_v44 = vpack.c.bf16 %v6364_v59, %v6363_v32 }
 0x211   : > { %v5865_v54 = vcombine.low %v5646_v11, %v5645_v2  ;;  %v5647_v40 = vcombine.high %v5645_v2, %v5645_v2  ;;  %v5648_v9 = vcombine.high %v5590_v19, %v5590_v19  ;;  %v5655_v23 = vrot.slane %v5590_v19, %v8814_v20  ;;  %v7903_v26 = vpop.f32.mrb[61].mxu0 }
 0x212   : > { %v5578_v4 = vadd.f32 %v10210_v56, %v5560_v57  ;;  %v5509_v42 = vadd.f32 %v5508_v7, %v10178_v41 }
 0x213   : > { %v5662_v55 = vrot.slane %v5648_v9, %v8814_v20  ;;  %v5663_v37 = vcombine.high %v5655_v23, %v5655_v23  ;;  %v5866_v61 = vcombine.low %v5647_v40, %v5655_v23  ;;  %v5873_v38 = vrot.slane %v5865_v54, %v8814_v20 }
 0x214   : > { %v5591_v36 = vmax.f32 %v5578_v4, 0.0  ;;  %v5561_v14 = vmul.f32 %v10204_v0, %v5509_v42  ;;  %v5513_v15 = vpop.f32.mrb[62].mxu0 }
 0x215   : > { %v5664_v41 = vcombine.high %v5662_v55, %v5662_v55  ;;  %v5880_v28 = vrot.slane %v5866_v61, %v8814_v20  ;;  %v5514_v8 = vadd.f32 %v5513_v15, %v10181_v27  ;;  %v7906_v30 = vpop.f32.mrb[63].mxu0  ;;  %v5888_v50 = vrot.slane %v5663_v37, %v8814_v20 }
 0x216   : > { %v5665_v62 = vcombine.high %v5591_v36, %v5591_v36  ;;  %v5672_v33 = vrot.slane %v5591_v36, %v8814_v20  ;;  %v5579_v31 = vadd.f32 %v10210_v56, %v5561_v14 }
 0x217   : > { %v5889_v6 = vcombine.low %v5662_v55, %v5664_v41  ;;  %v5562_v22 = vmul.f32 %v10204_v0, %v5514_v8  ;;  %v10250_v39 = vcombine.low %v5873_v38, %v5880_v28  ;;  %v6104_v47 = vsel %vm5836_vm2, %v5888_v50, 0.0 }
 0x218   : > { %v10255_v27 = vrot.slane %v5665_v62, %v8814_v20  ;;  %v5680_v48 = vcombine.high %v5672_v33, %v5672_v33  ;;  %v5592_v43 = vmax.f32 %v5579_v31, 0.0  ;;  %v5518_v49 = vpop.f32.mrb[64].mxu0  ;;  %v6142_v2 = vrot.slane %v6104_v47, 1 }
 0x219   : > { %v5897_v11 = vrot.slane %v5889_v6, %v8814_v20  ;;  %v5580_v19 = vadd.f32 %v10210_v56, %v5562_v22  ;;  %v5519_v57 = vadd.f32 %v5518_v49, %v10184_v29  ;;  %v7909_v21 = vpop.f32.mrb[65].mxu0  ;;  %v6103_v13 = vsel %vm5829_vm1, %v10250_v39, 0.0 }
 0x21a   : > { %v5890_v10 = vcombine.low %v5672_v33, %v5680_v48  ;;  %v5681_v7 = vcombine.high %v10255_v27, %v10255_v27  ;;  %v5682_v53 = vcombine.high %v5592_v43, %v5592_v43  ;;  %v5689_v18 = vrot.slane %v5592_v43, %v8814_v20 }
 0x21b   : > { %v5593_v54 = vmax.f32 %v5580_v19, 0.0  ;;  %v5563_v40 = vmul.f32 %v10204_v0, %v5519_v57  ;;  %v6141_v9 = vrot.slane %v6103_v13, 1  ;;  %v6174_v23 = vrot.slane %v6103_v13, 2 }
 0x21c   : > { %v5904_v26 = vrot.slane %v5890_v10, %v8814_v20  ;;  %v10269_v29 = vrot.slane %v5682_v53, %v8814_v20  ;;  %v5697_v24 = vcombine.high %v5689_v18, %v5689_v18  ;;  %v5913_v63 = vcombine.low %v5681_v7, %v5689_v18  ;;  %v5523_v4 = vpop.f32.mrb[66].mxu0 }
 0x21d   : > { %v5699_v42 = vcombine.high %v5593_v54, %v5593_v54  ;;  %v5706_v55 = vrot.slane %v5593_v54, %v8814_v20  ;;  %v5581_v37 = vadd.f32 %v10210_v56, %v5563_v40  ;;  %v5524_v61 = vadd.f32 %v5523_v4, %v10187_v25  ;;  %v7912_v32 = vpop.f32.mrb[67].mxu0 }
 0x21e   : > { %v10274_v59 = vcombine.low %v5897_v11, %v5904_v26  ;;  %v5698_v38 = vcombine.high %v10269_v29, %v10269_v29  ;;  %v5914_v36 = vcombine.low %v5697_v24, %v10269_v29  ;;  %v5921_v14 = vrot.slane %v5913_v63, %v8814_v20 }
 0x21f   : > { %v5713_v15 = vrot.slane %v5699_v42, %v8814_v20  ;;  %v5714_v41 = vcombine.high %v5706_v55, %v5706_v55  ;;  %v5594_v28 = vmax.f32 %v5581_v37, 0.0  ;;  %v5564_v8 = vmul.f32 %v10204_v0, %v5524_v61 }
 0x220   : > { %v5928_v30 = vrot.slane %v5914_v36, %v8814_v20  ;;  %v6143_v25 = vsel %vm6137_vm3, %v6141_v9, %v6142_v2  ;;  %v6175_v50 = vrot.slane %v6104_v47, 2  ;;  %v5528_v62 = vpop.f32.mrb[68].mxu0  ;;  %v5912_v33 = vrot.slane %v10255_v27, %v8814_v20 }
 0x221   : > { %v5715_v31 = vcombine.high %v5713_v15, %v5713_v15  ;;  %v5937_v6 = vcombine.low %v5706_v55, %v5714_v41  ;;  %v5716_v22 = vcombine.high %v5594_v28, %v5594_v28  ;;  %v10287_v48 = vrot.slane %v5594_v28, %v8814_v20  ;;  %6436 = vmatprep.mubr.f32.mxu1 %v6143_v25  ;;  %v7915_v43 = vpop.f32.mrb[69].mxu0 }
 0x222   : > { %v10289_v49 = vcombine.low %v5921_v14, %v5928_v30  ;;  %v5582_v11 = vadd.f32 %v10210_v56, %v5564_v8  ;;  %v10293_v19 = vsel %vm6170_vm4, %v6174_v23, %v6175_v50  ;;  %7258 = vmatmul.mubr.msk.f32.gmra.mrb[54].mxu1 %vm5829_vm1, %v10250_v39  ;;  %v5529_v47 = vadd.f32 %v5528_v62, %v10190_v46 }
 0x223   : > { %v5938_v27 = vcombine.low %v5713_v15, %v5715_v31  ;;  %v5945_v2 = vrot.slane %v5937_v6, %v8814_v20  ;;  %v5730_v57 = vrot.slane %v5716_v22, %v8814_v20  ;;  %v5731_v21 = vcombine.high %v10287_v48, %v10287_v48  ;;  %6641 = vmatprep.mubr.f32.mxu0 %v10293_v19 }
 0x224   : > { %v5960_v13 = vrot.slane %v10287_v48, %v8814_v20  ;;  %v5595_v10 = vmax.f32 %v5582_v11, 0.0  ;;  %6642 = vmatmul.mubr.f32.vlgmr.msra.gmra.mrb[78].mxu0 %v6143_v25  ;;  %v5565_v7 = vmul.f32 %v10204_v0, %v5529_v47  ;;  %v6105_v46 = vsel %vm5829_vm1, %v10274_v59, 0.0  ;;  %v5533_v53 = vpop.f32.mrb[70].mxu0 }
 0x225   : > { %v5952_v18 = vrot.slane %v5938_v27, %v8814_v20  ;;  %v5961_v54 = vcombine.low %v5731_v21, %v5730_v57  ;;  %v5732_v40 = vcombine.high %v5730_v57, %v5730_v57  ;;  %v6106_v9 = vsel %vm5836_vm2, %v5912_v33, 0.0  ;;  %v7918_v23 = vpop.f32.mrb[71].mxu0  ;;  %8255 = vmatpush3.bf16.msra.mxu0 %v10169_v16 }
 0x226   : > { %v5733_v26 = vcombine.high %v5595_v10, %v5595_v10  ;;  %v10315_v29 = vrot.slane %v5595_v10, %v8814_v20  ;;  %v5583_v24 = vadd.f32 %v10210_v56, %v5565_v7  ;;  %v6144_v63 = vrot.slane %v6105_v46, 1  ;;  %8257 = vmatprep.subr.bf16.mxu0 %v10226_v60 }
 0x227   : > { %v10319_v4 = vcombine.low %v5945_v2, %v5952_v18  ;;  %v5969_v42 = vrot.slane %v5961_v54, %v8814_v20  ;;  %v6145_v55 = vrot.slane %v6106_v9, 1  ;;  %v6177_v37 = vrot.slane %v6105_v46, 2 }
 0x228   : > { %v5747_v61 = vrot.slane %v5733_v26, %v8814_v20  ;;  %v5748_v16 = vcombine.high %v10315_v29, %v10315_v29  ;;  %v5962_v32 = vcombine.low %v5732_v40, %v10315_v29  ;;  %v5596_v36 = vmax.f32 %v5583_v24, 0.0  ;;  %v5538_v14 = vpop.f32.mrb[72].mxu0 }
 0x229   : > { %v10327_v15 = vsel %vm6137_vm3, %v6144_v63, %v6145_v55  ;;  %v6178_v41 = vrot.slane %v6106_v9, 2  ;;  %v5534_v28 = vadd.f32 %v5533_v53, %v10193_v58  ;;  %v5936_v8 = vrot.slane %v5698_v38, %v8814_v20  ;;  %v7921_v30 = vpop.f32.mrb[73].mxu0  ;;  %8259 = vmatpush3.bf16.msra.mxu0 %v10226_v60 }
 0x22a   : > { %v5749_v25 = vcombine.high %v5747_v61, %v5747_v61  ;;  %v5976_v50 = vrot.slane %v5962_v32, %v8814_v20  ;;  %v5750_v62 = vcombine.high %v5596_v36, %v5596_v36  ;;  %v5757_v33 = vrot.slane %v5596_v36, %v8814_v20  ;;  %6441 = vmatprep.mubr.f32.mxu1 %v10327_v15 }
 0x22b   : > { %v10336_v31 = vsel %vm6170_vm4, %v6177_v37, %v6178_v41  ;;  %v5566_v6 = vmul.f32 %v10204_v0, %v5534_v28  ;;  %7259 = vmatmul.mubr.msk.f32.gmra.mrb[56].mxu1 %vm5829_vm1, %v10274_v59  ;;  %v6107_v58 = vsel %vm5829_vm1, %v10289_v49, 0.0  ;;  %v6108_v60 = vsel %vm5836_vm2, %v5936_v8, 0.0  ;;  %8261 = vmatprep.subr.bf16.mxu0 %v10231_v52 }
 0x22c   : > { %v10348_v38 = vcombine.low %v5969_v42, %v5976_v50  ;;  %v5985_v22 = vcombine.low %v5747_v61, %v5749_v25  ;;  %v10351_v43 = vrot.slane %v5750_v62, %v8814_v20  ;;  %v5765_v11 = vcombine.high %v5757_v33, %v5757_v33  ;;  %6646 = vmatprep.mubr.f32.mxu0 %v10336_v31  ;;  %v5543_v47 = vpop.f32.mrb[74].mxu0 }
 0x22d   : > { %v5584_v27 = vadd.f32 %v10210_v56, %v5566_v6  ;;  %6647 = vmatmul.mubr.f32.gmra.mrb[80].mxu0 %v10327_v15  ;;  %v6147_v2 = vrot.slane %v6107_v58, 1  ;;  %v6148_v57 = vrot.slane %v6108_v60, 1  ;;  %v6180_v21 = vrot.slane %v6107_v58, 2  ;;  %v7924_v10 = vpop.f32.mrb[75].mxu0 }
 0x22e   : > { %v5993_v7 = vrot.slane %v5985_v22, %v8814_v20  ;;  %v5986_v46 = vcombine.low %v5757_v33, %v5765_v11  ;;  %v5766_v53 = vcombine.high %v10351_v43, %v10351_v43  ;;  %v6181_v18 = vrot.slane %v6108_v60, 2  ;;  %8263 = vmatpush3.bf16.msra.mxu0 %v10231_v52  ;;  %v6365_v11 = vld [vmem:[#allocation2 + $0x470] sm:$0xff] }
 0x22f   : > { %v5597_v54 = vmax.f32 %v5584_v27, 0.0  ;;  %v10361_v40 = vsel %vm6137_vm3, %v6147_v2, %v6148_v57  ;;  %v5539_v9 = vadd.f32 %v5538_v14, %v10196_v1  ;;  %v5544_v23 = vadd.f32 %v5543_v47, %v10199_v12  ;;  %8265 = vmatprep.subr.bf16.mxu0 %v10233_v34  ;;  %v6366_v47 = vld [vmem:[#allocation2 + $0x478] sm:$0xff] }
 0x230   : > { %v6000_v26 = vrot.slane %v5986_v46, %v8814_v20  ;;  %6446 = vmatprep.mubr.f32.mxu1 %v10361_v40  ;;  %v10369_v24 = vsel %vm6170_vm4, %v6180_v21, %v6181_v18  ;;  %v6109_v52 = vsel %vm5829_vm1, %v10319_v4, 0.0  ;;  %v6110_v1 = vsel %vm5836_vm2, %v5960_v13, 0.0 }
 0x231   : > { %v5767_v12 = vcombine.high %v5597_v54, %v5597_v54  ;;  %v5774_v63 = vrot.slane %v5597_v54, %v8814_v20  ;;  %6651 = vmatprep.mubr.f32.mxu0 %v10369_v24  ;;  %v5567_v42 = vmul.f32 %v10204_v0, %v5539_v9  ;;  %7260 = vmatmul.mubr.msk.f32.gmra.mrb[58].mxu1 %vm5829_vm1, %v10289_v49  ;;  %v6150_v55 = vrot.slane %v6109_v52, 1 }
 0x232   : > { %v10385_v37 = vcombine.low %v5993_v7, %v6000_v26  ;;  %6652 = vmatmul.mubr.f32.gmra.mrb[82].mxu0 %v10361_v40  ;;  %v5568_v48 = vmul.f32 %v10204_v0, %v5544_v23  ;;  %v6151_v61 = vrot.slane %v6110_v1, 1  ;;  %v6183_v13 = vrot.slane %v6109_v52, 2 }
 0x233   : > { %v5781_v32 = vrot.slane %v5767_v12, %v8814_v20  ;;  %v5782_v36 = vcombine.high %v5774_v63, %v5774_v63  ;;  %v6009_v14 = vcombine.low %v5766_v53, %v5774_v63  ;;  %v5585_v41 = vadd.f32 %v10210_v56, %v5567_v42  ;;  %8267 = vmatpush3.bf16.msra.mxu0 %v10233_v34 }
 0x234   : > { %v5586_v28 = vadd.f32 %v10210_v56, %v5568_v48  ;;  %v10394_v8 = vsel %vm6137_vm3, %v6150_v55, %v6151_v61  ;;  %v6184_v30 = vrot.slane %v6110_v1, 2  ;;  %v5984_v0 = vrot.slane %v5748_v16, %v8814_v20  ;;  %8269 = vmatprep.subr.bf16.mxu0 %v10236_v45 }
 0x235   : > { %v5783_v25 = vcombine.high %v5781_v32, %v5781_v32  ;;  %v6010_v50 = vcombine.low %v5782_v36, %v5781_v32  ;;  %v6017_v62 = vrot.slane %v6009_v14, %v8814_v20  ;;  %v5598_v33 = vmax.f32 %v5585_v41, 0.0  ;;  %6451 = vmatprep.mubr.f32.mxu1 %v10394_v8 }
 0x236   : > { %v5599_v34 = vmax.f32 %v5586_v28, 0.0  ;;  %v10404_v56 = vsel %vm6170_vm4, %v6183_v13, %v6184_v30  ;;  %7261 = vmatmul.mubr.msk.f32.gmra.mrb[60].mxu1 %vm5829_vm1, %v10319_v4  ;;  %v6111_v29 = vsel %vm5829_vm1, %v10348_v38, 0.0  ;;  %v6112_v16 = vsel %vm5836_vm2, %v5984_v0, 0.0 }
 0x237   : > { %v6024_v6 = vrot.slane %v6010_v50, %v8814_v20  ;;  %v5784_v58 = vcombine.high %v5598_v33, %v5598_v33  ;;  %v5791_v60 = vrot.slane %v5598_v33, %v8814_v20  ;;  %6656 = vmatprep.mubr.f32.mxu0 %v10404_v56  ;;  %v6153_v22 = vrot.slane %v6111_v29, 1  ;;  %8271 = vmatpush3.bf16.msra.mxu0 %v10236_v45  ;;  %v6319_v33 = vld [vmem:[#allocation2 + $0x300] sm:$0xff] }
 0x238   : > { %v5808_v27 = vrot.slane %v5599_v34, %v8814_v20  ;;  %6657 = vmatmul.mubr.f32.gmra.mrb[84].mxu0 %v10394_v8  ;;  %v6154_v2 = vrot.slane %v6112_v16, 1  ;;  %v6186_v57 = vrot.slane %v6111_v29, 2  ;;  %v6187_v21 = vrot.slane %v6112_v16, 2  ;;  %8273 = vmatprep.subr.bf16.mxu0 %v10240_v17  ;;  %v6320_v34 = vld [vmem:[#allocation2 + $0x308] sm:$0xff] }
 0x239   : > { %v10421_v10 = vcombine.low %v6017_v62, %v6024_v6  ;;  %v5798_v7 = vrot.slane %v5784_v58, %v8814_v20  ;;  %v5799_v46 = vcombine.high %v5791_v60, %v5791_v60  ;;  %v6008_v53 = vrot.slane %v10351_v43, %v8814_v20  ;;  %v6338_v6 = vld [vmem:[#allocation2 + $0x398] sm:$0xff] }
 0x23a   : > { %v10427_v45 = vsel %vm6137_vm3, %v6153_v22, %v6154_v2  ;;  %v10430_v18 = vsel %vm6170_vm4, %v6186_v57, %v6187_v21  ;;  %v6113_v54 = vsel %vm5829_vm1, %v10385_v37, 0.0  ;;  %v8280_v9 = vpack.c.bf16 %v6366_v47, %v6365_v11  ;;  %v6321_v57 = vld [vmem:[#allocation2 + $0x310] sm:$0xff]  ;;  %v6322_v21 = vld [vmem:[#allocation2 + $0x318] sm:$0xff] }
 0x23b   : > { %v5800_v23 = vcombine.high %v5798_v7, %v5798_v7  ;;  %v6033_v26 = vcombine.low %v5791_v60, %v5799_v46  ;;  %6456 = vmatprep.mubr.f32.mxu1 %v10427_v45  ;;  %6661 = vmatprep.mubr.f32.mxu0 %v10430_v18  ;;  %v6114_v43 = vsel %vm5836_vm2, %v6008_v53, 0.0  ;;  %v6156_v52 = vrot.slane %v6113_v54, 1  ;;  %v6340_v46 = vld [vmem:[#allocation2 + $0x3a8] sm:$0xff] }
 0x23c   : > { %7262 = vmatmul.mubr.msk.f32.gmra.mrb[62].mxu1 %vm5829_vm1, %v10348_v38  ;;  %6662 = vmatmul.mubr.f32.gmra.mrb[86].mxu0 %v10427_v45  ;;  %v6157_v1 = vrot.slane %v6114_v43, 1  ;;  %v6189_v12 = vrot.slane %v6113_v54, 2  ;;  %v6190_v63 = vrot.slane %v6114_v43, 2  ;;  %v6032_v42 = vrot.slane %v5783_v25, %v8814_v20  ;;  %v6323_v54 = vld [vmem:[#allocation2 + $0x320] sm:$0xff] }
 0x23d   : > { %v6034_v55 = vcombine.low %v5798_v7, %v5800_v23  ;;  %v6041_v48 = vrot.slane %v6033_v26, %v8814_v20  ;;  %v6056_v61 = vrot.slane %v5808_v27, %v8814_v20  ;;  %v6115_v13 = vsel %vm5829_vm1, %v10421_v10, 0.0  ;;  %8275 = vmatpush3.bf16.msra.mxu0 %v10240_v17  ;;  %v6339_v7 = vld [vmem:[#allocation2 + $0x3a0] sm:$0xff]  ;;  %v6341_v23 = vld [vmem:[#allocation2 + $0x3b0] sm:$0xff]  ;;  %v6342_v26 = vld [vmem:[#allocation2 + $0x3b8] sm:$0xff] }
 0x23e   : > { %v10451_v32 = vsel %vm6137_vm3, %v6156_v52, %v6157_v1  ;;  %v10454_v36 = vsel %vm6170_vm4, %v6189_v12, %v6190_v63  ;;  %v6116_v14 = vsel %vm5836_vm2, %v6032_v42, 0.0  ;;  %v6159_v41 = vrot.slane %v6115_v13, 1  ;;  %8277 = vmatprep.subr.bf16.mxu0 %v10247_v44  ;;  %v6325_v1 = vld [vmem:[#allocation2 + $0x330] sm:$0xff]  ;;  %v6326_v12 = vld [vmem:[#allocation2 + $0x338] sm:$0xff]  ;;  %v6343_v63 = vld [vmem:[#allocation2 + $0x3c0] sm:$0xff] }
 0x23f   : > { %v6048_v28 = vrot.slane %v6034_v55, %v8814_v20  ;;  %6461 = vmatprep.mubr.f32.mxu1 %v10451_v32  ;;  %6666 = vmatprep.mubr.f32.mxu0 %v10454_v36  ;;  %v6160_v30 = vrot.slane %v6116_v14, 1  ;;  %v6192_v17 = vrot.slane %v6115_v13, 2  ;;  %v6193_v0 = vrot.slane %v6116_v14, 2  ;;  %v6344_v42 = vld [vmem:[#allocation2 + $0x3c8] sm:$0xff]  ;;  %v6345_v13 = vld [vmem:[#allocation2 + $0x3d0] sm:$0xff]  ;;  %v6346_v14 = vld [vmem:[#allocation2 + $0x3d8] sm:$0xff] }
 0x240   : > { %7263 = vmatmul.mubr.msk.f32.gmra.mrb[64].mxu1 %vm5829_vm1, %v10385_v37  ;;  %6667 = vmatmul.mubr.f32.gmra.mrb[88].mxu0 %v10451_v32  ;;  %v6118_v62 = vsel %vm5836_vm2, %v6056_v61, 0.0  ;;  %v10480_v29 = vrot.slane %v8510_v51, 2  ;;  %v8222_v11 = vpack.c.bf16 %v6320_v34, %v6319_v33  ;;  %v8228_v53 = vpack.c.bf16 %v6340_v46, %v6339_v7  ;;  %v6328_v61 = vld [vmem:[#allocation2 + $0x348] sm:$0xff]  ;;  %v6331_v33 = vld [vmem:[#allocation2 + $0x360] sm:$0xff] }
 0x241   : > { %v10467_v25 = vsel %vm6137_vm3, %v6159_v41, %v6160_v30  ;;  %v10470_v50 = vsel %vm6170_vm4, %v6192_v17, %v6193_v0  ;;  %8279 = vmatpush3.bf16.msra.mxu0 %v10247_v44  ;;  %v10473_v20 = vcombine.low %v6041_v48, %v6048_v28  ;;  %v6337_v44 = vld [vmem:[#allocation2 + $0x390] sm:$0xff]  ;;  %v6210_v58 = vrot.slane %v6118_v62, 2  ;;  %v6327_v48 = vld [vmem:[#allocation2 + $0x340] sm:$0xff]  ;;  %v6330_v30 = vld [vmem:[#allocation2 + $0x358] sm:$0xff] }
 0x242   : > { %6466 = vmatprep.mubr.f32.mxu1 %v10467_v25  ;;  %6671 = vmatprep.mubr.f32.mxu0 %v10470_v50  ;;  %v6206_v22 = vrot.slane %v6118_v62, 1  ;;  %v8224_v2 = vpack.c.bf16 %v6338_v6, %v6337_v44  ;;  %v8232_v52 = vpack.c.bf16 %v6342_v26, %v6341_v23  ;;  %v8236_v55 = vpack.c.bf16 %v6344_v42, %v6343_v63  ;;  %v6329_v28 = vld [vmem:[#allocation2 + $0x350] sm:$0xff]  ;;  %v6347_v17 = vld [vmem:[#allocation2 + $0x3e0] sm:$0xff]  ;;  %v6348_v0 = vld [vmem:[#allocation2 + $0x3e8] sm:$0xff] }
 0x243   : > { %v6117_v16 = vsel %vm5829_vm1, %v10473_v20, 0.0  ;;  %8281 = vmatprep.subr.bf16.mxu0 %v8280_v9  ;;  %v8240_v41 = vpack.c.bf16 %v6346_v14, %v6345_v13  ;;  %v8244_v62 = vpack.c.bf16 %v6348_v0, %v6347_v17  ;;  %v6332_v34 = vld [vmem:[#allocation2 + $0x368] sm:$0xff]  ;;  %v6350_v44 = vld [vmem:[#allocation2 + $0x3f8] sm:$0xff]  ;;  %v6333_v6 = vld [vmem:[#allocation2 + $0x370] sm:$0xff] }
 0x244   : > { %7264 = vmatmul.mubr.msk.f32.gmra.mrb[66].mxu1 %vm5829_vm1, %v10421_v10  ;;  %6672 = vmatmul.mubr.f32.gmra.mrb[90].mxu0 %v10467_v25  ;;  %v6209_v5 = vrot.slane %v6117_v16, 2  ;;  %v6205_v60 = vrot.slane %v6117_v16, 1  ;;  %v6349_v16 = vld [vmem:[#allocation2 + $0x3f0] sm:$0xff] }
 0x245   : > { %7265 = vmatprep.mubr.msk.f32.mxu1 %vm5829_vm1, %v10250_v39  ;;  %8283 = vmatpush3.bf16.msra.mxu0 %v8280_v9  ;;  %v8226_v39 = vpack.c.bf16 %v6322_v21, %v6321_v57  ;;  %v6324_v9 = vld [vmem:[#allocation2 + $0x328] sm:$0xff] }
 0x246   : > { %v6211_v47 = vsel %vm6170_vm4, %v6209_v5, %v6210_v58  ;;  %v10494_v27 = vsel %vm6137_vm3, %v6205_v60, %v6206_v22  ;;  %v8230_v43 = vpack.c.bf16 %v6324_v9, %v6323_v54  ;;  %v6334_v5 = vld [vmem:[#allocation2 + $0x378] sm:$0xff] }
 0x247   : > { %6676 = vmatprep.mubr.f32.mxu0 %v6211_v47  ;;  %v8250_v58 = vpack.c.bf16 %v6334_v5, %v6333_v6 }
 0x248   : > { %6537 = vmatmul.mubr.f32.vlgmr.msra.gmra.mrb[68].mxu1 %v10480_v29  ;;  %6677 = vmatmul.mubr.f32.gmra.mrb[92].mxu0 %v10494_v27 }
 0x249   : > { %7266 = vmatprep.mubr.msk.f32.mxu1 %vm5829_vm1, %v10274_v59  ;;  %8223 = vmatpush3.bf16.msra.mxu1 %v8222_v11 }
 0x24a   : > { %7960 = vmatprep.mubr.f32.mxu0 %v10336_v31  ;;  %8225 = vmatprep.subr.bf16.mxu1 %v8224_v2 }
 0x24c   : > { %6542 = vmatmul.mubr.f32.gmra.mrb[70].mxu1 %v10293_v19  ;;  %7961 = vmatmul.mubr.f32.vlgmr.msra.gmra.mrb[94].mxu0 %v10369_v24  ;;  %v8234_v19 = vpack.c.bf16 %v6326_v12, %v6325_v1 }
 0x24d   : > { %7267 = vmatprep.mubr.msk.f32.mxu1 %vm5829_vm1, %v10289_v49  ;;  %8227 = vmatpush3.bf16.msra.mxu1 %v8226_v39 }
 0x24e   : > { %7963 = vmatprep.mubr.f32.mxu0 %v10404_v56  ;;  %8229 = vmatprep.subr.bf16.mxu1 %v8228_v53 }
 0x250   : > { %6547 = vmatmul.mubr.f32.gmra.mrb[72].mxu1 %v10336_v31  ;;  %7964 = vmatmul.mubr.f32.gmra.mrb[96].mxu0 %v10430_v18  ;;  %v8238_v31 = vpack.c.bf16 %v6328_v61, %v6327_v48 }
 0x251   : > { %7268 = vmatprep.mubr.msk.f32.mxu1 %vm5829_vm1, %v10319_v4  ;;  %8231 = vmatpush3.bf16.msra.mxu1 %v8230_v43 }
 0x252   : > { %7966 = vmatprep.mubr.f32.mxu0 %v10454_v36  ;;  %8233 = vmatprep.subr.bf16.mxu1 %v8232_v52 }
 0x254   : > { %6552 = vmatmul.mubr.f32.gmra.mrb[74].mxu1 %v10369_v24  ;;  %7967 = vmatmul.mubr.f32.gmra.mrb[98].mxu0 %v10470_v50  ;;  %v8242_v24 = vpack.c.bf16 %v6330_v30, %v6329_v28 }
 0x255   : > { %7269 = vmatprep.mubr.msk.f32.mxu1 %vm5829_vm1, %v10348_v38  ;;  %8235 = vmatpush3.bf16.msra.mxu1 %v8234_v19 }
 0x256   : > { %7969 = vmatprep.mubr.f32.mxu0 %v6211_v47  ;;  %8237 = vmatprep.subr.bf16.mxu1 %v8236_v55 }
 0x258   : > { %6557 = vmatmul.mubr.f32.gmra.mrb[76].mxu1 %v10404_v56  ;;  %7970 = vmatmul.mubr.f32.gmra.mrb[100].mxu0 %v10480_v29  ;;  %v8246_v56 = vpack.c.bf16 %v6332_v34, %v6331_v33  ;;  %v8248_v29 = vpack.c.bf16 %v6350_v44, %v6349_v16 }
 0x259   : > { %7270 = vmatprep.mubr.msk.f32.mxu1 %vm5829_vm1, %v10385_v37  ;;  %8239 = vmatpush3.bf16.msra.mxu1 %v8238_v31 }
 0x25a   : > { %8241 = vmatprep.subr.bf16.mxu1 %v8240_v41 }
 0x25c   : > { %6562 = vmatmul.mubr.f32.gmra.mrb[78].mxu1 %v10430_v18 }
 0x25d   : > { %7271 = vmatprep.mubr.msk.f32.mxu1 %vm5829_vm1, %v10421_v10  ;;  %8243 = vmatpush3.bf16.msra.mxu1 %v8242_v24 }
 0x25e   : > { %8245 = vmatprep.subr.bf16.mxu1 %v8244_v62 }
 0x260   : > { %6567 = vmatmul.mubr.f32.gmra.mrb[80].mxu1 %v10454_v36 }
 0x261   : > { %7272 = vmatprep.mubr.msk.f32.mxu1 %vm5829_vm1, %v10473_v20  ;;  %8247 = vmatpush3.bf16.msra.mxu1 %v8246_v56 }
 0x262   : > { %8249 = vmatprep.subr.bf16.mxu1 %v8248_v29  ;;  %v7577_v18 = vpop.f32.mrb[50].mxu1 }
 0x263   : > { %v7578_v36 = vpop.f32.mrb[51].mxu1 }
 0x264   : > { %6572 = vmatmul.mubr.f32.gmra.mrb[82].mxu1 %v10470_v50 }
 0x265   : > { %8251 = vmatpush3.bf16.msra.mxu1 %v8250_v58  ;;  %6746 = vmatprep.mubr.f32.mxu1 %v10327_v15 }
 0x266   : > { %v7641_v22 = vpop.f32.mrb[52].mxu1 }
 0x267   : > { %v7642_v15 = vpop.f32.mrb[53].mxu1 }
 0x268   : > { %7273 = vmatmul.mubr.msk.f32.vlgmr.msra.gmra.mrb[84].mxu1 %vm5829_vm1, %v10274_v59  ;;  %v7643_v59 = vadd.f32 %v7642_v15, %v7641_v22 }
 0x269   : > { %6751 = vmatprep.mubr.f32.mxu1 %v10361_v40 }
 0x26c   : > { %7274 = vmatmul.mubr.msk.f32.gmra.mrb[86].mxu1 %vm5829_vm1, %v10289_v49  ;;  %v5548_v60 = vpop.f32.mrb[76].mxu0 }
 0x26d   : > { %6756 = vmatprep.mubr.f32.mxu1 %v10394_v8  ;;  %v7927_v50 = vpop.f32.mrb[77].mxu0 }
 0x270   : > { %7275 = vmatmul.mubr.msk.f32.gmra.mrb[88].mxu1 %vm5829_vm1, %v10319_v4 }
 0x271   : > { %6761 = vmatprep.mubr.f32.mxu1 %v10427_v45 }
 0x274   : > { %7276 = vmatmul.mubr.msk.f32.gmra.mrb[90].mxu1 %vm5829_vm1, %v10348_v38 }
 0x275   : > { %6766 = vmatprep.mubr.f32.mxu1 %v10451_v32 }
 0x278   : > { %7277 = vmatmul.mubr.msk.f32.gmra.mrb[92].mxu1 %vm5829_vm1, %v10385_v37 }
 0x279   : > { %6771 = vmatprep.mubr.f32.mxu1 %v10467_v25 }
 0x27c   : > { %7278 = vmatmul.mubr.msk.f32.gmra.mrb[94].mxu1 %vm5829_vm1, %v10421_v10 }
 0x27d   : > { %6776 = vmatprep.mubr.f32.mxu1 %v10494_v27 }
 0x280   : > { %7279 = vmatmul.mubr.msk.f32.gmra.mrb[96].mxu1 %vm5829_vm1, %v10473_v20 }
 0x281   : > { %6781 = vmatprep.mubr.f32.mxu1 %v10160_v35 }
 0x284   : > { %6782 = vmatmul.mubr.f32.gmra.mrb[98].mxu1 %v8510_v51 }
 0x2f5   : > { %v7644_v49 = vpop.f32.mrb[54].mxu1 }
 0x2f6   : > { %v7645_v4 = vpop.f32.mrb[55].mxu1 }
 0x2f7   : > { %v7753_v38 = vpop.f32.mrb[78].mxu0  ;;  %v7646_v40 = vadd.f32 %v7645_v4, %v7644_v49 }
 0x2f8   : > { %v7754_v37 = vpop.f32.mrb[79].mxu0 }
 0x2f9   : > { %v7755_v8 = vadd.f32 %v7754_v37, %v7753_v38 }
 0x2fe   : > { %v7647_v45 = vpop.f32.mrb[56].mxu1 }
 0x2ff   : > { %v7648_v32 = vpop.f32.mrb[57].mxu1 }
 0x300   : > { %v7756_v25 = vpop.f32.mrb[80].mxu0  ;;  %v7649_v10 = vadd.f32 %v7648_v32, %v7647_v45 }
 0x301   : > { %v7757_v11 = vpop.f32.mrb[81].mxu0 }
 0x302   : > { %v7758_v47 = vadd.f32 %v7757_v11, %v7756_v25 }
 0x304   : > { %v7650_v27 = vpop.f32.mrb[58].mxu1 }
 0x305   : > { %v7759_v2 = vpop.f32.mrb[82].mxu0  ;;  %v7651_v3 = vpop.f32.mrb[59].mxu1 }
 0x306   : > { %v7652_v20 = vadd.f32 %v7651_v3, %v7650_v27  ;;  %v7760_v57 = vpop.f32.mrb[83].mxu0 }
 0x307   : > { %v7761_v35 = vadd.f32 %v7760_v57, %v7759_v2 }
 0x309   : > { %v7653_v21 = vpop.f32.mrb[60].mxu1 }
 0x30a   : > { %v7654_v51 = vpop.f32.mrb[61].mxu1 }
 0x30b   : > { %v7762_v7 = vpop.f32.mrb[84].mxu0  ;;  %v7655_v46 = vadd.f32 %v7654_v51, %v7653_v21 }
 0x30c   : > { %v7763_v39 = vpop.f32.mrb[85].mxu0 }
 0x30d   : > { %v7764_v53 = vadd.f32 %v7763_v39, %v7762_v7 }
 0x30f   : > { %v7656_v54 = vpop.f32.mrb[62].mxu1  ;;  %v7765_v9 = vpop.f32.mrb[86].mxu0 }
 0x310   : > { %v7657_v23 = vpop.f32.mrb[63].mxu1  ;;  %v7766_v26 = vpop.f32.mrb[87].mxu0 }
 0x311   : > { %v7658_v43 = vadd.f32 %v7657_v23, %v7656_v54  ;;  %v7767_v52 = vadd.f32 %v7766_v26, %v7765_v9 }
 0x313   : > { %v7659_v1 = vpop.f32.mrb[64].mxu1  ;;  %v7768_v12 = vpop.f32.mrb[88].mxu0 }
 0x314   : > { %v7660_v63 = vpop.f32.mrb[65].mxu1  ;;  %v7769_v42 = vpop.f32.mrb[89].mxu0 }
 0x315   : > { %v7661_v19 = vadd.f32 %v7660_v63, %v7659_v1  ;;  %v7770_v55 = vadd.f32 %v7769_v42, %v7768_v12 }
 0x317   : > { %v7662_v48 = vpop.f32.mrb[66].mxu1  ;;  %v7771_v61 = vpop.f32.mrb[90].mxu0 }
 0x318   : > { %v7663_v13 = vpop.f32.mrb[67].mxu1  ;;  %v7772_v14 = vpop.f32.mrb[91].mxu0 }
 0x319   : > { %v7664_v31 = vadd.f32 %v7663_v13, %v7662_v48  ;;  %v7773_v41 = vadd.f32 %v7772_v14, %v7771_v61  ;;  %v10588_v13 = vld [vmem:[%s10689_s3 + $0x3] ss:$0 sm:$0xff] }
 0x31b   : > { %v7697_v28 = vpop.f32.mrb[68].mxu1  ;;  %v7774_v30 = vpop.f32.mrb[92].mxu0 }
 0x31c   : > { %v7698_v17 = vpop.f32.mrb[69].mxu1  ;;  %v7775_v0 = vpop.f32.mrb[93].mxu0 }
 0x31d   : > { %v7699_v24 = vadd.f32 %v7698_v17, %v7697_v28  ;;  %v7776_v62 = vadd.f32 %v7775_v0, %v7774_v30  ;;  %v7282_v28 = vld [vmem:[%s8811_s28 + $0x22] sm:$0xff] }
 0x31f   : > { %v6539_v33 = vadd.f32 %v7699_v24, %v7643_v59  ;;  %v7700_v34 = vpop.f32.mrb[70].mxu1  ;;  %v7962_v16 = vpop.f32.mrb[94].mxu0 }
 0x320   : > { %v7701_v44 = vpop.f32.mrb[71].mxu1  ;;  %v6853_v56 = vpop.f32.mrb[95].mxu0 }
 0x321   : > { %v7702_v29 = vadd.f32 %v7701_v44, %v7700_v34  ;;  %v6644_v6 = vadd.f32 %v7755_v8, %v6539_v33 }
 0x323   : > { %v6544_v5 = vadd.f32 %v7702_v29, %v7646_v40  ;;  %v7703_v58 = vpop.f32.mrb[72].mxu1  ;;  %v10563_v18 = vpop.f32.mrb[96].mxu0 }
 0x324   : > { %v7704_v36 = vpop.f32.mrb[73].mxu1  ;;  %v6863_v60 = vpop.f32.mrb[97].mxu0 }
 0x325   : > { %v7705_v22 = vadd.f32 %v7704_v36, %v7703_v58  ;;  %v6649_v50 = vadd.f32 %v7758_v47, %v6544_v5 }
 0x327   : > { %v6549_v15 = vadd.f32 %v7705_v22, %v7649_v10  ;;  %v7706_v49 = vpop.f32.mrb[74].mxu1  ;;  %v10565_v4 = vpop.f32.mrb[98].mxu0 }
 0x328   : > { %v7707_v38 = vpop.f32.mrb[75].mxu1  ;;  %v10567_v59 = vpop.f32.mrb[99].mxu0 }
 0x329   : > { %v7708_v37 = vadd.f32 %v7707_v38, %v7706_v49  ;;  %v6654_v45 = vadd.f32 %v7761_v35, %v6549_v15  ;;  %v7284_v49 = vld [vmem:[%s8811_s28 + $0x42] sm:$0xff] }
 0x32b   : > { %v6554_v32 = vadd.f32 %v7708_v37, %v7652_v20  ;;  %v7709_v25 = vpop.f32.mrb[76].mxu1  ;;  %v10569_v8 = vpop.f32.mrb[100].mxu0 }
 0x32c   : > { %v7710_v40 = vpop.f32.mrb[77].mxu1  ;;  %v10571_v11 = vpop.f32.mrb[101].mxu0 }
 0x32d   : > { %v7711_v27 = vadd.f32 %v7710_v40, %v7709_v25  ;;  %v6659_v2 = vadd.f32 %v7764_v53, %v6554_v32 }
 0x32f   : > { %v6559_v3 = vadd.f32 %v7711_v27, %v7655_v46  ;;  %v7712_v47 = vpop.f32.mrb[78].mxu1 }
 0x330   : > { %v7713_v10 = vpop.f32.mrb[79].mxu1 }
 0x331   : > { %v7714_v57 = vadd.f32 %v7713_v10, %v7712_v47  ;;  %v6664_v21 = vadd.f32 %v7767_v52, %v6559_v3  ;;  %v7285_v47 = vld [vmem:[%s8811_s28 + $0x52] sm:$0xff] }
 0x333   : > { %v6564_v51 = vadd.f32 %v7714_v57, %v7658_v43  ;;  %v7715_v7 = vpop.f32.mrb[80].mxu1 }
 0x334   : > { %v7716_v39 = vpop.f32.mrb[81].mxu1 }
 0x335   : > { %v7717_v54 = vadd.f32 %v7716_v39, %v7715_v7  ;;  %v10573_v9 = vadd.f32 %v7770_v55, %v6564_v51 }
 0x337   : > { %v6569_v20 = vadd.f32 %v7717_v54, %v7661_v19  ;;  %v7718_v35 = vpop.f32.mrb[82].mxu1  ;;  %v10582_v19 = vld [vmem:[%s10689_s3 + $0x2] ss:$0 sm:$0xff] }
 0x338   : > { %v7719_v23 = vpop.f32.mrb[83].mxu1 }
 0x339   : > { %v7720_v26 = vadd.f32 %v7719_v23, %v7718_v35  ;;  %v10575_v1 = vadd.f32 %v7773_v41, %v6569_v20  ;;  %v7286_v35 = vld [vmem:[%s8811_s28 + $0x62] sm:$0xff] }
 0x33b   : > { %v6574_v12 = vadd.f32 %v7720_v26, %v7664_v31  ;;  %v7809_v46 = vpop.f32.mrb[84].mxu1 }
 0x33c   : > { %v7810_v53 = vpop.f32.mrb[85].mxu1 }
 0x33d   : > { %v7811_v63 = vadd.f32 %v7810_v53, %v7809_v46  ;;  %v10577_v52 = vadd.f32 %v7776_v62, %v6574_v12 }
 0x33f   : > { %v6749_v43 = vadd.f32 %v7811_v63, %v6644_v6  ;;  %v7812_v42 = vpop.f32.mrb[86].mxu1 }
 0x340   : > { %v7813_v55 = vpop.f32.mrb[87].mxu1 }
 0x341   : > { %v6854_v48 = vadd.f32 %v6853_v56, %v6749_v43  ;;  %v7814_v61 = vadd.f32 %v7813_v55, %v7812_v42  ;;  %v7283_v56 = vld [vmem:[%s8811_s28 + $0x32] sm:$0xff] }
 0x343   : > { %v6897_v14 = vmul.f32 %v10582_v19, %v6854_v48  ;;  %v6754_v31 = vadd.f32 %v7814_v61, %v6649_v50  ;;  %v7815_v41 = vpop.f32.mrb[88].mxu1 }
 0x344   : > { %v7816_v30 = vpop.f32.mrb[89].mxu1 }
 0x345   : > { %v6910_v17 = vadd.f32 %v10588_v13, %v6897_v14  ;;  %v6859_v0 = vadd.f32 %v7962_v16, %v6754_v31  ;;  %v7817_v24 = vadd.f32 %v7816_v30, %v7815_v41 }
 0x347   : > { %v6926_v62 = vadd.f32 %v7282_v28, %v6910_v17  ;;  %v6898_v33 = vmul.f32 %v10582_v19, %v6859_v0  ;;  %v6759_v34 = vadd.f32 %v7817_v24, %v6654_v45  ;;  %v7818_v44 = vpop.f32.mrb[90].mxu1  ;;  %v7288_v28 = vld [vmem:[%s8811_s28 + $0x82] sm:$0xff]  ;;  %v7289_v24 = vld [vmem:[%s8811_s28 + $0x92] sm:$0xff] }
 0x348   : > { %v7819_v29 = vpop.f32.mrb[91].mxu1 }
 0x349   : > { %v6934_v6 = vmax.f32 %v6926_v62, 0.0  ;;  %v6911_v5 = vadd.f32 %v10588_v13, %v6898_v33  ;;  %v6864_v58 = vadd.f32 %v6863_v60, %v6759_v34  ;;  %v7820_v36 = vadd.f32 %v7819_v29, %v7818_v44 }
 0x34b   : > { %6942 = vst [vmem:[%s10598_s10] sm:$0xff] %v6934_v6  ;;  %v6927_v16 = vadd.f32 %v7283_v56, %v6911_v5  ;;  %v6899_v22 = vmul.f32 %v10582_v19, %v6864_v58  ;;  %v6764_v50 = vadd.f32 %v7820_v36, %v6659_v2  ;;  %v7821_v15 = vpop.f32.mrb[92].mxu1 }
 0x34c   : > { %v7822_v38 = vpop.f32.mrb[93].mxu1 }
 0x34d   : > { %v6935_v37 = vmax.f32 %v6927_v16, 0.0  ;;  %v6912_v45 = vadd.f32 %v10588_v13, %v6899_v22  ;;  %v6869_v60 = vadd.f32 %v10563_v18, %v6764_v50  ;;  %v7823_v32 = vadd.f32 %v7822_v38, %v7821_v15 }
 0x34f   : > { %6943 = vst [vmem:[%s10598_s10 + $0x8] sm:$0xff] %v6935_v37  ;;  %v6928_v25 = vadd.f32 %v7284_v49, %v6912_v45  ;;  %v6900_v40 = vmul.f32 %v10582_v19, %v6869_v60  ;;  %v6769_v27 = vadd.f32 %v7823_v32, %v6664_v21  ;;  %v7824_v3 = vpop.f32.mrb[94].mxu1 }
 0x350   : > { %v7825_v10 = vpop.f32.mrb[95].mxu1 }
 0x351   : > { %v6936_v2 = vmax.f32 %v6928_v25, 0.0  ;;  %v6913_v57 = vadd.f32 %v10588_v13, %v6900_v40  ;;  %v6874_v51 = vadd.f32 %v10567_v59, %v6769_v27  ;;  %v7826_v7 = vadd.f32 %v7825_v10, %v7824_v3 }
 0x353   : > { %6944 = vst [vmem:[%s10598_s10 + $0x10] sm:$0xff] %v6936_v2  ;;  %v6929_v18 = vadd.f32 %v7285_v47, %v6913_v57  ;;  %v6901_v39 = vmul.f32 %v10582_v19, %v6874_v51  ;;  %v6774_v54 = vadd.f32 %v7826_v7, %v10573_v9  ;;  %v7827_v20 = vpop.f32.mrb[96].mxu1  ;;  %v7287_v9 = vld [vmem:[%s8811_s28 + $0x72] sm:$0xff]  ;;  %s10645_s28 = scalar_lea.sflag [#allocation4], %s203_s27 }
 0x354   : > { %v7828_v21 = vpop.f32.mrb[97].mxu1 }
 0x355   : > { %v6937_v23 = vmax.f32 %v6929_v18, 0.0  ;;  %v6914_v26 = vadd.f32 %v10588_v13, %v6901_v39  ;;  %v6879_v12 = vadd.f32 %v10565_v4, %v6774_v54  ;;  %v7829_v46 = vadd.f32 %v7828_v21, %v7827_v20 }
 0x357   : > { %6945 = vst [vmem:[%s10598_s10 + $0x18] sm:$0xff] %v6937_v23  ;;  %v6930_v59 = vadd.f32 %v7286_v35, %v6914_v26  ;;  %v6902_v53 = vmul.f32 %v10582_v19, %v6879_v12  ;;  %v7830_v63 = vpop.f32.mrb[98].mxu1  ;;  %v6779_v43 = vadd.f32 %v7829_v46, %v10575_v1 }
 0x358   : > { %v7831_v42 = vpop.f32.mrb[99].mxu1 }
 0x359   : > { %v6938_v55 = vmax.f32 %v6930_v59, 0.0  ;;  %v6915_v48 = vadd.f32 %v10588_v13, %v6902_v53  ;;  %v7832_v61 = vadd.f32 %v7831_v42, %v7830_v63  ;;  %v6884_v4 = vadd.f32 %v10571_v11, %v6779_v43 }
 0x35b   : > { %6946 = vst [vmem:[%s10598_s10 + $0x20] sm:$0xff] %v6938_v55  ;;  %v6931_v14 = vadd.f32 %v7287_v9, %v6915_v48  ;;  %v6784_v31 = vadd.f32 %v7832_v61, %v10577_v52  ;;  %v6903_v41 = vmul.f32 %v10582_v19, %v6884_v4 }
 0x35d   : > { %v6939_v1 = vmax.f32 %v6931_v14, 0.0  ;;  %v6889_v30 = vadd.f32 %v10569_v8, %v6784_v31  ;;  %v6916_v17 = vadd.f32 %v10588_v13, %v6903_v41 }
 0x35f   : > { %6947 = vst [vmem:[%s10598_s10 + $0x28] sm:$0xff] %v6939_v1  ;;  %v6904_v0 = vmul.f32 %v10582_v19, %v6889_v30  ;;  %v6932_v11 = vadd.f32 %v7288_v28, %v6916_v17 }
 0x361   : > { %v6917_v62 = vadd.f32 %v10588_v13, %v6904_v0  ;;  %v6940_v33 = vmax.f32 %v6932_v11, 0.0 }
 0x363   : > { %v6933_v52 = vadd.f32 %v7289_v24, %v6917_v62  ;;  %6948 = vst [vmem:[%s10598_s10 + $0x30] sm:$0xff] %v6940_v33 }
 0x365   : > { %v6941_v8 = vmax.f32 %v6933_v52, 0.0 }
 0x367   : > { %6949 = vst [vmem:[%s10598_s10 + $0x38] sm:$0xff] %v6941_v8 }
 0x368   : > { %8449 = shalt.err (!%p8446_p7)
}
 0x369   : > { %s8450_s6 = scalar_lea.hbm %s10638_s22, 1024  ;;  %s8454_s27 = scalar_lea.hbm %s10690_s4, 4096 }
 0x36a   : > { %p8451_p8 = scmp.ne.s32.totalorder %s10638_s22, %s8450_s6  ;;  %p8455_p1 = scmp.lt.u32.totalorder %s10638_s22, %s10690_s4 }
 0x36b   : > { %p8456_p0 = scmp.lt.u32.totalorder %s8454_s27, %s8450_s6  ;;  %p8458_p6 = scmp.lt.u32.totalorder %s8450_s6, %s10638_s22 }
 0x36c   : > { %p8452_p11 = pnand %p8451_p8, %p10701_p9 }
 0x36d   : > { %p8457_p5 = por %p8456_p0, %p8455_p1 }
 0x36e   : > { %p8453_p13 = pneg %p8452_p11 }
 0x36f   : > { %p8459_p10 = por %p8458_p6, %p8457_p5 }
 0x371   : > { %p8460_p12 = pnand %p8459_p10, %p8453_p13 }
 0x373   : > { %8463 = shalt.err (!%p8460_p12)
}
 0x374   : > { %s8512_s9 = smov 128   ;;  %s8513_s10 = smov 8  }
 0x375   : > { %8289 = dma.vmem_to_hbm [thread:$0]  (%p10701_p9), %s10640_s12, 1024, %s10638_s22, %s10645_s28, %s8512_s9, %s8512_s9, %s8513_s10  }
 0x376 PF: > { %p8301_p2 = scmp.ge.s32.totalorder %s8502_s18, 2  ;;  %s6979_s11 = sand.u32 1, %s8490_s15  }
 0x377   : > { %p10702_p3 = scmp.ne.s32.totalorder %s10695_s26, 0  ;;  %s6980_s13 = scalar_lea.sflag [#allocation4], %s6979_s11 }
 0x379   : > { %p8296_p4 = pnand %p8301_p2, %p10702_p3 }
 0x37b   : > { %8485 = dma.done.wait (!%p8296_p4), %s6980_s13, 1024  }
 0x37c   : > { %8487 = vsyncadd (!%p8296_p4), %s6980_s13, 4294966272  ;;  %p15_p7 = scmp.ge.s32.totalorder %s8564_s21, 6   ;;  %s10703_s15 = smov %s8494_s16 }
 0x37d   : > { %s10704_s16 = smov %s8498_s17  ;;  %s10705_s17 = smov %s8575_s24 }
 0x37e   : > { %s10706_s18 = smov %s8564_s21  ;;  %17 = sbr.rel (!%p15_p7) target bundleno = 4 (0x4), region = 78 }
 0x385   :  { %6985 = vsyncpa [#allocation3], 1 }
 0x386   :  { %6987 = vsyncpa [#allocation3 + $0x1], 1 }
 0x387   :  { %6988 = vsyncpa [#allocation4], 1 }
 0x388   :  { %6990 = vsyncpa [#allocation4 + $0x1], 1 }

</bundles_post_ra>
